<compile_context>
chip_gen: v7x
topology: tpu7x:2x2x1
jax: 0.10.0
libtpu: 0.0.40
codegen_flags: <defaults>
</compile_context>

<pallas_src>
import functools

import jax
import jax.numpy as jnp
import numpy as np
from jax.experimental import pallas as pl
from jax.experimental.pallas import tpu as pltpu


# ----------------------------------------------------------------------------
# Fused kernel: channel attention -> spatial attention -> out = sa * x
# ----------------------------------------------------------------------------
def cbam_fused_kernel(x_ref, w1t_ref, w2_ref, wconv_ref, mask_ref, o_ref, *,
                      ksize, width):
    """One batch tile.

    x_ref    : (block_b, C, HW)   input block (VMEM)
    w1t_ref  : (C, C_hid)         first 1x1-conv weight, transposed (VMEM)
    w2_ref   : (C, C_hid)         second 1x1-conv weight (VMEM)
    wconv_ref: (2*ksize*ksize,)   7x7 conv weights, [mean taps | max taps] (SMEM)
    mask_ref : (ksize*ksize, HW)  per-tap 0/1 validity mask (VMEM)
    o_ref    : (block_b, C, HW)   output block (VMEM)
    """
    bt, C, HW = x_ref.shape
    c_hid = w1t_ref.shape[1]
    P = (ksize - 1) // 2
    kk = ksize * ksize
    inv_hw = 1.0 / float(HW)
    inv_c = 1.0 / float(C)

    x = x_ref[...].astype(jnp.float32)                        # (bt, C, HW)

    # ---- channel attention: ca = sigmoid(MLP(avgpool) + MLP(maxpool)) -----
    # Pooled vectors kept as (bt, C, 1) (C on sublanes) so no relayout is
    # needed before gating x; the tiny shared MLP runs on the VPU/XLU as
    # c_hid broadcast-multiply + sublane-reduce steps (no MXU micro-matmuls).
    avg = jnp.sum(x, axis=2, keepdims=True) * inv_hw          # (bt, C, 1)
    mx = jnp.max(x, axis=2, keepdims=True)                    # (bt, C, 1)

    def shared_mlp(v):                                        # (bt, C, 1) -> (bt, C, 1)
        y = jnp.zeros_like(v)
        for j in range(c_hid):                                # static, C // ratio steps
            hj = jnp.sum(v * w1t_ref[:, j:j + 1],
                         axis=1, keepdims=True)               # (bt, 1, 1)
            hj = jnp.maximum(hj, 0.0)                         # ReLU
            y = y + hj * w2_ref[:, j:j + 1]                   # (bt, C, 1)
        return y

    ca = jax.nn.sigmoid(shared_mlp(avg) + shared_mlp(mx))     # (bt, C, 1)
    t = x * ca                                                # channel-refined (bt, C, HW)

    # ---- spatial attention on t: sigmoid(7x7 conv of [mean_c; max_c]) ------
    s_avg = jnp.sum(t, axis=1) * inv_c                        # (bt, HW)
    s_max = jnp.max(t, axis=1)                                # (bt, HW)

    acc = jnp.zeros((bt, HW), jnp.float32)
    for i in range(ksize):                                    # static 7x7 tap loop
        for j in range(ksize):
            tap = i * ksize + j
            s = (i - P) * width + (j - P)                     # flat shift of this tap
            sh = (-s) % HW                                    # pltpu.roll == jnp.roll semantics
            if sh == 0:
                ra, rm = s_avg, s_max
            else:
                ra = pltpu.roll(s_avg, sh, axis=1)            # XLU lane rotate
                rm = pltpu.roll(s_max, sh, axis=1)
            w_a = wconv_ref[tap]                              # scalar (SMEM), mean-map tap
            w_m = wconv_ref[kk + tap]                         # scalar (SMEM), max-map tap
            m = mask_ref[tap:tap + 1, :]                      # (1, HW) 0/1 validity
            acc = acc + (ra * w_a + rm * w_m) * m
    sa = jax.nn.sigmoid(acc)                                  # (bt, HW)

    # Gate the ORIGINAL x (matches the PyTorch forward: temp = sa * x).
    o_ref[...] = (x * sa[:, None, :]).astype(o_ref.dtype)


# ----------------------------------------------------------------------------
# Host-side helpers
# ----------------------------------------------------------------------------
def _tap_validity_mask(H, W, ksize):
    """(ksize*ksize, H*W) 0/1 mask.  Tap (i, j) at flat output position p is
    valid iff its input position (row+i-P, col+j-P) lies inside the image.
    Covers BOTH the horizontal wrap of the flattened roll and the vertical
    zero-padding border of the 7x7 conv."""
    P = (ksize - 1) // 2
    row = np.arange(H * W) // W
    col = np.arange(H * W) % W
    m = np.zeros((ksize * ksize, H * W), np.float32)
    for i in range(ksize):
        for j in range(ksize):
            di, dj = i - P, j - P
            ok = ((row + di >= 0) & (row + di < H) &
                  (col + dj >= 0) & (col + dj < W))
            m[i * ksize + j] = ok.astype(np.float32)
    return m


def _pick_block_b(batch, channels, hw, itemsize):
    """Batch-tile picker.

    Keeps one block under ~4 MiB (f32-equivalent) so that double-buffered
    in+out (~4x block bytes) plus the f32 in-kernel temporaries stay well
    below a 32 MiB scoped-VMEM budget (v7x is the tightest: 64 MiB physical,
    32 MiB scoped per TensorCore).  Keeps the grid length >= 2 whenever
    batch >= 2 so both v7x TensorCores get work, and prefers >= 4 pipelined
    steps once blocks are already >= ~1 MiB.
    """
    bytes_per_image = channels * hw * max(int(itemsize), 4)   # f32 temporaries dominate
    budget = 4 * 1024 * 1024
    min_grid = 2 if batch >= 2 else 1
    best = 1
    for bb in range(1, batch + 1):
        if batch % bb:
            continue
        if bb * bytes_per_image > budget:
            continue
        if batch // bb < min_grid:
            continue
        best = bb
    if batch // best < 4:                      # prefer >=4 steps if blocks stay >= 1 MiB
        for bb in range(best - 1, 0, -1):
            if batch % bb:
                continue
            if batch // bb >= 4 and bb * bytes_per_image >= (1 << 20):
                best = bb
                break
    return best


# ----------------------------------------------------------------------------
# Wrapper
# ----------------------------------------------------------------------------
def cbam_pallas(x, w1, w2, wconv, *, ksize=7, block_b=None):
    B, C, H, W = x.shape
    c_hid = w1.shape[0]
    HW = H * W
    itemsize = jnp.dtype(x.dtype).itemsize

    if block_b is None:
        block_b = _pick_block_b(B, C, HW, itemsize)
    if B % block_b:
        raise ValueError("block_b must divide the batch size")

    # Lane-dense views / layout plumbing done in the XLA wrapper (cheap).
    x3 = x.reshape(B, C, HW)
    w1t = jnp.transpose(w1).astype(jnp.float32)               # (C, c_hid)
    w2f = w2.astype(jnp.float32)                              # (C, c_hid)
    wconv_flat = wconv.reshape(-1).astype(jnp.float32)        # (2*ksize*ksize,)
    tap_mask = jnp.asarray(_tap_validity_mask(H, W, ksize))   # (ksize*ksize, HW)

    flops = int(B * C * HW * 7                                # pooling + gating + reductions
                + B * HW * ksize * ksize * 5                  # 7x7 conv taps
                + B * 8 * C * c_hid)                          # shared MLP (avg + max)
    transcendentals = int(B * (C + HW))                       # sigmoids
    bytes_accessed = int(2 * B * C * HW * itemsize
                         + (w1.size + w2.size + wconv.size + tap_mask.size) * 4)

    kernel = functools.partial(cbam_fused_kernel, ksize=ksize, width=W)

    out3 = pl.pallas_call(
        kernel,
        out_shape=jax.ShapeDtypeStruct((B, C, HW), x.dtype),
        grid=(B // block_b,),
        in_specs=[
            pl.BlockSpec((block_b, C, HW), lambda b: (b, 0, 0)),
            pl.BlockSpec((C, c_hid), lambda b: (0, 0)),
            pl.BlockSpec((C, c_hid), lambda b: (0, 0)),
            pl.BlockSpec(memory_space=pltpu.MemorySpace.SMEM),
            pl.BlockSpec((ksize * ksize, HW), lambda b: (0, 0)),
        ],
        out_specs=pl.BlockSpec((block_b, C, HW), lambda b: (b, 0, 0)),
        compiler_params=pltpu.CompilerParams(
            dimension_semantics=("parallel",),
            vmem_limit_bytes=32 * 1024 * 1024),
        cost_estimate=pl.CostEstimate(
            flops=flops, transcendentals=transcendentals,
            bytes_accessed=bytes_accessed),
    )(x3, w1t, w2f, wconv_flat, tap_mask)

    return out3.reshape(B, C, H, W)


# ----------------------------------------------------------------------------
# Pure-JAX reference (for the correctness check)
# ----------------------------------------------------------------------------
def cbam_ref(x, w1, w2, wconv):
    avg = jnp.mean(x, axis=(2, 3))                            # (B, C)
    mx = jnp.max(x, axis=(2, 3))                              # (B, C)

    def mlp(v):
        h = jnp.maximum(v @ w1.T, 0.0)
        return h @ w2.T

    ca = jax.nn.sigmoid(mlp(avg) + mlp(mx))[:, :, None, None]  # (B, C, 1, 1)
    temp = ca * x

    s_avg = jnp.mean(temp, axis=1, keepdims=True)
    s_max = jnp.max(temp, axis=1, keepdims=True)
    cat = jnp.concatenate([s_avg, s_max], axis=1)             # (B, 2, H, W)
    conv = jax.lax.conv_general_dilated(
        cat, wconv, window_strides=(1, 1), padding=((3, 3), (3, 3)),
        dimension_numbers=("NCHW", "OIHW", "NCHW"))
    sa = jax.nn.sigmoid(conv)                                 # (B, 1, H, W)
    return sa * x                                             # gate the ORIGINAL x


if __name__ == "__main__":
    B, C, H, W = 4, 32, 16, 16        # channel=32 so channel // 16 = 2
    ratio = 16
    c_hid = C // ratio

    key = jax.random.PRNGKey(0)
    k1, k2, k3, kx = jax.random.split(key, 4)

    # Deterministic synthetic parameters (bias-free convs, per module __init__).
    w1 = jax.random.normal(k1, (c_hid, C), jnp.float32) * 0.1       # 1x1 conv C -> C/16
    w2 = jax.random.normal(k2, (C, c_hid), jnp.float32) * 0.1       # 1x1 conv C/16 -> C
    wconv = jax.random.normal(k3, (1, 2, 7, 7), jnp.float32) * 0.1  # 7x7 conv, 2 -> 1
    x = jax.random.normal(kx, (B, C, H, W), jnp.float32)

    out = jax.block_until_ready(jax.jit(cbam_pallas)(x, w1, w2, wconv))
    ref = jax.block_until_ready(cbam_ref(x, w1, w2, wconv))
    np.testing.assert_allclose(np.asarray(out), np.asarray(ref),
                               rtol=1e-4, atol=1e-5)

    # TODO(synk): the print(temp.shape) debug statements in CBAM.forward are
    # intentionally omitted (no effect on numerics).
    print("KERNEL_OK")
</pallas_src>

<mosaic_0001>
module attributes {stable_mosaic.version = 11 : i64} {
  func.func @cbam_fused_kernel(%arg0: i32, %arg1: memref<2x32x256xf32, #tpu.memory_space<vmem>>, %arg2: memref<32x2xf32, #tpu.memory_space<vmem>>, %arg3: memref<32x2xf32, #tpu.memory_space<vmem>>, %arg4: memref<98xf32, #tpu.memory_space<smem>>, %arg5: memref<49x256xf32, #tpu.memory_space<vmem>>, %arg6: memref<2x32x256xf32, #tpu.memory_space<vmem>>) attributes {dimension_semantics = [#tpu.dimension_semantics<parallel>], iteration_bounds = array<i64: 2>, scalar_prefetch = 0 : i64, scratch_operands = 0 : i64, tpu.core_type = #tpu.core_type<tc>, window_params = [{transform_indices = @transform_0, window_bounds = array<i64: 2, 32, 256>}, {pipeline_mode = #tpu.pipeline_mode<synchronous>, transform_indices = @transform_1, window_bounds = array<i64: 32, 2>}, {pipeline_mode = #tpu.pipeline_mode<synchronous>, transform_indices = @transform_2, window_bounds = array<i64: 32, 2>}, {transform_indices = @transform_3, window_bounds = array<i64: 98>}, {pipeline_mode = #tpu.pipeline_mode<synchronous>, transform_indices = @transform_4, window_bounds = array<i64: 49, 256>}, {transform_indices = @transform_5, window_bounds = array<i64: 2, 32, 256>}]} {
    %c0 = arith.constant 0 : index
    %c0_0 = arith.constant 0 : index
    %c0_1 = arith.constant 0 : index
    %0 = vector.load %arg1[%c0, %c0_0, %c0_1] : memref<2x32x256xf32, #tpu.memory_space<vmem>>, vector<2x32x256xf32>
    %cst = arith.constant dense<0.000000e+00> : vector<2x32xf32>
    %1 = vector.multi_reduction <add>, %0, %cst [2] : vector<2x32x256xf32> to vector<2x32xf32>
    %2 = vector.shape_cast %1 : vector<2x32xf32> to vector<2x32x1xf32>
    %cst_2 = arith.constant 3.906250e-03 : f32
    %3 = vector.broadcast %cst_2 : f32 to vector<2x32x1xf32>
    %4 = arith.mulf %2, %3 : vector<2x32x1xf32>
    %cst_3 = arith.constant dense<0xFF800000> : vector<2x32xf32>
    %5 = vector.multi_reduction <maximumf>, %0, %cst_3 [2] : vector<2x32x256xf32> to vector<2x32xf32>
    %6 = vector.shape_cast %5 : vector<2x32xf32> to vector<2x32x1xf32>
    %cst_4 = arith.constant 0.000000e+00 : f32
    %7 = vector.broadcast %cst_4 : f32 to vector<2x32x1xf32>
    %c0_5 = arith.constant 0 : index
    %c0_6 = arith.constant 0 : index
    %8 = vector.load %arg2[%c0_5, %c0_6] : memref<32x2xf32, #tpu.memory_space<vmem>>, vector<32x1xf32>
    %9 = vector.shape_cast %8 : vector<32x1xf32> to vector<1x32x1xf32>
    %10 = vector.broadcast %9 : vector<1x32x1xf32> to vector<2x32x1xf32>
    %11 = arith.mulf %4, %10 : vector<2x32x1xf32>
    %cst_7 = arith.constant dense<0.000000e+00> : vector<2x1xf32>
    %12 = vector.multi_reduction <add>, %11, %cst_7 [1] : vector<2x32x1xf32> to vector<2x1xf32>
    %13 = vector.shape_cast %12 : vector<2x1xf32> to vector<2x1x1xf32>
    %cst_8 = arith.constant 0.000000e+00 : f32
    %14 = vector.broadcast %cst_8 : f32 to vector<2x1x1xf32>
    %15 = arith.maximumf %13, %14 : vector<2x1x1xf32>
    %c0_9 = arith.constant 0 : index
    %c0_10 = arith.constant 0 : index
    %16 = vector.load %arg3[%c0_9, %c0_10] : memref<32x2xf32, #tpu.memory_space<vmem>>, vector<32x1xf32>
    %17 = vector.shape_cast %16 : vector<32x1xf32> to vector<1x32x1xf32>
    %18 = vector.broadcast %15 : vector<2x1x1xf32> to vector<2x32x1xf32>
    %19 = vector.broadcast %17 : vector<1x32x1xf32> to vector<2x32x1xf32>
    %20 = arith.mulf %18, %19 : vector<2x32x1xf32>
    %21 = arith.addf %7, %20 : vector<2x32x1xf32>
    %c0_11 = arith.constant 0 : index
    %c1 = arith.constant 1 : index
    %22 = vector.load %arg2[%c0_11, %c1] : memref<32x2xf32, #tpu.memory_space<vmem>>, vector<32x1xf32>
    %23 = vector.shape_cast %22 : vector<32x1xf32> to vector<1x32x1xf32>
    %24 = vector.broadcast %23 : vector<1x32x1xf32> to vector<2x32x1xf32>
    %25 = arith.mulf %4, %24 : vector<2x32x1xf32>
    %cst_12 = arith.constant dense<0.000000e+00> : vector<2x1xf32>
    %26 = vector.multi_reduction <add>, %25, %cst_12 [1] : vector<2x32x1xf32> to vector<2x1xf32>
    %27 = vector.shape_cast %26 : vector<2x1xf32> to vector<2x1x1xf32>
    %cst_13 = arith.constant 0.000000e+00 : f32
    %28 = vector.broadcast %cst_13 : f32 to vector<2x1x1xf32>
    %29 = arith.maximumf %27, %28 : vector<2x1x1xf32>
    %c0_14 = arith.constant 0 : index
    %c1_15 = arith.constant 1 : index
    %30 = vector.load %arg3[%c0_14, %c1_15] : memref<32x2xf32, #tpu.memory_space<vmem>>, vector<32x1xf32>
    %31 = vector.shape_cast %30 : vector<32x1xf32> to vector<1x32x1xf32>
    %32 = vector.broadcast %29 : vector<2x1x1xf32> to vector<2x32x1xf32>
    %33 = vector.broadcast %31 : vector<1x32x1xf32> to vector<2x32x1xf32>
    %34 = arith.mulf %32, %33 : vector<2x32x1xf32>
    %35 = arith.addf %21, %34 : vector<2x32x1xf32>
    %cst_16 = arith.constant 0.000000e+00 : f32
    %36 = vector.broadcast %cst_16 : f32 to vector<2x32x1xf32>
    %c0_17 = arith.constant 0 : index
    %c0_18 = arith.constant 0 : index
    %37 = vector.load %arg2[%c0_17, %c0_18] : memref<32x2xf32, #tpu.memory_space<vmem>>, vector<32x1xf32>
    %38 = vector.shape_cast %37 : vector<32x1xf32> to vector<1x32x1xf32>
    %39 = vector.broadcast %38 : vector<1x32x1xf32> to vector<2x32x1xf32>
    %40 = arith.mulf %6, %39 : vector<2x32x1xf32>
    %cst_19 = arith.constant dense<0.000000e+00> : vector<2x1xf32>
    %41 = vector.multi_reduction <add>, %40, %cst_19 [1] : vector<2x32x1xf32> to vector<2x1xf32>
    %42 = vector.shape_cast %41 : vector<2x1xf32> to vector<2x1x1xf32>
    %cst_20 = arith.constant 0.000000e+00 : f32
    %43 = vector.broadcast %cst_20 : f32 to vector<2x1x1xf32>
    %44 = arith.maximumf %42, %43 : vector<2x1x1xf32>
    %c0_21 = arith.constant 0 : index
    %c0_22 = arith.constant 0 : index
    %45 = vector.load %arg3[%c0_21, %c0_22] : memref<32x2xf32, #tpu.memory_space<vmem>>, vector<32x1xf32>
    %46 = vector.shape_cast %45 : vector<32x1xf32> to vector<1x32x1xf32>
    %47 = vector.broadcast %44 : vector<2x1x1xf32> to vector<2x32x1xf32>
    %48 = vector.broadcast %46 : vector<1x32x1xf32> to vector<2x32x1xf32>
    %49 = arith.mulf %47, %48 : vector<2x32x1xf32>
    %50 = arith.addf %36, %49 : vector<2x32x1xf32>
    %c0_23 = arith.constant 0 : index
    %c1_24 = arith.constant 1 : index
    %51 = vector.load %arg2[%c0_23, %c1_24] : memref<32x2xf32, #tpu.memory_space<vmem>>, vector<32x1xf32>
    %52 = vector.shape_cast %51 : vector<32x1xf32> to vector<1x32x1xf32>
    %53 = vector.broadcast %52 : vector<1x32x1xf32> to vector<2x32x1xf32>
    %54 = arith.mulf %6, %53 : vector<2x32x1xf32>
    %cst_25 = arith.constant dense<0.000000e+00> : vector<2x1xf32>
    %55 = vector.multi_reduction <add>, %54, %cst_25 [1] : vector<2x32x1xf32> to vector<2x1xf32>
    %56 = vector.shape_cast %55 : vector<2x1xf32> to vector<2x1x1xf32>
    %cst_26 = arith.constant 0.000000e+00 : f32
    %57 = vector.broadcast %cst_26 : f32 to vector<2x1x1xf32>
    %58 = arith.maximumf %56, %57 : vector<2x1x1xf32>
    %c0_27 = arith.constant 0 : index
    %c1_28 = arith.constant 1 : index
    %59 = vector.load %arg3[%c0_27, %c1_28] : memref<32x2xf32, #tpu.memory_space<vmem>>, vector<32x1xf32>
    %60 = vector.shape_cast %59 : vector<32x1xf32> to vector<1x32x1xf32>
    %61 = vector.broadcast %58 : vector<2x1x1xf32> to vector<2x32x1xf32>
    %62 = vector.broadcast %60 : vector<1x32x1xf32> to vector<2x32x1xf32>
    %63 = arith.mulf %61, %62 : vector<2x32x1xf32>
    %64 = arith.addf %50, %63 : vector<2x32x1xf32>
    %65 = arith.addf %35, %64 : vector<2x32x1xf32>
    %66 = arith.negf %65 : vector<2x32x1xf32>
    %67 = math.exp %66 : vector<2x32x1xf32>
    %cst_29 = arith.constant 1.000000e+00 : f32
    %68 = vector.broadcast %cst_29 : f32 to vector<2x32x1xf32>
    %69 = arith.addf %68, %67 : vector<2x32x1xf32>
    %70 = arith.divf %68, %69 : vector<2x32x1xf32>
    %71 = vector.broadcast %70 : vector<2x32x1xf32> to vector<2x32x256xf32>
    %72 = arith.mulf %0, %71 : vector<2x32x256xf32>
    %cst_30 = arith.constant dense<0.000000e+00> : vector<2x256xf32>
    %73 = vector.multi_reduction <add>, %72, %cst_30 [1] : vector<2x32x256xf32> to vector<2x256xf32>
    %cst_31 = arith.constant 3.125000e-02 : f32
    %74 = vector.broadcast %cst_31 : f32 to vector<2x256xf32>
    %75 = arith.mulf %73, %74 : vector<2x256xf32>
    %cst_32 = arith.constant dense<0xFF800000> : vector<2x256xf32>
    %76 = vector.multi_reduction <maximumf>, %72, %cst_32 [1] : vector<2x32x256xf32> to vector<2x256xf32>
    %cst_33 = arith.constant 0.000000e+00 : f32
    %77 = vector.broadcast %cst_33 : f32 to vector<2x256xf32>
    %c51_i32 = arith.constant 51 : i32
    %78 = tpu.dynamic_rotate %75 by %c51_i32 dim 1 : vector<2x256xf32>, i32 -> vector<2x256xf32>
    %c51_i32_34 = arith.constant 51 : i32
    %79 = tpu.dynamic_rotate %76 by %c51_i32_34 dim 1 : vector<2x256xf32>, i32 -> vector<2x256xf32>
    %c0_35 = arith.constant 0 : index
    %80 = memref.load %arg4[%c0_35] : memref<98xf32, #tpu.memory_space<smem>>
    %c49 = arith.constant 49 : index
    %81 = memref.load %arg4[%c49] : memref<98xf32, #tpu.memory_space<smem>>
    %c0_36 = arith.constant 0 : index
    %c0_37 = arith.constant 0 : index
    %82 = vector.load %arg5[%c0_36, %c0_37] : memref<49x256xf32, #tpu.memory_space<vmem>>, vector<1x256xf32>
    %83 = vector.broadcast %80 : f32 to vector<2x256xf32>
    %84 = arith.mulf %78, %83 : vector<2x256xf32>
    %85 = vector.broadcast %81 : f32 to vector<2x256xf32>
    %86 = arith.mulf %79, %85 : vector<2x256xf32>
    %87 = arith.addf %84, %86 : vector<2x256xf32>
    %88 = vector.broadcast %82 : vector<1x256xf32> to vector<2x256xf32>
    %89 = arith.mulf %87, %88 : vector<2x256xf32>
    %90 = arith.addf %77, %89 : vector<2x256xf32>
    %c50_i32 = arith.constant 50 : i32
    %91 = tpu.dynamic_rotate %75 by %c50_i32 dim 1 : vector<2x256xf32>, i32 -> vector<2x256xf32>
    %c50_i32_38 = arith.constant 50 : i32
    %92 = tpu.dynamic_rotate %76 by %c50_i32_38 dim 1 : vector<2x256xf32>, i32 -> vector<2x256xf32>
    %c1_39 = arith.constant 1 : index
    %93 = memref.load %arg4[%c1_39] : memref<98xf32, #tpu.memory_space<smem>>
    %c50 = arith.constant 50 : index
    %94 = memref.load %arg4[%c50] : memref<98xf32, #tpu.memory_space<smem>>
    %c1_40 = arith.constant 1 : index
    %c0_41 = arith.constant 0 : index
    %95 = vector.load %arg5[%c1_40, %c0_41] : memref<49x256xf32, #tpu.memory_space<vmem>>, vector<1x256xf32>
    %96 = vector.broadcast %93 : f32 to vector<2x256xf32>
    %97 = arith.mulf %91, %96 : vector<2x256xf32>
    %98 = vector.broadcast %94 : f32 to vector<2x256xf32>
    %99 = arith.mulf %92, %98 : vector<2x256xf32>
    %100 = arith.addf %97, %99 : vector<2x256xf32>
    %101 = vector.broadcast %95 : vector<1x256xf32> to vector<2x256xf32>
    %102 = arith.mulf %100, %101 : vector<2x256xf32>
    %103 = arith.addf %90, %102 : vector<2x256xf32>
    %c49_i32 = arith.constant 49 : i32
    %104 = tpu.dynamic_rotate %75 by %c49_i32 dim 1 : vector<2x256xf32>, i32 -> vector<2x256xf32>
    %c49_i32_42 = arith.constant 49 : i32
    %105 = tpu.dynamic_rotate %76 by %c49_i32_42 dim 1 : vector<2x256xf32>, i32 -> vector<2x256xf32>
    %c2 = arith.constant 2 : index
    %106 = memref.load %arg4[%c2] : memref<98xf32, #tpu.memory_space<smem>>
    %c51 = arith.constant 51 : index
    %107 = memref.load %arg4[%c51] : memref<98xf32, #tpu.memory_space<smem>>
    %c2_43 = arith.constant 2 : index
    %c0_44 = arith.constant 0 : index
    %108 = vector.load %arg5[%c2_43, %c0_44] : memref<49x256xf32, #tpu.memory_space<vmem>>, vector<1x256xf32>
    %109 = vector.broadcast %106 : f32 to vector<2x256xf32>
    %110 = arith.mulf %104, %109 : vector<2x256xf32>
    %111 = vector.broadcast %107 : f32 to vector<2x256xf32>
    %112 = arith.mulf %105, %111 : vector<2x256xf32>
    %113 = arith.addf %110, %112 : vector<2x256xf32>
    %114 = vector.broadcast %108 : vector<1x256xf32> to vector<2x256xf32>
    %115 = arith.mulf %113, %114 : vector<2x256xf32>
    %116 = arith.addf %103, %115 : vector<2x256xf32>
    %c48_i32 = arith.constant 48 : i32
    %117 = tpu.dynamic_rotate %75 by %c48_i32 dim 1 : vector<2x256xf32>, i32 -> vector<2x256xf32>
    %c48_i32_45 = arith.constant 48 : i32
    %118 = tpu.dynamic_rotate %76 by %c48_i32_45 dim 1 : vector<2x256xf32>, i32 -> vector<2x256xf32>
    %c3 = arith.constant 3 : index
    %119 = memref.load %arg4[%c3] : memref<98xf32, #tpu.memory_space<smem>>
    %c52 = arith.constant 52 : index
    %120 = memref.load %arg4[%c52] : memref<98xf32, #tpu.memory_space<smem>>
    %c3_46 = arith.constant 3 : index
    %c0_47 = arith.constant 0 : index
    %121 = vector.load %arg5[%c3_46, %c0_47] : memref<49x256xf32, #tpu.memory_space<vmem>>, vector<1x256xf32>
    %122 = vector.broadcast %119 : f32 to vector<2x256xf32>
    %123 = arith.mulf %117, %122 : vector<2x256xf32>
    %124 = vector.broadcast %120 : f32 to vector<2x256xf32>
    %125 = arith.mulf %118, %124 : vector<2x256xf32>
    %126 = arith.addf %123, %125 : vector<2x256xf32>
    %127 = vector.broadcast %121 : vector<1x256xf32> to vector<2x256xf32>
    %128 = arith.mulf %126, %127 : vector<2x256xf32>
    %129 = arith.addf %116, %128 : vector<2x256xf32>
    %c47_i32 = arith.constant 47 : i32
    %130 = tpu.dynamic_rotate %75 by %c47_i32 dim 1 : vector<2x256xf32>, i32 -> vector<2x256xf32>
    %c47_i32_48 = arith.constant 47 : i32
    %131 = tpu.dynamic_rotate %76 by %c47_i32_48 dim 1 : vector<2x256xf32>, i32 -> vector<2x256xf32>
    %c4 = arith.constant 4 : index
    %132 = memref.load %arg4[%c4] : memref<98xf32, #tpu.memory_space<smem>>
    %c53 = arith.constant 53 : index
    %133 = memref.load %arg4[%c53] : memref<98xf32, #tpu.memory_space<smem>>
    %c4_49 = arith.constant 4 : index
    %c0_50 = arith.constant 0 : index
    %134 = vector.load %arg5[%c4_49, %c0_50] : memref<49x256xf32, #tpu.memory_space<vmem>>, vector<1x256xf32>
    %135 = vector.broadcast %132 : f32 to vector<2x256xf32>
    %136 = arith.mulf %130, %135 : vector<2x256xf32>
    %137 = vector.broadcast %133 : f32 to vector<2x256xf32>
    %138 = arith.mulf %131, %137 : vector<2x256xf32>
    %139 = arith.addf %136, %138 : vector<2x256xf32>
    %140 = vector.broadcast %134 : vector<1x256xf32> to vector<2x256xf32>
    %141 = arith.mulf %139, %140 : vector<2x256xf32>
    %142 = arith.addf %129, %141 : vector<2x256xf32>
    %c46_i32 = arith.constant 46 : i32
    %143 = tpu.dynamic_rotate %75 by %c46_i32 dim 1 : vector<2x256xf32>, i32 -> vector<2x256xf32>
    %c46_i32_51 = arith.constant 46 : i32
    %144 = tpu.dynamic_rotate %76 by %c46_i32_51 dim 1 : vector<2x256xf32>, i32 -> vector<2x256xf32>
    %c5 = arith.constant 5 : index
    %145 = memref.load %arg4[%c5] : memref<98xf32, #tpu.memory_space<smem>>
    %c54 = arith.constant 54 : index
    %146 = memref.load %arg4[%c54] : memref<98xf32, #tpu.memory_space<smem>>
    %c5_52 = arith.constant 5 : index
    %c0_53 = arith.constant 0 : index
    %147 = vector.load %arg5[%c5_52, %c0_53] : memref<49x256xf32, #tpu.memory_space<vmem>>, vector<1x256xf32>
    %148 = vector.broadcast %145 : f32 to vector<2x256xf32>
    %149 = arith.mulf %143, %148 : vector<2x256xf32>
    %150 = vector.broadcast %146 : f32 to vector<2x256xf32>
    %151 = arith.mulf %144, %150 : vector<2x256xf32>
    %152 = arith.addf %149, %151 : vector<2x256xf32>
    %153 = vector.broadcast %147 : vector<1x256xf32> to vector<2x256xf32>
    %154 = arith.mulf %152, %153 : vector<2x256xf32>
    %155 = arith.addf %142, %154 : vector<2x256xf32>
    %c45_i32 = arith.constant 45 : i32
    %156 = tpu.dynamic_rotate %75 by %c45_i32 dim 1 : vector<2x256xf32>, i32 -> vector<2x256xf32>
    %c45_i32_54 = arith.constant 45 : i32
    %157 = tpu.dynamic_rotate %76 by %c45_i32_54 dim 1 : vector<2x256xf32>, i32 -> vector<2x256xf32>
    %c6 = arith.constant 6 : index
    %158 = memref.load %arg4[%c6] : memref<98xf32, #tpu.memory_space<smem>>
    %c55 = arith.constant 55 : index
    %159 = memref.load %arg4[%c55] : memref<98xf32, #tpu.memory_space<smem>>
    %c6_55 = arith.constant 6 : index
    %c0_56 = arith.constant 0 : index
    %160 = vector.load %arg5[%c6_55, %c0_56] : memref<49x256xf32, #tpu.memory_space<vmem>>, vector<1x256xf32>
    %161 = vector.broadcast %158 : f32 to vector<2x256xf32>
    %162 = arith.mulf %156, %161 : vector<2x256xf32>
    %163 = vector.broadcast %159 : f32 to vector<2x256xf32>
    %164 = arith.mulf %157, %163 : vector<2x256xf32>
    %165 = arith.addf %162, %164 : vector<2x256xf32>
    %166 = vector.broadcast %160 : vector<1x256xf32> to vector<2x256xf32>
    %167 = arith.mulf %165, %166 : vector<2x256xf32>
    %168 = arith.addf %155, %167 : vector<2x256xf32>
    %c35_i32 = arith.constant 35 : i32
    %169 = tpu.dynamic_rotate %75 by %c35_i32 dim 1 : vector<2x256xf32>, i32 -> vector<2x256xf32>
    %c35_i32_57 = arith.constant 35 : i32
    %170 = tpu.dynamic_rotate %76 by %c35_i32_57 dim 1 : vector<2x256xf32>, i32 -> vector<2x256xf32>
    %c7 = arith.constant 7 : index
    %171 = memref.load %arg4[%c7] : memref<98xf32, #tpu.memory_space<smem>>
    %c56 = arith.constant 56 : index
    %172 = memref.load %arg4[%c56] : memref<98xf32, #tpu.memory_space<smem>>
    %c7_58 = arith.constant 7 : index
    %c0_59 = arith.constant 0 : index
    %173 = vector.load %arg5[%c7_58, %c0_59] : memref<49x256xf32, #tpu.memory_space<vmem>>, vector<1x256xf32>
    %174 = vector.broadcast %171 : f32 to vector<2x256xf32>
    %175 = arith.mulf %169, %174 : vector<2x256xf32>
    %176 = vector.broadcast %172 : f32 to vector<2x256xf32>
    %177 = arith.mulf %170, %176 : vector<2x256xf32>
    %178 = arith.addf %175, %177 : vector<2x256xf32>
    %179 = vector.broadcast %173 : vector<1x256xf32> to vector<2x256xf32>
    %180 = arith.mulf %178, %179 : vector<2x256xf32>
    %181 = arith.addf %168, %180 : vector<2x256xf32>
    %c34_i32 = arith.constant 34 : i32
    %182 = tpu.dynamic_rotate %75 by %c34_i32 dim 1 : vector<2x256xf32>, i32 -> vector<2x256xf32>
    %c34_i32_60 = arith.constant 34 : i32
    %183 = tpu.dynamic_rotate %76 by %c34_i32_60 dim 1 : vector<2x256xf32>, i32 -> vector<2x256xf32>
    %c8 = arith.constant 8 : index
    %184 = memref.load %arg4[%c8] : memref<98xf32, #tpu.memory_space<smem>>
    %c57 = arith.constant 57 : index
    %185 = memref.load %arg4[%c57] : memref<98xf32, #tpu.memory_space<smem>>
    %c8_61 = arith.constant 8 : index
    %c0_62 = arith.constant 0 : index
    %186 = vector.load %arg5[%c8_61, %c0_62] : memref<49x256xf32, #tpu.memory_space<vmem>>, vector<1x256xf32>
    %187 = vector.broadcast %184 : f32 to vector<2x256xf32>
    %188 = arith.mulf %182, %187 : vector<2x256xf32>
    %189 = vector.broadcast %185 : f32 to vector<2x256xf32>
    %190 = arith.mulf %183, %189 : vector<2x256xf32>
    %191 = arith.addf %188, %190 : vector<2x256xf32>
    %192 = vector.broadcast %186 : vector<1x256xf32> to vector<2x256xf32>
    %193 = arith.mulf %191, %192 : vector<2x256xf32>
    %194 = arith.addf %181, %193 : vector<2x256xf32>
    %c33_i32 = arith.constant 33 : i32
    %195 = tpu.dynamic_rotate %75 by %c33_i32 dim 1 : vector<2x256xf32>, i32 -> vector<2x256xf32>
    %c33_i32_63 = arith.constant 33 : i32
    %196 = tpu.dynamic_rotate %76 by %c33_i32_63 dim 1 : vector<2x256xf32>, i32 -> vector<2x256xf32>
    %c9 = arith.constant 9 : index
    %197 = memref.load %arg4[%c9] : memref<98xf32, #tpu.memory_space<smem>>
    %c58 = arith.constant 58 : index
    %198 = memref.load %arg4[%c58] : memref<98xf32, #tpu.memory_space<smem>>
    %c9_64 = arith.constant 9 : index
    %c0_65 = arith.constant 0 : index
    %199 = vector.load %arg5[%c9_64, %c0_65] : memref<49x256xf32, #tpu.memory_space<vmem>>, vector<1x256xf32>
    %200 = vector.broadcast %197 : f32 to vector<2x256xf32>
    %201 = arith.mulf %195, %200 : vector<2x256xf32>
    %202 = vector.broadcast %198 : f32 to vector<2x256xf32>
    %203 = arith.mulf %196, %202 : vector<2x256xf32>
    %204 = arith.addf %201, %203 : vector<2x256xf32>
    %205 = vector.broadcast %199 : vector<1x256xf32> to vector<2x256xf32>
    %206 = arith.mulf %204, %205 : vector<2x256xf32>
    %207 = arith.addf %194, %206 : vector<2x256xf32>
    %c32_i32 = arith.constant 32 : i32
    %208 = tpu.dynamic_rotate %75 by %c32_i32 dim 1 : vector<2x256xf32>, i32 -> vector<2x256xf32>
    %c32_i32_66 = arith.constant 32 : i32
    %209 = tpu.dynamic_rotate %76 by %c32_i32_66 dim 1 : vector<2x256xf32>, i32 -> vector<2x256xf32>
    %c10 = arith.constant 10 : index
    %210 = memref.load %arg4[%c10] : memref<98xf32, #tpu.memory_space<smem>>
    %c59 = arith.constant 59 : index
    %211 = memref.load %arg4[%c59] : memref<98xf32, #tpu.memory_space<smem>>
    %c10_67 = arith.constant 10 : index
    %c0_68 = arith.constant 0 : index
    %212 = vector.load %arg5[%c10_67, %c0_68] : memref<49x256xf32, #tpu.memory_space<vmem>>, vector<1x256xf32>
    %213 = vector.broadcast %210 : f32 to vector<2x256xf32>
    %214 = arith.mulf %208, %213 : vector<2x256xf32>
    %215 = vector.broadcast %211 : f32 to vector<2x256xf32>
    %216 = arith.mulf %209, %215 : vector<2x256xf32>
    %217 = arith.addf %214, %216 : vector<2x256xf32>
    %218 = vector.broadcast %212 : vector<1x256xf32> to vector<2x256xf32>
    %219 = arith.mulf %217, %218 : vector<2x256xf32>
    %220 = arith.addf %207, %219 : vector<2x256xf32>
    %c31_i32 = arith.constant 31 : i32
    %221 = tpu.dynamic_rotate %75 by %c31_i32 dim 1 : vector<2x256xf32>, i32 -> vector<2x256xf32>
    %c31_i32_69 = arith.constant 31 : i32
    %222 = tpu.dynamic_rotate %76 by %c31_i32_69 dim 1 : vector<2x256xf32>, i32 -> vector<2x256xf32>
    %c11 = arith.constant 11 : index
    %223 = memref.load %arg4[%c11] : memref<98xf32, #tpu.memory_space<smem>>
    %c60 = arith.constant 60 : index
    %224 = memref.load %arg4[%c60] : memref<98xf32, #tpu.memory_space<smem>>
    %c11_70 = arith.constant 11 : index
    %c0_71 = arith.constant 0 : index
    %225 = vector.load %arg5[%c11_70, %c0_71] : memref<49x256xf32, #tpu.memory_space<vmem>>, vector<1x256xf32>
    %226 = vector.broadcast %223 : f32 to vector<2x256xf32>
    %227 = arith.mulf %221, %226 : vector<2x256xf32>
    %228 = vector.broadcast %224 : f32 to vector<2x256xf32>
    %229 = arith.mulf %222, %228 : vector<2x256xf32>
    %230 = arith.addf %227, %229 : vector<2x256xf32>
    %231 = vector.broadcast %225 : vector<1x256xf32> to vector<2x256xf32>
    %232 = arith.mulf %230, %231 : vector<2x256xf32>
    %233 = arith.addf %220, %232 : vector<2x256xf32>
    %c30_i32 = arith.constant 30 : i32
    %234 = tpu.dynamic_rotate %75 by %c30_i32 dim 1 : vector<2x256xf32>, i32 -> vector<2x256xf32>
    %c30_i32_72 = arith.constant 30 : i32
    %235 = tpu.dynamic_rotate %76 by %c30_i32_72 dim 1 : vector<2x256xf32>, i32 -> vector<2x256xf32>
    %c12 = arith.constant 12 : index
    %236 = memref.load %arg4[%c12] : memref<98xf32, #tpu.memory_space<smem>>
    %c61 = arith.constant 61 : index
    %237 = memref.load %arg4[%c61] : memref<98xf32, #tpu.memory_space<smem>>
    %c12_73 = arith.constant 12 : index
    %c0_74 = arith.constant 0 : index
    %238 = vector.load %arg5[%c12_73, %c0_74] : memref<49x256xf32, #tpu.memory_space<vmem>>, vector<1x256xf32>
    %239 = vector.broadcast %236 : f32 to vector<2x256xf32>
    %240 = arith.mulf %234, %239 : vector<2x256xf32>
    %241 = vector.broadcast %237 : f32 to vector<2x256xf32>
    %242 = arith.mulf %235, %241 : vector<2x256xf32>
    %243 = arith.addf %240, %242 : vector<2x256xf32>
    %244 = vector.broadcast %238 : vector<1x256xf32> to vector<2x256xf32>
    %245 = arith.mulf %243, %244 : vector<2x256xf32>
    %246 = arith.addf %233, %245 : vector<2x256xf32>
    %c29_i32 = arith.constant 29 : i32
    %247 = tpu.dynamic_rotate %75 by %c29_i32 dim 1 : vector<2x256xf32>, i32 -> vector<2x256xf32>
    %c29_i32_75 = arith.constant 29 : i32
    %248 = tpu.dynamic_rotate %76 by %c29_i32_75 dim 1 : vector<2x256xf32>, i32 -> vector<2x256xf32>
    %c13 = arith.constant 13 : index
    %249 = memref.load %arg4[%c13] : memref<98xf32, #tpu.memory_space<smem>>
    %c62 = arith.constant 62 : index
    %250 = memref.load %arg4[%c62] : memref<98xf32, #tpu.memory_space<smem>>
    %c13_76 = arith.constant 13 : index
    %c0_77 = arith.constant 0 : index
    %251 = vector.load %arg5[%c13_76, %c0_77] : memref<49x256xf32, #tpu.memory_space<vmem>>, vector<1x256xf32>
    %252 = vector.broadcast %249 : f32 to vector<2x256xf32>
    %253 = arith.mulf %247, %252 : vector<2x256xf32>
    %254 = vector.broadcast %250 : f32 to vector<2x256xf32>
    %255 = arith.mulf %248, %254 : vector<2x256xf32>
    %256 = arith.addf %253, %255 : vector<2x256xf32>
    %257 = vector.broadcast %251 : vector<1x256xf32> to vector<2x256xf32>
    %258 = arith.mulf %256, %257 : vector<2x256xf32>
    %259 = arith.addf %246, %258 : vector<2x256xf32>
    %c19_i32 = arith.constant 19 : i32
    %260 = tpu.dynamic_rotate %75 by %c19_i32 dim 1 : vector<2x256xf32>, i32 -> vector<2x256xf32>
    %c19_i32_78 = arith.constant 19 : i32
    %261 = tpu.dynamic_rotate %76 by %c19_i32_78 dim 1 : vector<2x256xf32>, i32 -> vector<2x256xf32>
    %c14 = arith.constant 14 : index
    %262 = memref.load %arg4[%c14] : memref<98xf32, #tpu.memory_space<smem>>
    %c63 = arith.constant 63 : index
    %263 = memref.load %arg4[%c63] : memref<98xf32, #tpu.memory_space<smem>>
    %c14_79 = arith.constant 14 : index
    %c0_80 = arith.constant 0 : index
    %264 = vector.load %arg5[%c14_79, %c0_80] : memref<49x256xf32, #tpu.memory_space<vmem>>, vector<1x256xf32>
    %265 = vector.broadcast %262 : f32 to vector<2x256xf32>
    %266 = arith.mulf %260, %265 : vector<2x256xf32>
    %267 = vector.broadcast %263 : f32 to vector<2x256xf32>
    %268 = arith.mulf %261, %267 : vector<2x256xf32>
    %269 = arith.addf %266, %268 : vector<2x256xf32>
    %270 = vector.broadcast %264 : vector<1x256xf32> to vector<2x256xf32>
    %271 = arith.mulf %269, %270 : vector<2x256xf32>
    %272 = arith.addf %259, %271 : vector<2x256xf32>
    %c18_i32 = arith.constant 18 : i32
    %273 = tpu.dynamic_rotate %75 by %c18_i32 dim 1 : vector<2x256xf32>, i32 -> vector<2x256xf32>
    %c18_i32_81 = arith.constant 18 : i32
    %274 = tpu.dynamic_rotate %76 by %c18_i32_81 dim 1 : vector<2x256xf32>, i32 -> vector<2x256xf32>
    %c15 = arith.constant 15 : index
    %275 = memref.load %arg4[%c15] : memref<98xf32, #tpu.memory_space<smem>>
    %c64 = arith.constant 64 : index
    %276 = memref.load %arg4[%c64] : memref<98xf32, #tpu.memory_space<smem>>
    %c15_82 = arith.constant 15 : index
    %c0_83 = arith.constant 0 : index
    %277 = vector.load %arg5[%c15_82, %c0_83] : memref<49x256xf32, #tpu.memory_space<vmem>>, vector<1x256xf32>
    %278 = vector.broadcast %275 : f32 to vector<2x256xf32>
    %279 = arith.mulf %273, %278 : vector<2x256xf32>
    %280 = vector.broadcast %276 : f32 to vector<2x256xf32>
    %281 = arith.mulf %274, %280 : vector<2x256xf32>
    %282 = arith.addf %279, %281 : vector<2x256xf32>
    %283 = vector.broadcast %277 : vector<1x256xf32> to vector<2x256xf32>
    %284 = arith.mulf %282, %283 : vector<2x256xf32>
    %285 = arith.addf %272, %284 : vector<2x256xf32>
    %c17_i32 = arith.constant 17 : i32
    %286 = tpu.dynamic_rotate %75 by %c17_i32 dim 1 : vector<2x256xf32>, i32 -> vector<2x256xf32>
    %c17_i32_84 = arith.constant 17 : i32
    %287 = tpu.dynamic_rotate %76 by %c17_i32_84 dim 1 : vector<2x256xf32>, i32 -> vector<2x256xf32>
    %c16 = arith.constant 16 : index
    %288 = memref.load %arg4[%c16] : memref<98xf32, #tpu.memory_space<smem>>
    %c65 = arith.constant 65 : index
    %289 = memref.load %arg4[%c65] : memref<98xf32, #tpu.memory_space<smem>>
    %c16_85 = arith.constant 16 : index
    %c0_86 = arith.constant 0 : index
    %290 = vector.load %arg5[%c16_85, %c0_86] : memref<49x256xf32, #tpu.memory_space<vmem>>, vector<1x256xf32>
    %291 = vector.broadcast %288 : f32 to vector<2x256xf32>
    %292 = arith.mulf %286, %291 : vector<2x256xf32>
    %293 = vector.broadcast %289 : f32 to vector<2x256xf32>
    %294 = arith.mulf %287, %293 : vector<2x256xf32>
    %295 = arith.addf %292, %294 : vector<2x256xf32>
    %296 = vector.broadcast %290 : vector<1x256xf32> to vector<2x256xf32>
    %297 = arith.mulf %295, %296 : vector<2x256xf32>
    %298 = arith.addf %285, %297 : vector<2x256xf32>
    %c16_i32 = arith.constant 16 : i32
    %299 = tpu.dynamic_rotate %75 by %c16_i32 dim 1 : vector<2x256xf32>, i32 -> vector<2x256xf32>
    %c16_i32_87 = arith.constant 16 : i32
    %300 = tpu.dynamic_rotate %76 by %c16_i32_87 dim 1 : vector<2x256xf32>, i32 -> vector<2x256xf32>
    %c17 = arith.constant 17 : index
    %301 = memref.load %arg4[%c17] : memref<98xf32, #tpu.memory_space<smem>>
    %c66 = arith.constant 66 : index
    %302 = memref.load %arg4[%c66] : memref<98xf32, #tpu.memory_space<smem>>
    %c17_88 = arith.constant 17 : index
    %c0_89 = arith.constant 0 : index
    %303 = vector.load %arg5[%c17_88, %c0_89] : memref<49x256xf32, #tpu.memory_space<vmem>>, vector<1x256xf32>
    %304 = vector.broadcast %301 : f32 to vector<2x256xf32>
    %305 = arith.mulf %299, %304 : vector<2x256xf32>
    %306 = vector.broadcast %302 : f32 to vector<2x256xf32>
    %307 = arith.mulf %300, %306 : vector<2x256xf32>
    %308 = arith.addf %305, %307 : vector<2x256xf32>
    %309 = vector.broadcast %303 : vector<1x256xf32> to vector<2x256xf32>
    %310 = arith.mulf %308, %309 : vector<2x256xf32>
    %311 = arith.addf %298, %310 : vector<2x256xf32>
    %c15_i32 = arith.constant 15 : i32
    %312 = tpu.dynamic_rotate %75 by %c15_i32 dim 1 : vector<2x256xf32>, i32 -> vector<2x256xf32>
    %c15_i32_90 = arith.constant 15 : i32
    %313 = tpu.dynamic_rotate %76 by %c15_i32_90 dim 1 : vector<2x256xf32>, i32 -> vector<2x256xf32>
    %c18 = arith.constant 18 : index
    %314 = memref.load %arg4[%c18] : memref<98xf32, #tpu.memory_space<smem>>
    %c67 = arith.constant 67 : index
    %315 = memref.load %arg4[%c67] : memref<98xf32, #tpu.memory_space<smem>>
    %c18_91 = arith.constant 18 : index
    %c0_92 = arith.constant 0 : index
    %316 = vector.load %arg5[%c18_91, %c0_92] : memref<49x256xf32, #tpu.memory_space<vmem>>, vector<1x256xf32>
    %317 = vector.broadcast %314 : f32 to vector<2x256xf32>
    %318 = arith.mulf %312, %317 : vector<2x256xf32>
    %319 = vector.broadcast %315 : f32 to vector<2x256xf32>
    %320 = arith.mulf %313, %319 : vector<2x256xf32>
    %321 = arith.addf %318, %320 : vector<2x256xf32>
    %322 = vector.broadcast %316 : vector<1x256xf32> to vector<2x256xf32>
    %323 = arith.mulf %321, %322 : vector<2x256xf32>
    %324 = arith.addf %311, %323 : vector<2x256xf32>
    %c14_i32 = arith.constant 14 : i32
    %325 = tpu.dynamic_rotate %75 by %c14_i32 dim 1 : vector<2x256xf32>, i32 -> vector<2x256xf32>
    %c14_i32_93 = arith.constant 14 : i32
    %326 = tpu.dynamic_rotate %76 by %c14_i32_93 dim 1 : vector<2x256xf32>, i32 -> vector<2x256xf32>
    %c19 = arith.constant 19 : index
    %327 = memref.load %arg4[%c19] : memref<98xf32, #tpu.memory_space<smem>>
    %c68 = arith.constant 68 : index
    %328 = memref.load %arg4[%c68] : memref<98xf32, #tpu.memory_space<smem>>
    %c19_94 = arith.constant 19 : index
    %c0_95 = arith.constant 0 : index
    %329 = vector.load %arg5[%c19_94, %c0_95] : memref<49x256xf32, #tpu.memory_space<vmem>>, vector<1x256xf32>
    %330 = vector.broadcast %327 : f32 to vector<2x256xf32>
    %331 = arith.mulf %325, %330 : vector<2x256xf32>
    %332 = vector.broadcast %328 : f32 to vector<2x256xf32>
    %333 = arith.mulf %326, %332 : vector<2x256xf32>
    %334 = arith.addf %331, %333 : vector<2x256xf32>
    %335 = vector.broadcast %329 : vector<1x256xf32> to vector<2x256xf32>
    %336 = arith.mulf %334, %335 : vector<2x256xf32>
    %337 = arith.addf %324, %336 : vector<2x256xf32>
    %c13_i32 = arith.constant 13 : i32
    %338 = tpu.dynamic_rotate %75 by %c13_i32 dim 1 : vector<2x256xf32>, i32 -> vector<2x256xf32>
    %c13_i32_96 = arith.constant 13 : i32
    %339 = tpu.dynamic_rotate %76 by %c13_i32_96 dim 1 : vector<2x256xf32>, i32 -> vector<2x256xf32>
    %c20 = arith.constant 20 : index
    %340 = memref.load %arg4[%c20] : memref<98xf32, #tpu.memory_space<smem>>
    %c69 = arith.constant 69 : index
    %341 = memref.load %arg4[%c69] : memref<98xf32, #tpu.memory_space<smem>>
    %c20_97 = arith.constant 20 : index
    %c0_98 = arith.constant 0 : index
    %342 = vector.load %arg5[%c20_97, %c0_98] : memref<49x256xf32, #tpu.memory_space<vmem>>, vector<1x256xf32>
    %343 = vector.broadcast %340 : f32 to vector<2x256xf32>
    %344 = arith.mulf %338, %343 : vector<2x256xf32>
    %345 = vector.broadcast %341 : f32 to vector<2x256xf32>
    %346 = arith.mulf %339, %345 : vector<2x256xf32>
    %347 = arith.addf %344, %346 : vector<2x256xf32>
    %348 = vector.broadcast %342 : vector<1x256xf32> to vector<2x256xf32>
    %349 = arith.mulf %347, %348 : vector<2x256xf32>
    %350 = arith.addf %337, %349 : vector<2x256xf32>
    %c3_i32 = arith.constant 3 : i32
    %351 = tpu.dynamic_rotate %75 by %c3_i32 dim 1 : vector<2x256xf32>, i32 -> vector<2x256xf32>
    %c3_i32_99 = arith.constant 3 : i32
    %352 = tpu.dynamic_rotate %76 by %c3_i32_99 dim 1 : vector<2x256xf32>, i32 -> vector<2x256xf32>
    %c21 = arith.constant 21 : index
    %353 = memref.load %arg4[%c21] : memref<98xf32, #tpu.memory_space<smem>>
    %c70 = arith.constant 70 : index
    %354 = memref.load %arg4[%c70] : memref<98xf32, #tpu.memory_space<smem>>
    %c21_100 = arith.constant 21 : index
    %c0_101 = arith.constant 0 : index
    %355 = vector.load %arg5[%c21_100, %c0_101] : memref<49x256xf32, #tpu.memory_space<vmem>>, vector<1x256xf32>
    %356 = vector.broadcast %353 : f32 to vector<2x256xf32>
    %357 = arith.mulf %351, %356 : vector<2x256xf32>
    %358 = vector.broadcast %354 : f32 to vector<2x256xf32>
    %359 = arith.mulf %352, %358 : vector<2x256xf32>
    %360 = arith.addf %357, %359 : vector<2x256xf32>
    %361 = vector.broadcast %355 : vector<1x256xf32> to vector<2x256xf32>
    %362 = arith.mulf %360, %361 : vector<2x256xf32>
    %363 = arith.addf %350, %362 : vector<2x256xf32>
    %c2_i32 = arith.constant 2 : i32
    %364 = tpu.dynamic_rotate %75 by %c2_i32 dim 1 : vector<2x256xf32>, i32 -> vector<2x256xf32>
    %c2_i32_102 = arith.constant 2 : i32
    %365 = tpu.dynamic_rotate %76 by %c2_i32_102 dim 1 : vector<2x256xf32>, i32 -> vector<2x256xf32>
    %c22 = arith.constant 22 : index
    %366 = memref.load %arg4[%c22] : memref<98xf32, #tpu.memory_space<smem>>
    %c71 = arith.constant 71 : index
    %367 = memref.load %arg4[%c71] : memref<98xf32, #tpu.memory_space<smem>>
    %c22_103 = arith.constant 22 : index
    %c0_104 = arith.constant 0 : index
    %368 = vector.load %arg5[%c22_103, %c0_104] : memref<49x256xf32, #tpu.memory_space<vmem>>, vector<1x256xf32>
    %369 = vector.broadcast %366 : f32 to vector<2x256xf32>
    %370 = arith.mulf %364, %369 : vector<2x256xf32>
    %371 = vector.broadcast %367 : f32 to vector<2x256xf32>
    %372 = arith.mulf %365, %371 : vector<2x256xf32>
    %373 = arith.addf %370, %372 : vector<2x256xf32>
    %374 = vector.broadcast %368 : vector<1x256xf32> to vector<2x256xf32>
    %375 = arith.mulf %373, %374 : vector<2x256xf32>
    %376 = arith.addf %363, %375 : vector<2x256xf32>
    %c1_i32 = arith.constant 1 : i32
    %377 = tpu.dynamic_rotate %75 by %c1_i32 dim 1 : vector<2x256xf32>, i32 -> vector<2x256xf32>
    %c1_i32_105 = arith.constant 1 : i32
    %378 = tpu.dynamic_rotate %76 by %c1_i32_105 dim 1 : vector<2x256xf32>, i32 -> vector<2x256xf32>
    %c23 = arith.constant 23 : index
    %379 = memref.load %arg4[%c23] : memref<98xf32, #tpu.memory_space<smem>>
    %c72 = arith.constant 72 : index
    %380 = memref.load %arg4[%c72] : memref<98xf32, #tpu.memory_space<smem>>
    %c23_106 = arith.constant 23 : index
    %c0_107 = arith.constant 0 : index
    %381 = vector.load %arg5[%c23_106, %c0_107] : memref<49x256xf32, #tpu.memory_space<vmem>>, vector<1x256xf32>
    %382 = vector.broadcast %379 : f32 to vector<2x256xf32>
    %383 = arith.mulf %377, %382 : vector<2x256xf32>
    %384 = vector.broadcast %380 : f32 to vector<2x256xf32>
    %385 = arith.mulf %378, %384 : vector<2x256xf32>
    %386 = arith.addf %383, %385 : vector<2x256xf32>
    %387 = vector.broadcast %381 : vector<1x256xf32> to vector<2x256xf32>
    %388 = arith.mulf %386, %387 : vector<2x256xf32>
    %389 = arith.addf %376, %388 : vector<2x256xf32>
    %c24 = arith.constant 24 : index
    %390 = memref.load %arg4[%c24] : memref<98xf32, #tpu.memory_space<smem>>
    %c73 = arith.constant 73 : index
    %391 = memref.load %arg4[%c73] : memref<98xf32, #tpu.memory_space<smem>>
    %c24_108 = arith.constant 24 : index
    %c0_109 = arith.constant 0 : index
    %392 = vector.load %arg5[%c24_108, %c0_109] : memref<49x256xf32, #tpu.memory_space<vmem>>, vector<1x256xf32>
    %393 = vector.broadcast %390 : f32 to vector<2x256xf32>
    %394 = arith.mulf %75, %393 : vector<2x256xf32>
    %395 = vector.broadcast %391 : f32 to vector<2x256xf32>
    %396 = arith.mulf %76, %395 : vector<2x256xf32>
    %397 = arith.addf %394, %396 : vector<2x256xf32>
    %398 = vector.broadcast %392 : vector<1x256xf32> to vector<2x256xf32>
    %399 = arith.mulf %397, %398 : vector<2x256xf32>
    %400 = arith.addf %389, %399 : vector<2x256xf32>
    %c255_i32 = arith.constant 255 : i32
    %401 = tpu.dynamic_rotate %75 by %c255_i32 dim 1 : vector<2x256xf32>, i32 -> vector<2x256xf32>
    %c255_i32_110 = arith.constant 255 : i32
    %402 = tpu.dynamic_rotate %76 by %c255_i32_110 dim 1 : vector<2x256xf32>, i32 -> vector<2x256xf32>
    %c25 = arith.constant 25 : index
    %403 = memref.load %arg4[%c25] : memref<98xf32, #tpu.memory_space<smem>>
    %c74 = arith.constant 74 : index
    %404 = memref.load %arg4[%c74] : memref<98xf32, #tpu.memory_space<smem>>
    %c25_111 = arith.constant 25 : index
    %c0_112 = arith.constant 0 : index
    %405 = vector.load %arg5[%c25_111, %c0_112] : memref<49x256xf32, #tpu.memory_space<vmem>>, vector<1x256xf32>
    %406 = vector.broadcast %403 : f32 to vector<2x256xf32>
    %407 = arith.mulf %401, %406 : vector<2x256xf32>
    %408 = vector.broadcast %404 : f32 to vector<2x256xf32>
    %409 = arith.mulf %402, %408 : vector<2x256xf32>
    %410 = arith.addf %407, %409 : vector<2x256xf32>
    %411 = vector.broadcast %405 : vector<1x256xf32> to vector<2x256xf32>
    %412 = arith.mulf %410, %411 : vector<2x256xf32>
    %413 = arith.addf %400, %412 : vector<2x256xf32>
    %c254_i32 = arith.constant 254 : i32
    %414 = tpu.dynamic_rotate %75 by %c254_i32 dim 1 : vector<2x256xf32>, i32 -> vector<2x256xf32>
    %c254_i32_113 = arith.constant 254 : i32
    %415 = tpu.dynamic_rotate %76 by %c254_i32_113 dim 1 : vector<2x256xf32>, i32 -> vector<2x256xf32>
    %c26 = arith.constant 26 : index
    %416 = memref.load %arg4[%c26] : memref<98xf32, #tpu.memory_space<smem>>
    %c75 = arith.constant 75 : index
    %417 = memref.load %arg4[%c75] : memref<98xf32, #tpu.memory_space<smem>>
    %c26_114 = arith.constant 26 : index
    %c0_115 = arith.constant 0 : index
    %418 = vector.load %arg5[%c26_114, %c0_115] : memref<49x256xf32, #tpu.memory_space<vmem>>, vector<1x256xf32>
    %419 = vector.broadcast %416 : f32 to vector<2x256xf32>
    %420 = arith.mulf %414, %419 : vector<2x256xf32>
    %421 = vector.broadcast %417 : f32 to vector<2x256xf32>
    %422 = arith.mulf %415, %421 : vector<2x256xf32>
    %423 = arith.addf %420, %422 : vector<2x256xf32>
    %424 = vector.broadcast %418 : vector<1x256xf32> to vector<2x256xf32>
    %425 = arith.mulf %423, %424 : vector<2x256xf32>
    %426 = arith.addf %413, %425 : vector<2x256xf32>
    %c253_i32 = arith.constant 253 : i32
    %427 = tpu.dynamic_rotate %75 by %c253_i32 dim 1 : vector<2x256xf32>, i32 -> vector<2x256xf32>
    %c253_i32_116 = arith.constant 253 : i32
    %428 = tpu.dynamic_rotate %76 by %c253_i32_116 dim 1 : vector<2x256xf32>, i32 -> vector<2x256xf32>
    %c27 = arith.constant 27 : index
    %429 = memref.load %arg4[%c27] : memref<98xf32, #tpu.memory_space<smem>>
    %c76 = arith.constant 76 : index
    %430 = memref.load %arg4[%c76] : memref<98xf32, #tpu.memory_space<smem>>
    %c27_117 = arith.constant 27 : index
    %c0_118 = arith.constant 0 : index
    %431 = vector.load %arg5[%c27_117, %c0_118] : memref<49x256xf32, #tpu.memory_space<vmem>>, vector<1x256xf32>
    %432 = vector.broadcast %429 : f32 to vector<2x256xf32>
    %433 = arith.mulf %427, %432 : vector<2x256xf32>
    %434 = vector.broadcast %430 : f32 to vector<2x256xf32>
    %435 = arith.mulf %428, %434 : vector<2x256xf32>
    %436 = arith.addf %433, %435 : vector<2x256xf32>
    %437 = vector.broadcast %431 : vector<1x256xf32> to vector<2x256xf32>
    %438 = arith.mulf %436, %437 : vector<2x256xf32>
    %439 = arith.addf %426, %438 : vector<2x256xf32>
    %c243_i32 = arith.constant 243 : i32
    %440 = tpu.dynamic_rotate %75 by %c243_i32 dim 1 : vector<2x256xf32>, i32 -> vector<2x256xf32>
    %c243_i32_119 = arith.constant 243 : i32
    %441 = tpu.dynamic_rotate %76 by %c243_i32_119 dim 1 : vector<2x256xf32>, i32 -> vector<2x256xf32>
    %c28 = arith.constant 28 : index
    %442 = memref.load %arg4[%c28] : memref<98xf32, #tpu.memory_space<smem>>
    %c77 = arith.constant 77 : index
    %443 = memref.load %arg4[%c77] : memref<98xf32, #tpu.memory_space<smem>>
    %c28_120 = arith.constant 28 : index
    %c0_121 = arith.constant 0 : index
    %444 = vector.load %arg5[%c28_120, %c0_121] : memref<49x256xf32, #tpu.memory_space<vmem>>, vector<1x256xf32>
    %445 = vector.broadcast %442 : f32 to vector<2x256xf32>
    %446 = arith.mulf %440, %445 : vector<2x256xf32>
    %447 = vector.broadcast %443 : f32 to vector<2x256xf32>
    %448 = arith.mulf %441, %447 : vector<2x256xf32>
    %449 = arith.addf %446, %448 : vector<2x256xf32>
    %450 = vector.broadcast %444 : vector<1x256xf32> to vector<2x256xf32>
    %451 = arith.mulf %449, %450 : vector<2x256xf32>
    %452 = arith.addf %439, %451 : vector<2x256xf32>
    %c242_i32 = arith.constant 242 : i32
    %453 = tpu.dynamic_rotate %75 by %c242_i32 dim 1 : vector<2x256xf32>, i32 -> vector<2x256xf32>
    %c242_i32_122 = arith.constant 242 : i32
    %454 = tpu.dynamic_rotate %76 by %c242_i32_122 dim 1 : vector<2x256xf32>, i32 -> vector<2x256xf32>
    %c29 = arith.constant 29 : index
    %455 = memref.load %arg4[%c29] : memref<98xf32, #tpu.memory_space<smem>>
    %c78 = arith.constant 78 : index
    %456 = memref.load %arg4[%c78] : memref<98xf32, #tpu.memory_space<smem>>
    %c29_123 = arith.constant 29 : index
    %c0_124 = arith.constant 0 : index
    %457 = vector.load %arg5[%c29_123, %c0_124] : memref<49x256xf32, #tpu.memory_space<vmem>>, vector<1x256xf32>
    %458 = vector.broadcast %455 : f32 to vector<2x256xf32>
    %459 = arith.mulf %453, %458 : vector<2x256xf32>
    %460 = vector.broadcast %456 : f32 to vector<2x256xf32>
    %461 = arith.mulf %454, %460 : vector<2x256xf32>
    %462 = arith.addf %459, %461 : vector<2x256xf32>
    %463 = vector.broadcast %457 : vector<1x256xf32> to vector<2x256xf32>
    %464 = arith.mulf %462, %463 : vector<2x256xf32>
    %465 = arith.addf %452, %464 : vector<2x256xf32>
    %c241_i32 = arith.constant 241 : i32
    %466 = tpu.dynamic_rotate %75 by %c241_i32 dim 1 : vector<2x256xf32>, i32 -> vector<2x256xf32>
    %c241_i32_125 = arith.constant 241 : i32
    %467 = tpu.dynamic_rotate %76 by %c241_i32_125 dim 1 : vector<2x256xf32>, i32 -> vector<2x256xf32>
    %c30 = arith.constant 30 : index
    %468 = memref.load %arg4[%c30] : memref<98xf32, #tpu.memory_space<smem>>
    %c79 = arith.constant 79 : index
    %469 = memref.load %arg4[%c79] : memref<98xf32, #tpu.memory_space<smem>>
    %c30_126 = arith.constant 30 : index
    %c0_127 = arith.constant 0 : index
    %470 = vector.load %arg5[%c30_126, %c0_127] : memref<49x256xf32, #tpu.memory_space<vmem>>, vector<1x256xf32>
    %471 = vector.broadcast %468 : f32 to vector<2x256xf32>
    %472 = arith.mulf %466, %471 : vector<2x256xf32>
    %473 = vector.broadcast %469 : f32 to vector<2x256xf32>
    %474 = arith.mulf %467, %473 : vector<2x256xf32>
    %475 = arith.addf %472, %474 : vector<2x256xf32>
    %476 = vector.broadcast %470 : vector<1x256xf32> to vector<2x256xf32>
    %477 = arith.mulf %475, %476 : vector<2x256xf32>
    %478 = arith.addf %465, %477 : vector<2x256xf32>
    %c240_i32 = arith.constant 240 : i32
    %479 = tpu.dynamic_rotate %75 by %c240_i32 dim 1 : vector<2x256xf32>, i32 -> vector<2x256xf32>
    %c240_i32_128 = arith.constant 240 : i32
    %480 = tpu.dynamic_rotate %76 by %c240_i32_128 dim 1 : vector<2x256xf32>, i32 -> vector<2x256xf32>
    %c31 = arith.constant 31 : index
    %481 = memref.load %arg4[%c31] : memref<98xf32, #tpu.memory_space<smem>>
    %c80 = arith.constant 80 : index
    %482 = memref.load %arg4[%c80] : memref<98xf32, #tpu.memory_space<smem>>
    %c31_129 = arith.constant 31 : index
    %c0_130 = arith.constant 0 : index
    %483 = vector.load %arg5[%c31_129, %c0_130] : memref<49x256xf32, #tpu.memory_space<vmem>>, vector<1x256xf32>
    %484 = vector.broadcast %481 : f32 to vector<2x256xf32>
    %485 = arith.mulf %479, %484 : vector<2x256xf32>
    %486 = vector.broadcast %482 : f32 to vector<2x256xf32>
    %487 = arith.mulf %480, %486 : vector<2x256xf32>
    %488 = arith.addf %485, %487 : vector<2x256xf32>
    %489 = vector.broadcast %483 : vector<1x256xf32> to vector<2x256xf32>
    %490 = arith.mulf %488, %489 : vector<2x256xf32>
    %491 = arith.addf %478, %490 : vector<2x256xf32>
    %c239_i32 = arith.constant 239 : i32
    %492 = tpu.dynamic_rotate %75 by %c239_i32 dim 1 : vector<2x256xf32>, i32 -> vector<2x256xf32>
    %c239_i32_131 = arith.constant 239 : i32
    %493 = tpu.dynamic_rotate %76 by %c239_i32_131 dim 1 : vector<2x256xf32>, i32 -> vector<2x256xf32>
    %c32 = arith.constant 32 : index
    %494 = memref.load %arg4[%c32] : memref<98xf32, #tpu.memory_space<smem>>
    %c81 = arith.constant 81 : index
    %495 = memref.load %arg4[%c81] : memref<98xf32, #tpu.memory_space<smem>>
    %c32_132 = arith.constant 32 : index
    %c0_133 = arith.constant 0 : index
    %496 = vector.load %arg5[%c32_132, %c0_133] : memref<49x256xf32, #tpu.memory_space<vmem>>, vector<1x256xf32>
    %497 = vector.broadcast %494 : f32 to vector<2x256xf32>
    %498 = arith.mulf %492, %497 : vector<2x256xf32>
    %499 = vector.broadcast %495 : f32 to vector<2x256xf32>
    %500 = arith.mulf %493, %499 : vector<2x256xf32>
    %501 = arith.addf %498, %500 : vector<2x256xf32>
    %502 = vector.broadcast %496 : vector<1x256xf32> to vector<2x256xf32>
    %503 = arith.mulf %501, %502 : vector<2x256xf32>
    %504 = arith.addf %491, %503 : vector<2x256xf32>
    %c238_i32 = arith.constant 238 : i32
    %505 = tpu.dynamic_rotate %75 by %c238_i32 dim 1 : vector<2x256xf32>, i32 -> vector<2x256xf32>
    %c238_i32_134 = arith.constant 238 : i32
    %506 = tpu.dynamic_rotate %76 by %c238_i32_134 dim 1 : vector<2x256xf32>, i32 -> vector<2x256xf32>
    %c33 = arith.constant 33 : index
    %507 = memref.load %arg4[%c33] : memref<98xf32, #tpu.memory_space<smem>>
    %c82 = arith.constant 82 : index
    %508 = memref.load %arg4[%c82] : memref<98xf32, #tpu.memory_space<smem>>
    %c33_135 = arith.constant 33 : index
    %c0_136 = arith.constant 0 : index
    %509 = vector.load %arg5[%c33_135, %c0_136] : memref<49x256xf32, #tpu.memory_space<vmem>>, vector<1x256xf32>
    %510 = vector.broadcast %507 : f32 to vector<2x256xf32>
    %511 = arith.mulf %505, %510 : vector<2x256xf32>
    %512 = vector.broadcast %508 : f32 to vector<2x256xf32>
    %513 = arith.mulf %506, %512 : vector<2x256xf32>
    %514 = arith.addf %511, %513 : vector<2x256xf32>
    %515 = vector.broadcast %509 : vector<1x256xf32> to vector<2x256xf32>
    %516 = arith.mulf %514, %515 : vector<2x256xf32>
    %517 = arith.addf %504, %516 : vector<2x256xf32>
    %c237_i32 = arith.constant 237 : i32
    %518 = tpu.dynamic_rotate %75 by %c237_i32 dim 1 : vector<2x256xf32>, i32 -> vector<2x256xf32>
    %c237_i32_137 = arith.constant 237 : i32
    %519 = tpu.dynamic_rotate %76 by %c237_i32_137 dim 1 : vector<2x256xf32>, i32 -> vector<2x256xf32>
    %c34 = arith.constant 34 : index
    %520 = memref.load %arg4[%c34] : memref<98xf32, #tpu.memory_space<smem>>
    %c83 = arith.constant 83 : index
    %521 = memref.load %arg4[%c83] : memref<98xf32, #tpu.memory_space<smem>>
    %c34_138 = arith.constant 34 : index
    %c0_139 = arith.constant 0 : index
    %522 = vector.load %arg5[%c34_138, %c0_139] : memref<49x256xf32, #tpu.memory_space<vmem>>, vector<1x256xf32>
    %523 = vector.broadcast %520 : f32 to vector<2x256xf32>
    %524 = arith.mulf %518, %523 : vector<2x256xf32>
    %525 = vector.broadcast %521 : f32 to vector<2x256xf32>
    %526 = arith.mulf %519, %525 : vector<2x256xf32>
    %527 = arith.addf %524, %526 : vector<2x256xf32>
    %528 = vector.broadcast %522 : vector<1x256xf32> to vector<2x256xf32>
    %529 = arith.mulf %527, %528 : vector<2x256xf32>
    %530 = arith.addf %517, %529 : vector<2x256xf32>
    %c227_i32 = arith.constant 227 : i32
    %531 = tpu.dynamic_rotate %75 by %c227_i32 dim 1 : vector<2x256xf32>, i32 -> vector<2x256xf32>
    %c227_i32_140 = arith.constant 227 : i32
    %532 = tpu.dynamic_rotate %76 by %c227_i32_140 dim 1 : vector<2x256xf32>, i32 -> vector<2x256xf32>
    %c35 = arith.constant 35 : index
    %533 = memref.load %arg4[%c35] : memref<98xf32, #tpu.memory_space<smem>>
    %c84 = arith.constant 84 : index
    %534 = memref.load %arg4[%c84] : memref<98xf32, #tpu.memory_space<smem>>
    %c35_141 = arith.constant 35 : index
    %c0_142 = arith.constant 0 : index
    %535 = vector.load %arg5[%c35_141, %c0_142] : memref<49x256xf32, #tpu.memory_space<vmem>>, vector<1x256xf32>
    %536 = vector.broadcast %533 : f32 to vector<2x256xf32>
    %537 = arith.mulf %531, %536 : vector<2x256xf32>
    %538 = vector.broadcast %534 : f32 to vector<2x256xf32>
    %539 = arith.mulf %532, %538 : vector<2x256xf32>
    %540 = arith.addf %537, %539 : vector<2x256xf32>
    %541 = vector.broadcast %535 : vector<1x256xf32> to vector<2x256xf32>
    %542 = arith.mulf %540, %541 : vector<2x256xf32>
    %543 = arith.addf %530, %542 : vector<2x256xf32>
    %c226_i32 = arith.constant 226 : i32
    %544 = tpu.dynamic_rotate %75 by %c226_i32 dim 1 : vector<2x256xf32>, i32 -> vector<2x256xf32>
    %c226_i32_143 = arith.constant 226 : i32
    %545 = tpu.dynamic_rotate %76 by %c226_i32_143 dim 1 : vector<2x256xf32>, i32 -> vector<2x256xf32>
    %c36 = arith.constant 36 : index
    %546 = memref.load %arg4[%c36] : memref<98xf32, #tpu.memory_space<smem>>
    %c85 = arith.constant 85 : index
    %547 = memref.load %arg4[%c85] : memref<98xf32, #tpu.memory_space<smem>>
    %c36_144 = arith.constant 36 : index
    %c0_145 = arith.constant 0 : index
    %548 = vector.load %arg5[%c36_144, %c0_145] : memref<49x256xf32, #tpu.memory_space<vmem>>, vector<1x256xf32>
    %549 = vector.broadcast %546 : f32 to vector<2x256xf32>
    %550 = arith.mulf %544, %549 : vector<2x256xf32>
    %551 = vector.broadcast %547 : f32 to vector<2x256xf32>
    %552 = arith.mulf %545, %551 : vector<2x256xf32>
    %553 = arith.addf %550, %552 : vector<2x256xf32>
    %554 = vector.broadcast %548 : vector<1x256xf32> to vector<2x256xf32>
    %555 = arith.mulf %553, %554 : vector<2x256xf32>
    %556 = arith.addf %543, %555 : vector<2x256xf32>
    %c225_i32 = arith.constant 225 : i32
    %557 = tpu.dynamic_rotate %75 by %c225_i32 dim 1 : vector<2x256xf32>, i32 -> vector<2x256xf32>
    %c225_i32_146 = arith.constant 225 : i32
    %558 = tpu.dynamic_rotate %76 by %c225_i32_146 dim 1 : vector<2x256xf32>, i32 -> vector<2x256xf32>
    %c37 = arith.constant 37 : index
    %559 = memref.load %arg4[%c37] : memref<98xf32, #tpu.memory_space<smem>>
    %c86 = arith.constant 86 : index
    %560 = memref.load %arg4[%c86] : memref<98xf32, #tpu.memory_space<smem>>
    %c37_147 = arith.constant 37 : index
    %c0_148 = arith.constant 0 : index
    %561 = vector.load %arg5[%c37_147, %c0_148] : memref<49x256xf32, #tpu.memory_space<vmem>>, vector<1x256xf32>
    %562 = vector.broadcast %559 : f32 to vector<2x256xf32>
    %563 = arith.mulf %557, %562 : vector<2x256xf32>
    %564 = vector.broadcast %560 : f32 to vector<2x256xf32>
    %565 = arith.mulf %558, %564 : vector<2x256xf32>
    %566 = arith.addf %563, %565 : vector<2x256xf32>
    %567 = vector.broadcast %561 : vector<1x256xf32> to vector<2x256xf32>
    %568 = arith.mulf %566, %567 : vector<2x256xf32>
    %569 = arith.addf %556, %568 : vector<2x256xf32>
    %c224_i32 = arith.constant 224 : i32
    %570 = tpu.dynamic_rotate %75 by %c224_i32 dim 1 : vector<2x256xf32>, i32 -> vector<2x256xf32>
    %c224_i32_149 = arith.constant 224 : i32
    %571 = tpu.dynamic_rotate %76 by %c224_i32_149 dim 1 : vector<2x256xf32>, i32 -> vector<2x256xf32>
    %c38 = arith.constant 38 : index
    %572 = memref.load %arg4[%c38] : memref<98xf32, #tpu.memory_space<smem>>
    %c87 = arith.constant 87 : index
    %573 = memref.load %arg4[%c87] : memref<98xf32, #tpu.memory_space<smem>>
    %c38_150 = arith.constant 38 : index
    %c0_151 = arith.constant 0 : index
    %574 = vector.load %arg5[%c38_150, %c0_151] : memref<49x256xf32, #tpu.memory_space<vmem>>, vector<1x256xf32>
    %575 = vector.broadcast %572 : f32 to vector<2x256xf32>
    %576 = arith.mulf %570, %575 : vector<2x256xf32>
    %577 = vector.broadcast %573 : f32 to vector<2x256xf32>
    %578 = arith.mulf %571, %577 : vector<2x256xf32>
    %579 = arith.addf %576, %578 : vector<2x256xf32>
    %580 = vector.broadcast %574 : vector<1x256xf32> to vector<2x256xf32>
    %581 = arith.mulf %579, %580 : vector<2x256xf32>
    %582 = arith.addf %569, %581 : vector<2x256xf32>
    %c223_i32 = arith.constant 223 : i32
    %583 = tpu.dynamic_rotate %75 by %c223_i32 dim 1 : vector<2x256xf32>, i32 -> vector<2x256xf32>
    %c223_i32_152 = arith.constant 223 : i32
    %584 = tpu.dynamic_rotate %76 by %c223_i32_152 dim 1 : vector<2x256xf32>, i32 -> vector<2x256xf32>
    %c39 = arith.constant 39 : index
    %585 = memref.load %arg4[%c39] : memref<98xf32, #tpu.memory_space<smem>>
    %c88 = arith.constant 88 : index
    %586 = memref.load %arg4[%c88] : memref<98xf32, #tpu.memory_space<smem>>
    %c39_153 = arith.constant 39 : index
    %c0_154 = arith.constant 0 : index
    %587 = vector.load %arg5[%c39_153, %c0_154] : memref<49x256xf32, #tpu.memory_space<vmem>>, vector<1x256xf32>
    %588 = vector.broadcast %585 : f32 to vector<2x256xf32>
    %589 = arith.mulf %583, %588 : vector<2x256xf32>
    %590 = vector.broadcast %586 : f32 to vector<2x256xf32>
    %591 = arith.mulf %584, %590 : vector<2x256xf32>
    %592 = arith.addf %589, %591 : vector<2x256xf32>
    %593 = vector.broadcast %587 : vector<1x256xf32> to vector<2x256xf32>
    %594 = arith.mulf %592, %593 : vector<2x256xf32>
    %595 = arith.addf %582, %594 : vector<2x256xf32>
    %c222_i32 = arith.constant 222 : i32
    %596 = tpu.dynamic_rotate %75 by %c222_i32 dim 1 : vector<2x256xf32>, i32 -> vector<2x256xf32>
    %c222_i32_155 = arith.constant 222 : i32
    %597 = tpu.dynamic_rotate %76 by %c222_i32_155 dim 1 : vector<2x256xf32>, i32 -> vector<2x256xf32>
    %c40 = arith.constant 40 : index
    %598 = memref.load %arg4[%c40] : memref<98xf32, #tpu.memory_space<smem>>
    %c89 = arith.constant 89 : index
    %599 = memref.load %arg4[%c89] : memref<98xf32, #tpu.memory_space<smem>>
    %c40_156 = arith.constant 40 : index
    %c0_157 = arith.constant 0 : index
    %600 = vector.load %arg5[%c40_156, %c0_157] : memref<49x256xf32, #tpu.memory_space<vmem>>, vector<1x256xf32>
    %601 = vector.broadcast %598 : f32 to vector<2x256xf32>
    %602 = arith.mulf %596, %601 : vector<2x256xf32>
    %603 = vector.broadcast %599 : f32 to vector<2x256xf32>
    %604 = arith.mulf %597, %603 : vector<2x256xf32>
    %605 = arith.addf %602, %604 : vector<2x256xf32>
    %606 = vector.broadcast %600 : vector<1x256xf32> to vector<2x256xf32>
    %607 = arith.mulf %605, %606 : vector<2x256xf32>
    %608 = arith.addf %595, %607 : vector<2x256xf32>
    %c221_i32 = arith.constant 221 : i32
    %609 = tpu.dynamic_rotate %75 by %c221_i32 dim 1 : vector<2x256xf32>, i32 -> vector<2x256xf32>
    %c221_i32_158 = arith.constant 221 : i32
    %610 = tpu.dynamic_rotate %76 by %c221_i32_158 dim 1 : vector<2x256xf32>, i32 -> vector<2x256xf32>
    %c41 = arith.constant 41 : index
    %611 = memref.load %arg4[%c41] : memref<98xf32, #tpu.memory_space<smem>>
    %c90 = arith.constant 90 : index
    %612 = memref.load %arg4[%c90] : memref<98xf32, #tpu.memory_space<smem>>
    %c41_159 = arith.constant 41 : index
    %c0_160 = arith.constant 0 : index
    %613 = vector.load %arg5[%c41_159, %c0_160] : memref<49x256xf32, #tpu.memory_space<vmem>>, vector<1x256xf32>
    %614 = vector.broadcast %611 : f32 to vector<2x256xf32>
    %615 = arith.mulf %609, %614 : vector<2x256xf32>
    %616 = vector.broadcast %612 : f32 to vector<2x256xf32>
    %617 = arith.mulf %610, %616 : vector<2x256xf32>
    %618 = arith.addf %615, %617 : vector<2x256xf32>
    %619 = vector.broadcast %613 : vector<1x256xf32> to vector<2x256xf32>
    %620 = arith.mulf %618, %619 : vector<2x256xf32>
    %621 = arith.addf %608, %620 : vector<2x256xf32>
    %c211_i32 = arith.constant 211 : i32
    %622 = tpu.dynamic_rotate %75 by %c211_i32 dim 1 : vector<2x256xf32>, i32 -> vector<2x256xf32>
    %c211_i32_161 = arith.constant 211 : i32
    %623 = tpu.dynamic_rotate %76 by %c211_i32_161 dim 1 : vector<2x256xf32>, i32 -> vector<2x256xf32>
    %c42 = arith.constant 42 : index
    %624 = memref.load %arg4[%c42] : memref<98xf32, #tpu.memory_space<smem>>
    %c91 = arith.constant 91 : index
    %625 = memref.load %arg4[%c91] : memref<98xf32, #tpu.memory_space<smem>>
    %c42_162 = arith.constant 42 : index
    %c0_163 = arith.constant 0 : index
    %626 = vector.load %arg5[%c42_162, %c0_163] : memref<49x256xf32, #tpu.memory_space<vmem>>, vector<1x256xf32>
    %627 = vector.broadcast %624 : f32 to vector<2x256xf32>
    %628 = arith.mulf %622, %627 : vector<2x256xf32>
    %629 = vector.broadcast %625 : f32 to vector<2x256xf32>
    %630 = arith.mulf %623, %629 : vector<2x256xf32>
    %631 = arith.addf %628, %630 : vector<2x256xf32>
    %632 = vector.broadcast %626 : vector<1x256xf32> to vector<2x256xf32>
    %633 = arith.mulf %631, %632 : vector<2x256xf32>
    %634 = arith.addf %621, %633 : vector<2x256xf32>
    %c210_i32 = arith.constant 210 : i32
    %635 = tpu.dynamic_rotate %75 by %c210_i32 dim 1 : vector<2x256xf32>, i32 -> vector<2x256xf32>
    %c210_i32_164 = arith.constant 210 : i32
    %636 = tpu.dynamic_rotate %76 by %c210_i32_164 dim 1 : vector<2x256xf32>, i32 -> vector<2x256xf32>
    %c43 = arith.constant 43 : index
    %637 = memref.load %arg4[%c43] : memref<98xf32, #tpu.memory_space<smem>>
    %c92 = arith.constant 92 : index
    %638 = memref.load %arg4[%c92] : memref<98xf32, #tpu.memory_space<smem>>
    %c43_165 = arith.constant 43 : index
    %c0_166 = arith.constant 0 : index
    %639 = vector.load %arg5[%c43_165, %c0_166] : memref<49x256xf32, #tpu.memory_space<vmem>>, vector<1x256xf32>
    %640 = vector.broadcast %637 : f32 to vector<2x256xf32>
    %641 = arith.mulf %635, %640 : vector<2x256xf32>
    %642 = vector.broadcast %638 : f32 to vector<2x256xf32>
    %643 = arith.mulf %636, %642 : vector<2x256xf32>
    %644 = arith.addf %641, %643 : vector<2x256xf32>
    %645 = vector.broadcast %639 : vector<1x256xf32> to vector<2x256xf32>
    %646 = arith.mulf %644, %645 : vector<2x256xf32>
    %647 = arith.addf %634, %646 : vector<2x256xf32>
    %c209_i32 = arith.constant 209 : i32
    %648 = tpu.dynamic_rotate %75 by %c209_i32 dim 1 : vector<2x256xf32>, i32 -> vector<2x256xf32>
    %c209_i32_167 = arith.constant 209 : i32
    %649 = tpu.dynamic_rotate %76 by %c209_i32_167 dim 1 : vector<2x256xf32>, i32 -> vector<2x256xf32>
    %c44 = arith.constant 44 : index
    %650 = memref.load %arg4[%c44] : memref<98xf32, #tpu.memory_space<smem>>
    %c93 = arith.constant 93 : index
    %651 = memref.load %arg4[%c93] : memref<98xf32, #tpu.memory_space<smem>>
    %c44_168 = arith.constant 44 : index
    %c0_169 = arith.constant 0 : index
    %652 = vector.load %arg5[%c44_168, %c0_169] : memref<49x256xf32, #tpu.memory_space<vmem>>, vector<1x256xf32>
    %653 = vector.broadcast %650 : f32 to vector<2x256xf32>
    %654 = arith.mulf %648, %653 : vector<2x256xf32>
    %655 = vector.broadcast %651 : f32 to vector<2x256xf32>
    %656 = arith.mulf %649, %655 : vector<2x256xf32>
    %657 = arith.addf %654, %656 : vector<2x256xf32>
    %658 = vector.broadcast %652 : vector<1x256xf32> to vector<2x256xf32>
    %659 = arith.mulf %657, %658 : vector<2x256xf32>
    %660 = arith.addf %647, %659 : vector<2x256xf32>
    %c208_i32 = arith.constant 208 : i32
    %661 = tpu.dynamic_rotate %75 by %c208_i32 dim 1 : vector<2x256xf32>, i32 -> vector<2x256xf32>
    %c208_i32_170 = arith.constant 208 : i32
    %662 = tpu.dynamic_rotate %76 by %c208_i32_170 dim 1 : vector<2x256xf32>, i32 -> vector<2x256xf32>
    %c45 = arith.constant 45 : index
    %663 = memref.load %arg4[%c45] : memref<98xf32, #tpu.memory_space<smem>>
    %c94 = arith.constant 94 : index
    %664 = memref.load %arg4[%c94] : memref<98xf32, #tpu.memory_space<smem>>
    %c45_171 = arith.constant 45 : index
    %c0_172 = arith.constant 0 : index
    %665 = vector.load %arg5[%c45_171, %c0_172] : memref<49x256xf32, #tpu.memory_space<vmem>>, vector<1x256xf32>
    %666 = vector.broadcast %663 : f32 to vector<2x256xf32>
    %667 = arith.mulf %661, %666 : vector<2x256xf32>
    %668 = vector.broadcast %664 : f32 to vector<2x256xf32>
    %669 = arith.mulf %662, %668 : vector<2x256xf32>
    %670 = arith.addf %667, %669 : vector<2x256xf32>
    %671 = vector.broadcast %665 : vector<1x256xf32> to vector<2x256xf32>
    %672 = arith.mulf %670, %671 : vector<2x256xf32>
    %673 = arith.addf %660, %672 : vector<2x256xf32>
    %c207_i32 = arith.constant 207 : i32
    %674 = tpu.dynamic_rotate %75 by %c207_i32 dim 1 : vector<2x256xf32>, i32 -> vector<2x256xf32>
    %c207_i32_173 = arith.constant 207 : i32
    %675 = tpu.dynamic_rotate %76 by %c207_i32_173 dim 1 : vector<2x256xf32>, i32 -> vector<2x256xf32>
    %c46 = arith.constant 46 : index
    %676 = memref.load %arg4[%c46] : memref<98xf32, #tpu.memory_space<smem>>
    %c95 = arith.constant 95 : index
    %677 = memref.load %arg4[%c95] : memref<98xf32, #tpu.memory_space<smem>>
    %c46_174 = arith.constant 46 : index
    %c0_175 = arith.constant 0 : index
    %678 = vector.load %arg5[%c46_174, %c0_175] : memref<49x256xf32, #tpu.memory_space<vmem>>, vector<1x256xf32>
    %679 = vector.broadcast %676 : f32 to vector<2x256xf32>
    %680 = arith.mulf %674, %679 : vector<2x256xf32>
    %681 = vector.broadcast %677 : f32 to vector<2x256xf32>
    %682 = arith.mulf %675, %681 : vector<2x256xf32>
    %683 = arith.addf %680, %682 : vector<2x256xf32>
    %684 = vector.broadcast %678 : vector<1x256xf32> to vector<2x256xf32>
    %685 = arith.mulf %683, %684 : vector<2x256xf32>
    %686 = arith.addf %673, %685 : vector<2x256xf32>
    %c206_i32 = arith.constant 206 : i32
    %687 = tpu.dynamic_rotate %75 by %c206_i32 dim 1 : vector<2x256xf32>, i32 -> vector<2x256xf32>
    %c206_i32_176 = arith.constant 206 : i32
    %688 = tpu.dynamic_rotate %76 by %c206_i32_176 dim 1 : vector<2x256xf32>, i32 -> vector<2x256xf32>
    %c47 = arith.constant 47 : index
    %689 = memref.load %arg4[%c47] : memref<98xf32, #tpu.memory_space<smem>>
    %c96 = arith.constant 96 : index
    %690 = memref.load %arg4[%c96] : memref<98xf32, #tpu.memory_space<smem>>
    %c47_177 = arith.constant 47 : index
    %c0_178 = arith.constant 0 : index
    %691 = vector.load %arg5[%c47_177, %c0_178] : memref<49x256xf32, #tpu.memory_space<vmem>>, vector<1x256xf32>
    %692 = vector.broadcast %689 : f32 to vector<2x256xf32>
    %693 = arith.mulf %687, %692 : vector<2x256xf32>
    %694 = vector.broadcast %690 : f32 to vector<2x256xf32>
    %695 = arith.mulf %688, %694 : vector<2x256xf32>
    %696 = arith.addf %693, %695 : vector<2x256xf32>
    %697 = vector.broadcast %691 : vector<1x256xf32> to vector<2x256xf32>
    %698 = arith.mulf %696, %697 : vector<2x256xf32>
    %699 = arith.addf %686, %698 : vector<2x256xf32>
    %c205_i32 = arith.constant 205 : i32
    %700 = tpu.dynamic_rotate %75 by %c205_i32 dim 1 : vector<2x256xf32>, i32 -> vector<2x256xf32>
    %c205_i32_179 = arith.constant 205 : i32
    %701 = tpu.dynamic_rotate %76 by %c205_i32_179 dim 1 : vector<2x256xf32>, i32 -> vector<2x256xf32>
    %c48 = arith.constant 48 : index
    %702 = memref.load %arg4[%c48] : memref<98xf32, #tpu.memory_space<smem>>
    %c97 = arith.constant 97 : index
    %703 = memref.load %arg4[%c97] : memref<98xf32, #tpu.memory_space<smem>>
    %c48_180 = arith.constant 48 : index
    %c0_181 = arith.constant 0 : index
    %704 = vector.load %arg5[%c48_180, %c0_181] : memref<49x256xf32, #tpu.memory_space<vmem>>, vector<1x256xf32>
    %705 = vector.broadcast %702 : f32 to vector<2x256xf32>
    %706 = arith.mulf %700, %705 : vector<2x256xf32>
    %707 = vector.broadcast %703 : f32 to vector<2x256xf32>
    %708 = arith.mulf %701, %707 : vector<2x256xf32>
    %709 = arith.addf %706, %708 : vector<2x256xf32>
    %710 = vector.broadcast %704 : vector<1x256xf32> to vector<2x256xf32>
    %711 = arith.mulf %709, %710 : vector<2x256xf32>
    %712 = arith.addf %699, %711 : vector<2x256xf32>
    %713 = arith.negf %712 : vector<2x256xf32>
    %714 = math.exp %713 : vector<2x256xf32>
    %cst_182 = arith.constant 1.000000e+00 : f32
    %715 = vector.broadcast %cst_182 : f32 to vector<2x256xf32>
    %716 = arith.addf %715, %714 : vector<2x256xf32>
    %717 = arith.divf %715, %716 : vector<2x256xf32>
    %718 = vector.shape_cast %717 : vector<2x256xf32> to vector<2x1x256xf32>
    %719 = vector.broadcast %718 : vector<2x1x256xf32> to vector<2x32x256xf32>
    %720 = arith.mulf %0, %719 : vector<2x32x256xf32>
    %c0_183 = arith.constant 0 : index
    %c0_184 = arith.constant 0 : index
    %c0_185 = arith.constant 0 : index
    %721 = vector.load %arg6[%c0_183, %c0_184, %c0_185] : memref<2x32x256xf32, #tpu.memory_space<vmem>>, vector<2x32x256xf32>
    tpu.vector_store %arg6[%c0_183, %c0_184, %c0_185], %720 {strides = array<i32>} : memref<2x32x256xf32, #tpu.memory_space<vmem>>, vector<2x32x256xf32>,
    return
  }
  func.func @transform_0(%arg0: i32) -> (i32, i32, i32) {
    %c0_i32 = arith.constant 0 : i32
    %c0_i32_0 = arith.constant 0 : i32
    %c0_i32_1 = arith.constant 0 : i32
    return %arg0, %c0_i32, %c0_i32_0 : i32, i32, i32
  }
  func.func @transform_1(%arg0: i32) -> (i32, i32) {
    %c0_i32 = arith.constant 0 : i32
    %c0_i32_0 = arith.constant 0 : i32
    %c0_i32_1 = arith.constant 0 : i32
    return %c0_i32, %c0_i32_0 : i32, i32
  }
  func.func @transform_2(%arg0: i32) -> (i32, i32) {
    %c0_i32 = arith.constant 0 : i32
    %c0_i32_0 = arith.constant 0 : i32
    %c0_i32_1 = arith.constant 0 : i32
    return %c0_i32, %c0_i32_0 : i32, i32
  }
  func.func @transform_3(%arg0: i32) -> i32 {
    %c0_i32 = arith.constant 0 : i32
    %c0_i32_0 = arith.constant 0 : i32
    return %c0_i32 : i32
  }
  func.func @transform_4(%arg0: i32) -> (i32, i32) {
    %c0_i32 = arith.constant 0 : i32
    %c0_i32_0 = arith.constant 0 : i32
    %c0_i32_1 = arith.constant 0 : i32
    return %c0_i32, %c0_i32_0 : i32, i32
  }
  func.func @transform_5(%arg0: i32) -> (i32, i32, i32) {
    %c0_i32 = arith.constant 0 : i32
    %c0_i32_0 = arith.constant 0 : i32
    %c0_i32_1 = arith.constant 0 : i32
    return %arg0, %c0_i32, %c0_i32_0 : i32, i32, i32
  }
}

</mosaic_0001>

<bundles_post_ra>
// kernel: cbam_pallas.1
= control target key start
LH: loop header
LB: loop body
LE: loop exit
PB: predicated region body
PF: predicated region fallthrough
CT: control target
= control target key end

     0   :  { %s6328_s0 = inlined_call_operand.vmem [shape: f32[4,32,256], index: 0, kind: input, shape index: {}]   ;;  %s6329_s1 = inlined_call_operand.vmem [shape: f32[32,2], index: 1, kind: input, shape index: {}]   ;;  %s6330_s2 = inlined_call_operand.vmem [shape: f32[32,2], index: 2, kind: input, shape index: {}]   ;;  %s6331_s3 = inlined_call_operand.vmem [shape: f32[98], index: 3, kind: input, shape index: {}]   ;;  %s6332_s4 = inlined_call_operand.vmem [shape: f32[49,256], index: 4, kind: input, shape index: {}]   ;;  %s6333_s5 = inlined_call_operand.vmem [shape: f32[4,32,256], index: 5, kind: output, shape index: {}]  }
   0x1   :  { %6507 = sst [smem:[#allocation78_spill]] %s6328_s0 }
   0x2   :  { %6508 = sst [smem:[#allocation79_spill]] %s6329_s1 }
   0x3   :  { %6509 = sst [smem:[#allocation80_spill]] %s6330_s2 }
   0x4   :  { %6510 = sst [smem:[#allocation81_spill]] %s6331_s3 }
   0x5   :  { %6511 = sst [smem:[#allocation82_spill]] %s6332_s4 }
   0x6   :  { %6512 = sst [smem:[#allocation83_spill]] %s6333_s5 }
   0x7   :  { %10 = vsyncpa [#allocation3], 0  ;;  %s3322_s18 = smov 0  }
   0x8 LB: > { %6513 = sst [smem:[#allocation5_spill]] %s3239_s18  ;;  %s2915_s19 = sadd.s32 4294967295, %s3239_s18   ;;  %s3239_s18 = sphi %s3322_s18, %s16_s18  }
   0x9   : > { %p2917_p0 = scmp.ge.s32.totalorder %s3239_s18, 1  ;;  %p157_p1 = scmp.lt.s32.totalorder %s3239_s18, 3 }
   0xa   : > { %s6514_s3 = sld [smem:[#allocation81_spill]]  ;;  %p3337_p3 = scmp.eq.s32.totalorder %s2915_s19, 0 }
   0xb   : > { %p3333_p2 = pnand %p2917_p0, %p157_p1 }
   0xd   : > { %p3091_p4 = pneg %p3333_p2 }
   0xf   : > { %p3092_p5 = pnand %p3337_p3, %p3091_p4 }
  0x10   : > { %s176_s22 = sshll.u32 %s6514_s3, 4  ;;  %s177_s22 = int_to_ptr.vmem [resolvable:$true] %s176_s22 }
  0x11   : > { %s3214_s25 = scalar_lea.vmem %s177_s22, 16  ;;  %p3216_p7 = pneg %p3092_p5 }
  0x12   : > { %p3215_p6 = scmp.ne.s32.totalorder %s177_s22, %s3214_s25  ;;  %p3222_p10 = scmp.lt.s32.totalorder %s177_s22, %s177_s22 }
  0x13   : > { %p3223_p11 = scmp.lt.s32.totalorder %s3214_s25, %s3214_s25 }
  0x14   : > { %p3217_p8 = pnand %p3216_p7, %p3215_p6 }
  0x15   : > { %p3224_p12 = por %p3223_p11, %p3222_p10 }
  0x16   : > { %p3218_p9 = pneg %p3217_p8 }
  0x18   : > { %p3225_p13 = pnand %p3224_p12, %p3218_p9 }
  0x1a   : > { %3228 = shalt.err (!%p3225_p13)
}
  0x1b   : > { %s3241_s26 = smov [#allocation2]   ;;  %202 = sbr.rel (%p3333_p2) target bundleno = 1153 (0x481), region = 40 }
  0x1c   : > { %3094 = dma.vmem_to_smem (!%p3092_p5), %s177_s22, 16, %s3241_s26, [#allocation3]  }
  0x22   : > { %3234 = dma.done.wait (%p3337_p3), [#allocation3], 16  }
  0x23   : > { %3236 = vsyncadd (%p3337_p3), [#allocation3], 4294967280 }
  0x24   : > { %208 = sfence }
  0x25   : > { %s2922_s27 = sshll.u32 %s2915_s19, 1  ;;  %s6518_s0 = sld [smem:[#allocation78_spill]]  ;;  %vm331_vm0 = vcmask 7168   ;;  %vm380_vm1 = vcmask 15368   ;;  %vm777_vm2 = vcmask 1041409  }
  0x26   : > { %p234_p0 = scmp.lt.s32.totalorder %s2922_s27, 3  ;;  %s6520_s1 = sld [smem:[#allocation79_spill]] }
  0x27   : > { %s6521_s2 = sld [smem:[#allocation80_spill]]  ;;  %s6347_s24 = smov 127  }
  0x28   : > { %s6964_s27 = smov (!%p234_p0, %s2922_s27), 3  ;;  %s3611_s25 = sld [smem:[#allocation2 + $0x18]] }
  0x29   : > { %6517 = sst [smem:[#allocation6_spill]] %s6964_s27  ;;  %s6334_s28 = sshll.u32 %s6964_s27, 6 }
  0x2a   : > { %s3613_s26 = sld [smem:[#allocation2 + $0x49]]  ;;  %s3244_s29 = smov 51  }
  0x2b   : > { %s3359_s6 = scalar_lea.vmem %s6518_s0, %s6334_s28  ;;  %s6525_s4 = sld [smem:[#allocation82_spill]] }
  0x2c   : > { %6519 = sst [smem:[#allocation7_spill]] %s3359_s6  ;;  %v3362_v0 = vld [vmem:[%s3359_s6 + $0x20] sm:$0xff]  ;;  %v3365_v1 = vld [vmem:[%s3359_s6 + $0x28] sm:$0xff]  ;;  %v3376_v5 = vld [vmem:[%s3359_s6 + $0x30] sm:$0xff]  ;;  %s3245_s8 = smov 50  }
  0x2d   : > { %v3368_v2 = vld [vmem:[%s3359_s6] sm:$0xff]  ;;  %v269_v3 = vadd.f32 %v3365_v1, %v3362_v0  ;;  %v3373_v4 = vld [vmem:[%s3359_s6 + $0x8] sm:$0xff]  ;;  %v3379_v6 = vld [vmem:[%s3359_s6 + $0x38] sm:$0xff]  ;;  %v301_v29 = vmax.f32 %v3362_v0, %v3365_v1  ;;  %s3246_s9 = smov 49   ;;  %s3247_s10 = smov 48  }
  0x2e   : > { %v263_v7 = vadd.f32 %v3373_v4, %v3368_v2  ;;  %v3384_v8 = vld [vmem:[%s3359_s6 + $0x10] sm:$0xff]  ;;  %v3387_v9 = vld [vmem:[%s3359_s6 + $0x18] sm:$0xff]  ;;  %v272_v10 = vadd.f32 %v3379_v6, %v3376_v5  ;;  %v3400_v14 = vld [vmem:[%s3359_s6 + $0x40] sm:$0xff]  ;;  %v295_v25 = vmax.f32 %v3368_v2, %v3373_v4  ;;  %v304_v31 = vmax.f32 %v3376_v5, %v3379_v6  ;;  %s3248_s11 = smov 47   ;;  %s3249_s12 = smov 46  }
  0x2f   : > { %270 = vadd.xlane.f32.xlu1 %v269_v3  ;;  %v266_v11 = vadd.f32 %v3387_v9, %v3384_v8  ;;  %v3394_v12 = vld [vmem:[%s3359_s6 + $0x50] sm:$0xff]  ;;  %v3397_v13 = vld [vmem:[%s3359_s6 + $0x58] sm:$0xff]  ;;  %v3403_v15 = vld [vmem:[%s3359_s6 + $0x48] sm:$0xff]  ;;  %v298_v24 = vmax.f32 %v3384_v8, %v3387_v9  ;;  %s3250_s13 = smov 45   ;;  %s3251_s14 = smov 35  }
  0x30   : > { %264 = vadd.xlane.f32.xlu0 %v263_v7  ;;  %v278_v16 = vadd.f32 %v3397_v13, %v3394_v12  ;;  %v275_v17 = vadd.f32 %v3403_v15, %v3400_v14  ;;  %v3410_v18 = vld [vmem:[%s3359_s6 + $0x70] sm:$0xff]  ;;  %v3413_v19 = vld [vmem:[%s3359_s6 + $0x78] sm:$0xff]  ;;  %v3416_v20 = vld [vmem:[%s3359_s6 + $0x60] sm:$0xff]  ;;  %v310_v26 = vmax.f32 %v3394_v12, %v3397_v13  ;;  %v307_v27 = vmax.f32 %v3400_v14, %v3403_v15  ;;  %s3252_s15 = smov 34   ;;  %s3253_s16 = smov 33  }
  0x31   : > { %v3419_v21 = vld [vmem:[%s3359_s6 + $0x68] sm:$0xff]  ;;  %v284_v22 = vadd.f32 %v3413_v19, %v3410_v18  ;;  %v316_v30 = vmax.f32 %v3410_v18, %v3413_v19  ;;  %v3444_v36 = vld [vmem:[%s6520_s1 + $0x10] sm:$0xff]  ;;  %v319_v37 = vld [vmem:[%s6520_s1] sm:$0xff]  ;;  %s3254_s17 = smov 32   ;;  %s3255_s19 = smov 31  }
  0x32   : > { %v281_v23 = vadd.f32 %v3419_v21, %v3416_v20  ;;  %v313_v28 = vmax.f32 %v3416_v20, %v3419_v21  ;;  %v3452_v39 = vld [vmem:[%s6520_s1 + $0x18] sm:$0xff]  ;;  %v320_v41 = vld [vmem:[%s6520_s1 + $0x8] sm:$0xff]  ;;  %s3256_s20 = smov 30   ;;  %s3257_s21 = smov 29  }
  0x33   : > { %273 = vadd.xlane.f32.xlu1 %v272_v10  ;;  %s3258_s22 = smov 19   ;;  %s3259_s23 = smov 18  }
  0x34   : > { %267 = vadd.xlane.f32.xlu0 %v266_v11  ;;  %s6337_s30 = smov 15   ;;  %s6339_s7 = smov 14  }
  0x35   : > { %s3264_s28 = smov 13   ;;  %s4156_s0 = sld [smem:[#allocation2 + $0x47]] }
  0x36   : > { %s6582_s1 = smov 1   ;;  %s4164_s3 = sld [smem:[#allocation2 + $0x4a]] }
  0x37   : > { %279 = vadd.xlane.f32.xlu1 %v278_v16  ;;  %s4169_s18 = sld [smem:[#allocation2 + $0x4b]]  ;;  %s4171_s5 = sld [smem:[#allocation2 + $0x4c]] }
  0x38   : > { %276 = vadd.xlane.f32.xlu0 %v275_v17  ;;  %s4183_s6 = sld [smem:[#allocation2 + $0x4e]]  ;;  %s4189_s27 = sld [smem:[#allocation2 + $0x4f]] }
  0x3b   : > { %285 = vadd.xlane.f32.xlu1 %v284_v22 }
  0x3c   : > { %282 = vadd.xlane.f32.xlu0 %v281_v23  ;;  %6584 = sst [smem:[#allocation62_spill]] %s4164_s3  ;;  %s6598_s3 = smov 125  }
  0x3d   : > { %6585 = sst [smem:[#allocation63_spill]] %s4169_s18  ;;  %s4265_s18 = sld [smem:[#allocation2 + $0x56]] }
  0x3e   : > { %6588 = sst [smem:[#allocation66_spill]] %s4189_s27  ;;  %s6608_s27 = smov 115  }
  0x3f   : > { %299 = vmax.xlane.f32.xlu1 %v298_v24 }
  0x40   : > { %296 = vmax.xlane.f32.xlu0 %v295_v25 }
  0x43   : > { %311 = vmax.xlane.f32.xlu1 %v310_v26 }
  0x44   : > { %308 = vmax.xlane.f32.xlu0 %v307_v27 }
  0x47   : > { %314 = vmax.xlane.f32.xlu1 %v313_v28 }
  0x48   : > { %302 = vmax.xlane.f32.xlu0 %v301_v29 }
  0x4b   : > { %317 = vmax.xlane.f32.xlu1 %v316_v30 }
  0x4c   : > { %305 = vmax.xlane.f32.xlu0 %v304_v31 }
  0xbc   : > { %v271_v32 = vpop.xlane.xlu1 %270 }
  0xbd   : > { %v265_v33 = vpop.xlane.xlu0 %264  ;;  %v289_v34 = vmul.f32 0.00390625, %v271_v32 }
  0xbe   : > { %v287_v35 = vmul.f32 0.00390625, %v265_v33 }
  0xbf   : > { %v325_v43 = vmul.f32 %v3444_v36, %v289_v34 }
  0xc0   : > { %v274_v38 = vpop.xlane.xlu1 %273  ;;  %v323_v44 = vmul.f32 %v319_v37, %v287_v35 }
  0xc1   : > { %v290_v40 = vmul.f32 0.00390625, %v274_v38  ;;  %v268_v42 = vpop.xlane.xlu0 %267  ;;  %v335_v51 = vsel %vm331_vm0, %v325_v43, 0.0  ;;  %v384_v35 = vsel %vm380_vm1, %v325_v43, 0.0 }
  0xc2   : > { %v288_v45 = vmul.f32 0.00390625, %v268_v42  ;;  %v332_v52 = vsel %vm331_vm0, %v323_v44, 0.0  ;;  %v381_v24 = vsel %vm380_vm1, %v323_v44, 0.0 }
  0xc3   : > { %v326_v46 = vmul.f32 %v3452_v39, %v290_v40 }
  0xc4   : > { %v324_v47 = vmul.f32 %v320_v41, %v288_v45  ;;  %v280_v48 = vpop.xlane.xlu1 %279 }
  0xc5   : > { %v292_v49 = vmul.f32 0.00390625, %v280_v48  ;;  %v277_v50 = vpop.xlane.xlu0 %276  ;;  %v337_v57 = vsel %vm331_vm0, %v326_v46, 0.0 }
  0xc6   : > { %v333_v53 = vsel %vm331_vm0, %v324_v47, 0.0  ;;  %v291_v54 = vmul.f32 0.00390625, %v277_v50  ;;  %v382_v11 = vsel %vm380_vm1, %v324_v47, 0.0 }
  0xc7   : > { %v334_v55 = vadd.f32 %v333_v53, %v332_v52  ;;  %v328_v56 = vmul.f32 %v320_v41, %v292_v49  ;;  %v383_v28 = vadd.f32 %v382_v11, %v381_v24 }
  0xc8   : > { %v327_v58 = vmul.f32 %v319_v37, %v291_v54  ;;  %v286_v59 = vpop.xlane.xlu1 %285 }
  0xc9   : > { %v336_v60 = vadd.f32 %v335_v51, %v334_v55  ;;  %v346_v61 = vsel %vm331_vm0, %v328_v56, 0.0  ;;  %v283_v62 = vpop.xlane.xlu0 %282  ;;  %v294_v3 = vmul.f32 0.00390625, %v286_v59  ;;  %v395_v32 = vsel %vm380_vm1, %v328_v56, 0.0 }
  0xca   : > { %v345_v63 = vsel %vm331_vm0, %v327_v58, 0.0  ;;  %v293_v7 = vmul.f32 0.00390625, %v283_v62  ;;  %v394_v33 = vsel %vm380_vm1, %v327_v58, 0.0  ;;  %v385_v53 = vadd.f32 %v384_v35, %v383_v28 }
  0xcb   : > { %v338_v10 = vadd.f32 %v337_v57, %v336_v60  ;;  %v347_v16 = vadd.f32 %v346_v61, %v345_v63  ;;  %v330_v17 = vmul.f32 %v3452_v39, %v294_v3  ;;  %v396_v48 = vadd.f32 %v395_v32, %v394_v33 }
  0xcc   : > { %v329_v22 = vmul.f32 %v3444_v36, %v293_v7  ;;  %v300_v23 = vpop.xlane.xlu1 %299  ;;  %v386_v56 = vsel %vm380_vm1, %v326_v46, 0.0 }
  0xcd   : > { %v339_v25 = vrot.slane %v338_v10, 4  ;;  %v458_v26 = vmul.f32 %v320_v41, %v300_v23  ;;  %v297_v27 = vpop.xlane.xlu0 %296  ;;  %v350_v29 = vsel %vm331_vm0, %v330_v17, 0.0  ;;  %v399_v11 = vsel %vm380_vm1, %v330_v17, 0.0 }
  0xce   : > { %v348_v30 = vsel %vm331_vm0, %v329_v22, 0.0  ;;  %v457_v40 = vmul.f32 %v319_v37, %v297_v27  ;;  %v397_v45 = vsel %vm380_vm1, %v329_v22, 0.0 }
  0xcf   : > { %v340_v31 = vadd.f32 %v339_v25, %v338_v10  ;;  %v349_v34 = vadd.f32 %v348_v30, %v347_v16  ;;  %v466_v38 = vsel %vm331_vm0, %v458_v26, 0.0  ;;  %v398_v43 = vadd.f32 %v397_v45, %v396_v48 }
  0xd0   : > { %v312_v42 = vpop.xlane.xlu1 %311  ;;  %v465_v49 = vsel %vm331_vm0, %v457_v40, 0.0  ;;  %v510_v61 = vsel %vm380_vm1, %v458_v26, 0.0  ;;  %v509_v62 = vsel %vm380_vm1, %v457_v40, 0.0  ;;  %v387_v10 = vadd.f32 %v386_v56, %v385_v53 }
  0xd1   : > { %v351_v44 = vadd.f32 %v350_v29, %v349_v34  ;;  %v309_v47 = vpop.xlane.xlu0 %308  ;;  %v462_v50 = vmul.f32 %v320_v41, %v312_v42  ;;  %v341_v52 = vrot.slane %v340_v31, 2  ;;  %v467_v55 = vadd.f32 %v466_v38, %v465_v49 }
  0xd2   : > { %v461_v51 = vmul.f32 %v319_v37, %v309_v47  ;;  %v511_v29 = vadd.f32 %v510_v61, %v509_v62  ;;  %v388_v53 = vrot.slane %v387_v10, 4 }
  0xd3   : > { %v352_v54 = vrot.slane %v351_v44, 4  ;;  %v479_v57 = vsel %vm331_vm0, %v462_v50, 0.0  ;;  %v523_v37 = vsel %vm380_vm1, %v462_v50, 0.0  ;;  %v342_v22 = vadd.f32 %v341_v52, %v340_v31 }
  0xd4   : > { %v478_v58 = vsel %vm331_vm0, %v461_v51, 0.0  ;;  %v315_v59 = vpop.xlane.xlu1 %314  ;;  %v522_v3 = vsel %vm380_vm1, %v461_v51, 0.0 }
  0xd5   : > { %v353_v60 = vadd.f32 %v352_v54, %v351_v44  ;;  %v480_v63 = vadd.f32 %v479_v57, %v478_v58  ;;  %v303_v41 = vpop.xlane.xlu0 %302  ;;  %v463_v7 = vmul.f32 %v3444_v36, %v315_v59  ;;  %v524_v30 = vadd.f32 %v523_v37, %v522_v3 }
  0xd6   : > { %v459_v46 = vmul.f32 %v3444_v36, %v303_v41  ;;  %v400_v36 = vadd.f32 %v399_v11, %v398_v43  ;;  %v343_v40 = vrot.slane %v342_v22, 1  ;;  %v3500_v41 = vld [vmem:[%s6521_s2 + $0x8] sm:$0xff] }
  0xd7   : > { %v354_v16 = vrot.slane %v353_v60, 2  ;;  %v481_v23 = vsel %vm331_vm0, %v463_v7, 0.0  ;;  %v525_v24 = vsel %vm380_vm1, %v463_v7, 0.0 }
  0xd8   : > { %v468_v25 = vsel %vm331_vm0, %v459_v46, 0.0  ;;  %v512_v26 = vsel %vm380_vm1, %v459_v46, 0.0  ;;  %v318_v27 = vpop.xlane.xlu1 %317  ;;  %v482_v32 = vadd.f32 %v481_v23, %v480_v63  ;;  %v526_v35 = vadd.f32 %v525_v24, %v524_v30 }
  0xd9   : > { %v355_v28 = vadd.f32 %v354_v16, %v353_v60  ;;  %v306_v33 = vpop.xlane.xlu0 %305  ;;  %v469_v34 = vadd.f32 %v468_v25, %v467_v55  ;;  %v464_v17 = vmul.f32 %v3452_v39, %v318_v27  ;;  %v513_v38 = vadd.f32 %v512_v26, %v511_v29 }
  0xda   : > { %v460_v31 = vmul.f32 %v3452_v39, %v306_v33  ;;  %v344_v54 = vadd.f32 %v343_v40, %v342_v22  ;;  %v401_v58 = vrot.slane %v400_v36, 4  ;;  %v389_v63 = vadd.f32 %v388_v53, %v387_v10  ;;  %v3505_v22 = vld [vmem:[%s6521_s2] sm:$0xff]  ;;  %v3510_v10 = vld [vmem:[%s6521_s2 + $0x10] sm:$0xff] }
  0xdb   : > { %v356_v42 = vrot.slane %v355_v28, 1  ;;  %v483_v44 = vsel %vm331_vm0, %v464_v17, 0.0  ;;  %v527_v45 = vsel %vm380_vm1, %v464_v17, 0.0 }
  0xdc   : > { %v470_v47 = vsel %vm331_vm0, %v460_v31, 0.0  ;;  %v514_v48 = vsel %vm380_vm1, %v460_v31, 0.0  ;;  %v484_v49 = vadd.f32 %v483_v44, %v482_v32  ;;  %v528_v50 = vadd.f32 %v527_v45, %v526_v35 }
  0xdd   : > { %v471_v51 = vadd.f32 %v470_v47, %v469_v34  ;;  %v515_v52 = vadd.f32 %v514_v48, %v513_v38  ;;  %v357_v55 = vadd.f32 %v356_v42, %v355_v28  ;;  %v358_v37 = vmax.f32 %v344_v54, 0.0  ;;  %v3515_v28 = vld [vmem:[%s6521_s2 + $0x18] sm:$0xff]  ;;  %s4162_s2 = sld [smem:[#allocation2 + $0x48]] }
  0xde   : > { %v485_v39 = vrot.slane %v484_v49, 4  ;;  %v529_v56 = vrot.slane %v528_v50, 4  ;;  %v402_v23 = vadd.f32 %v401_v58, %v400_v36  ;;  %v390_v36 = vrot.slane %v389_v63, 2 }
  0xdf   : > { %v472_v43 = vrot.slane %v471_v51, 4  ;;  %v516_v57 = vrot.slane %v515_v52, 4  ;;  %v359_v3 = vmax.f32 %v357_v55, 0.0  ;;  %v3518_v29 = vmul.f32 %v3500_v41, %v358_v37 }
  0xe0   : > { %v486_v59 = vadd.f32 %v485_v39, %v484_v49  ;;  %v530_v60 = vadd.f32 %v529_v56, %v528_v50  ;;  %v3521_v30 = vmul.f32 %v3505_v22, %v358_v37  ;;  %v3524_v32 = vmul.f32 %v3510_v10, %v358_v37 }
  0xe1   : > { %v473_v61 = vadd.f32 %v472_v43, %v471_v51  ;;  %v517_v62 = vadd.f32 %v516_v57, %v515_v52  ;;  %v3527_v33 = vmul.f32 %v3505_v22, %v359_v3  ;;  %v3530_v35 = vmul.f32 %v3515_v28, %v358_v37 }
  0xe2   : > { %v487_v7 = vrot.slane %v486_v59, 2  ;;  %v531_v46 = vrot.slane %v530_v60, 2  ;;  %v3533_v38 = vmul.f32 %v3510_v10, %v359_v3  ;;  %v3536_v40 = vmul.f32 %v3500_v41, %v359_v3 }
  0xe3   : > { %v474_v11 = vrot.slane %v473_v61, 2  ;;  %v518_v16 = vrot.slane %v517_v62, 2  ;;  %v3539_v42 = vmul.f32 %v3515_v28, %v359_v3  ;;  %v403_v49 = vrot.slane %v402_v23, 2  ;;  %6583 = sst [smem:[#allocation61_spill]] %s4162_s2  ;;  %s4256_s2 = sld [smem:[#allocation2 + $0x55]] }
  0xe4   : > { %v488_v24 = vadd.f32 %v487_v7, %v486_v59  ;;  %v532_v25 = vadd.f32 %v531_v46, %v530_v60  ;;  %v391_v52 = vadd.f32 %v390_v36, %v389_v63 }
  0xe5   : > { %v475_v26 = vadd.f32 %v474_v11, %v473_v61  ;;  %v519_v27 = vadd.f32 %v518_v16, %v517_v62  ;;  %v404_v56 = vadd.f32 %v403_v49, %v402_v23 }
  0xe6   : > { %v489_v34 = vrot.slane %v488_v24, 1  ;;  %v533_v45 = vrot.slane %v532_v25, 1  ;;  %v392_v43 = vrot.slane %v391_v52, 1 }
  0xe7   : > { %v476_v17 = vrot.slane %v475_v26, 1  ;;  %v520_v31 = vrot.slane %v519_v27, 1 }
  0xe8   : > { %v490_v44 = vadd.f32 %v489_v34, %v488_v24  ;;  %v534_v54 = vadd.f32 %v533_v45, %v532_v25  ;;  %v393_v23 = vadd.f32 %v392_v43, %v391_v52  ;;  %v405_v24 = vrot.slane %v404_v56, 1 }
  0xe9   : > { %v477_v47 = vadd.f32 %v476_v17, %v475_v26  ;;  %v521_v48 = vadd.f32 %v520_v31, %v519_v27 }
  0xea   : > { %v492_v53 = vmax.f32 %v490_v44, 0.0  ;;  %v536_v37 = vmax.f32 %v534_v54, 0.0  ;;  %v407_v27 = vmax.f32 %v393_v23, 0.0  ;;  %v406_v36 = vadd.f32 %v405_v24, %v404_v56 }
  0xeb   : > { %v491_v50 = vmax.f32 %v477_v47, 0.0  ;;  %v535_v51 = vmax.f32 %v521_v48, 0.0 }
  0xec   : > { %v3552_v61 = vmul.f32 %v492_v53, %v3500_v41  ;;  %v497_v62 = vmul.f32 %v492_v53, %v3505_v22  ;;  %v3556_v63 = vmul.f32 %v492_v53, %v3515_v28  ;;  %v3561_v46 = vmul.f32 %v492_v53, %v3510_v10 }
  0xed   : > { %v538_v55 = vmul.f32 %v535_v51, %v3500_v41  ;;  %v537_v39 = vmul.f32 %v535_v51, %v3505_v22  ;;  %v494_v57 = vmul.f32 %v491_v50, %v3500_v41  ;;  %v493_v58 = vmul.f32 %v491_v50, %v3505_v22 }
  0xee   : > { %v3548_v59 = vmul.f32 %v491_v50, %v3515_v28  ;;  %v495_v60 = vmul.f32 %v491_v50, %v3510_v10  ;;  %v540_v3 = vmul.f32 %v535_v51, %v3515_v28  ;;  %v539_v7 = vmul.f32 %v535_v51, %v3510_v10 }
  0xef   : > { %555 = vrot.lane.b32.xlu1 %v538_v55, %s6347_s24  ;;  %553 = vrot.lane.b32.xlu0 %v537_v39, %s6347_s24  ;;  %v542_v11 = vmul.f32 %v536_v37, %v3500_v41  ;;  %v541_v16 = vmul.f32 %v536_v37, %v3505_v22  ;;  %v544_v25 = vmul.f32 %v536_v37, %v3515_v28  ;;  %v408_v31 = vmax.f32 %v406_v36, 0.0 }
  0xf0   : > { %v543_v26 = vmul.f32 %v536_v37, %v3510_v10  ;;  %v410_v34 = vmul.f32 %v407_v27, %v3500_v41  ;;  %v409_v17 = vmul.f32 %v407_v27, %v3505_v22  ;;  %v411_v44 = vmul.f32 %v407_v27, %v3510_v10 }
  0xf1   : > { %v413_v45 = vmul.f32 %v408_v31, %v3505_v22  ;;  %v412_v47 = vmul.f32 %v407_v27, %v3515_v28  ;;  %v415_v48 = vmul.f32 %v408_v31, %v3510_v10  ;;  %v414_v49 = vmul.f32 %v408_v31, %v3500_v41 }
  0xf2   : > { %v416_v50 = vmul.f32 %v408_v31, %v3515_v28  ;;  %v3243_v22 = vmov 0  }
  0xf3   : > { %559 = vrot.lane.b32.xlu1 %v540_v3, %s6347_s24  ;;  %557 = vrot.lane.b32.xlu0 %v539_v7, %s6347_s24 }
  0xf4   : > { %3157 = vset.pattern.permute.xlu1 %v3243_v22  ;;  %3156 = vset.pattern.permute.xlu0 %v3243_v22 }
  0xf7   : > { %563 = vrot.lane.b32.xlu1 %v542_v11, %s6347_s24  ;;  %561 = vrot.lane.b32.xlu0 %v541_v16, %s6347_s24 }
  0xfb   : > { %567 = vrot.lane.b32.xlu1 %v544_v25, %s6347_s24  ;;  %565 = vrot.lane.b32.xlu0 %v543_v26, %s6347_s24 }
  0xff   : > { %427 = vrot.lane.b32.xlu1 %v410_v34, %s6347_s24  ;;  %425 = vrot.lane.b32.xlu0 %v409_v17, %s6347_s24 }
 0x103   : > { %429 = vrot.lane.b32.xlu1 %v411_v44, %s6347_s24  ;;  %433 = vrot.lane.b32.xlu0 %v413_v45, %s6347_s24 }
 0x107   : > { %431 = vrot.lane.b32.xlu1 %v412_v47, %s6347_s24  ;;  %437 = vrot.lane.b32.xlu0 %v415_v48, %s6347_s24 }
 0x10b   : > { %435 = vrot.lane.b32.xlu1 %v414_v49, %s6347_s24 }
 0x10f   : > { %439 = vrot.lane.b32.xlu1 %v416_v50, %s6347_s24 }
 0x161   : > { %v556_v51 = vpop.permute.xlu1 %555  ;;  %v554_v52 = vpop.permute.xlu0 %553 }
 0x162   : > { %v578_v41 = vadd.f32 %v556_v51, %v494_v57  ;;  %v577_v3 = vadd.f32 %v554_v52, %v493_v58 }
 0x165   : > { %v560_v53 = vpop.permute.xlu1 %559  ;;  %v558_v54 = vpop.permute.xlu0 %557 }
 0x166   : > { %v579_v23 = vadd.f32 %v558_v54, %v495_v60  ;;  %v580_v58 = vadd.f32 %v560_v53, %v3548_v59 }
 0x169   : > { %v564_v10 = vpop.permute.xlu1 %563  ;;  %v562_v55 = vpop.permute.xlu0 %561 }
 0x16a   : > { %v581_v24 = vadd.f32 %v562_v55, %v497_v62  ;;  %v582_v49 = vadd.f32 %v564_v10, %v3552_v61 }
 0x16d   : > { %v568_v39 = vpop.permute.xlu1 %567  ;;  %v566_v56 = vpop.permute.xlu0 %565 }
 0x171   : > { %v428_v43 = vpop.permute.xlu1 %427  ;;  %v426_v37 = vpop.permute.xlu0 %425 }
 0x172   : > { %v450_v7 = vadd.f32 %v428_v43, %v3518_v29  ;;  %v449_v28 = vadd.f32 %v426_v37, %v3521_v30  ;;  %v583_v29 = vadd.f32 %v566_v56, %v3561_v46 }
 0x174   : > { %v586_v11 = vadd.f32 %v578_v41, %v450_v7  ;;  %v585_v16 = vadd.f32 %v577_v3, %v449_v28 }
 0x175   : > { %v430_v25 = vpop.permute.xlu1 %429  ;;  %v434_v26 = vpop.permute.xlu0 %433 }
 0x176   : > { %v2929_v27 = vmul.f32 -1.442695, %v586_v11  ;;  %v2928_v36 = vmul.f32 -1.442695, %v585_v16  ;;  %v451_v34 = vadd.f32 %v430_v25, %v3524_v32  ;;  %v453_v17 = vadd.f32 %v434_v26, %v3527_v33 }
 0x178   : > { %3158 = vpow2.f32 %v2929_v27  ;;  %v587_v31 = vadd.f32 %v579_v23, %v451_v34  ;;  %v589_v57 = vadd.f32 %v581_v24, %v453_v17 }
 0x179   : > { %3160 = vpow2.f32 %v2928_v36  ;;  %v432_v30 = vpop.permute.xlu1 %431  ;;  %v438_v44 = vpop.permute.xlu0 %437 }
 0x17a   : > { %v2930_v60 = vmul.f32 -1.442695, %v587_v31  ;;  %v2932_v62 = vmul.f32 -1.442695, %v589_v57  ;;  %v452_v45 = vadd.f32 %v432_v30, %v3530_v35  ;;  %v455_v47 = vadd.f32 %v438_v44, %v3533_v38 }
 0x17b   : > { %v584_v35 = vadd.f32 %v568_v39, %v3556_v63 }
 0x17c   : > { %3162 = vpow2.f32 %v2930_v60  ;;  %v588_v32 = vadd.f32 %v580_v58, %v452_v45  ;;  %v591_v48 = vadd.f32 %v583_v29, %v455_v47 }
 0x17d   : > { %3164 = vpow2.f32 %v2932_v62  ;;  %v436_v33 = vpop.permute.xlu1 %435 }
 0x17e   : > { %v2931_v50 = vmul.f32 -1.442695, %v588_v32  ;;  %v2934_v59 = vmul.f32 -1.442695, %v591_v48  ;;  %v454_v46 = vadd.f32 %v436_v33, %v3536_v40 }
 0x180   : > { %3166 = vpow2.f32 %v2931_v50  ;;  %v590_v22 = vadd.f32 %v582_v49, %v454_v46 }
 0x181   : > { %3168 = vpow2.f32 %v2934_v59  ;;  %v440_v51 = vpop.permute.xlu1 %439 }
 0x182   : > { %v3159_v52 = vpop.eup %3158  ;;  %v2933_v53 = vmul.f32 -1.442695, %v590_v22  ;;  %v456_v38 = vadd.f32 %v440_v51, %v3539_v42 }
 0x183   : > { %v3161_v54 = vpop.eup %3160  ;;  %v618_v55 = vadd.f32 1.0, %v3159_v52 }
 0x184   : > { %v617_v56 = vadd.f32 1.0, %v3161_v54  ;;  %3170 = vpow2.f32 %v2933_v53  ;;  %v592_v43 = vadd.f32 %v584_v35, %v456_v38 }
 0x185   : > { %3172 = vrcp.f32 %v618_v55 }
 0x186   : > { %v3163_v61 = vpop.eup %3162  ;;  %3174 = vrcp.f32 %v617_v56  ;;  %v2935_v10 = vmul.f32 -1.442695, %v592_v43 }
 0x187   : > { %v3165_v40 = vpop.eup %3164  ;;  %v619_v37 = vadd.f32 1.0, %v3163_v61 }
 0x188   : > { %v621_v41 = vadd.f32 1.0, %v3165_v40  ;;  %3176 = vpow2.f32 %v2935_v10 }
 0x189   : > { %3178 = vrcp.f32 %v619_v37 }
 0x18a   : > { %v3167_v3 = vpop.eup %3166  ;;  %3180 = vrcp.f32 %v621_v41 }
 0x18b   : > { %v3169_v7 = vpop.eup %3168  ;;  %v620_v63 = vadd.f32 1.0, %v3167_v3 }
 0x18c   : > { %v623_v39 = vadd.f32 1.0, %v3169_v7 }
 0x18d   : > { %3182 = vrcp.f32 %v620_v63 }
 0x18e   : > { %v3171_v42 = vpop.eup %3170  ;;  %3184 = vrcp.f32 %v623_v39 }
 0x18f   : > { %v3173_v28 = vpop.eup %3172  ;;  %v622_v11 = vadd.f32 1.0, %v3171_v42 }
 0x190   : > { %v3175_v16 = vpop.eup %3174  ;;  %648 = vperm.xlu1 %3157, %v3173_v28  }
 0x191   : > { %3186 = vrcp.f32 %v622_v11  ;;  %643 = vperm.xlu0 %3156, %v3175_v16  }
 0x192   : > { %v3177_v23 = vpop.eup %3176 }
 0x193   : > { %v3179_v24 = vpop.eup %3178  ;;  %v624_v25 = vadd.f32 1.0, %v3177_v23 }
 0x194   : > { %653 = vperm.xlu1 %3157, %v3179_v24   ;;  %v3181_v26 = vpop.eup %3180 }
 0x195   : > { %3188 = vrcp.f32 %v624_v25 }
 0x197   : > { %v3183_v27 = vpop.eup %3182 }
 0x198   : > { %663 = vperm.xlu1 %3157, %v3181_v26   ;;  %658 = vperm.xlu0 %3156, %v3183_v27   ;;  %v3185_v36 = vpop.eup %3184  ;;  %v3620_v27 = vstv %s3611_s25  ;;  %s3260_s25 = smov 17  }
 0x19b   : > { %v3187_v34 = vpop.eup %3186 }
 0x19c   : > { %673 = vperm.xlu1 %3157, %v3185_v36   ;;  %668 = vperm.xlu0 %3156, %v3187_v34   ;;  %v1760_v36 = vstv %s3613_s26  ;;  %s6335_s26 = smov 16  }
 0x19f   : > { %v3189_v17 = vpop.eup %3188 }
 0x1a0   : > { %678 = vperm.xlu0 %3156, %v3189_v17  }
 0x20f   : > { %v649_v31 = vpop.permute.xlu1 %648 }
 0x210   : > { %v683_v57 = vmul.f32 %v649_v31, %v3384_v8  ;;  %v684_v58 = vmul.f32 %v649_v31, %v3387_v9  ;;  %v644_v29 = vpop.permute.xlu0 %643 }
 0x211   : > { %v681_v30 = vmul.f32 %v644_v29, %v3368_v2  ;;  %v682_v44 = vmul.f32 %v644_v29, %v3373_v4 }
 0x213   : > { %v697_v60 = vadd.f32 %v683_v57, %v681_v30  ;;  %v706_v62 = vadd.f32 %v684_v58, %v682_v44  ;;  %v654_v45 = vpop.permute.xlu1 %653  ;;  %v737_v48 = vmax.f32 %v681_v30, %v683_v57  ;;  %v746_v33 = vmax.f32 %v682_v44, %v684_v58 }
 0x214   : > { %v685_v47 = vmul.f32 %v654_v45, %v3362_v0  ;;  %v686_v32 = vmul.f32 %v654_v45, %v3365_v1 }
 0x216   : > { %v698_v49 = vadd.f32 %v697_v60, %v685_v47  ;;  %v707_v50 = vadd.f32 %v706_v62, %v686_v32  ;;  %v738_v46 = vmax.f32 %v737_v48, %v685_v47  ;;  %v747_v9 = vmax.f32 %v746_v33, %v686_v32 }
 0x217   : > { %v664_v59 = vpop.permute.xlu1 %663  ;;  %v659_v8 = vpop.permute.xlu0 %658 }
 0x218   : > { %v687_v22 = vmul.f32 %v659_v8, %v3376_v5  ;;  %v688_v2 = vmul.f32 %v659_v8, %v3379_v6  ;;  %v689_v0 = vmul.f32 %v664_v59, %v3400_v14  ;;  %v690_v1 = vmul.f32 %v664_v59, %v3403_v15 }
 0x21a   : > { %v699_v4 = vadd.f32 %v698_v49, %v687_v22  ;;  %v708_v51 = vadd.f32 %v707_v50, %v688_v2  ;;  %v739_v52 = vmax.f32 %v738_v46, %v687_v22  ;;  %v748_v35 = vmax.f32 %v747_v9, %v688_v2 }
 0x21b   : > { %v674_v53 = vpop.permute.xlu1 %673  ;;  %v669_v38 = vpop.permute.xlu0 %668  ;;  %v6385_v46 = vlaneseq }
 0x21c   : > { %v700_v54 = vrot.slane %v699_v4, 4  ;;  %v709_v55 = vrot.slane %v708_v51, 4  ;;  %v740_v56 = vrot.slane %v739_v52, 4  ;;  %v749_v5 = vrot.slane %v748_v35, 4 }
 0x21d   : > { %v693_v6 = vmul.f32 %v674_v53, %v3416_v20  ;;  %v694_v43 = vmul.f32 %v674_v53, %v3419_v21  ;;  %v691_v61 = vmul.f32 %v669_v38, %v3394_v12  ;;  %v692_v14 = vmul.f32 %v669_v38, %v3397_v13 }
 0x21e   : > { %v701_v10 = vadd.f32 %v700_v54, %v699_v4  ;;  %v710_v15 = vadd.f32 %v709_v55, %v708_v51  ;;  %v741_v40 = vmax.f32 %v739_v52, %v740_v56  ;;  %v750_v37 = vmax.f32 %v748_v35, %v749_v5 }
 0x21f   : > { %v715_v41 = vadd.f32 %v691_v61, %v689_v0  ;;  %v724_v3 = vadd.f32 %v692_v14, %v690_v1  ;;  %v755_v7 = vmax.f32 %v689_v0, %v691_v61  ;;  %v764_v63 = vmax.f32 %v690_v1, %v692_v14  ;;  %v679_v11 = vpop.permute.xlu0 %678 }
 0x220   : > { %v702_v39 = vrot.slane %v701_v10, 2  ;;  %v711_v42 = vrot.slane %v710_v15, 2  ;;  %v742_v28 = vrot.slane %v741_v40, 2  ;;  %v751_v20 = vrot.slane %v750_v37, 2 }
 0x221   : > { %v716_v21 = vadd.f32 %v715_v41, %v693_v6  ;;  %v725_v16 = vadd.f32 %v724_v3, %v694_v43  ;;  %v756_v12 = vmax.f32 %v755_v7, %v693_v6  ;;  %v765_v23 = vmax.f32 %v764_v63, %v694_v43 }
 0x222   : > { %v703_v13 = vadd.f32 %v702_v39, %v701_v10  ;;  %v712_v24 = vadd.f32 %v711_v42, %v710_v15  ;;  %v743_v25 = vmax.f32 %v741_v40, %v742_v28  ;;  %v752_v26 = vmax.f32 %v750_v37, %v751_v20 }
 0x223   : > { %v695_v34 = vmul.f32 %v679_v11, %v3410_v18  ;;  %v696_v17 = vmul.f32 %v679_v11, %v3413_v19  ;;  %v3628_v61 = vshrl.u32 %v6385_v46, 7 }
 0x224   : > { %v704_v31 = vrot.slane %v703_v13, 1  ;;  %v713_v57 = vrot.slane %v712_v24, 1  ;;  %v744_v58 = vrot.slane %v743_v25, 1  ;;  %v753_v29 = vrot.slane %v752_v26, 1 }
 0x225   : > { %v717_v30 = vadd.f32 %v716_v21, %v695_v34  ;;  %v726_v44 = vadd.f32 %v725_v16, %v696_v17  ;;  %v757_v60 = vmax.f32 %v756_v12, %v695_v34  ;;  %v766_v62 = vmax.f32 %v765_v23, %v696_v17  ;;  %6522 = vst [vmem:[#allocation8_spill] sm:$0xff] %v3628_v61  ;;  %v3008_v12 = vld [vmem:[%s6525_s4 + $0x30] ss:$8 sm:$0x3]  ;;  %s4191_s4 = sld [smem:[#allocation2 + $0x50]] }
 0x226   : > { %v705_v45 = vadd.f32 %v704_v31, %v703_v13  ;;  %v714_v47 = vadd.f32 %v713_v57, %v712_v24  ;;  %v745_v32 = vmax.f32 %v743_v25, %v744_v58  ;;  %v754_v48 = vmax.f32 %v752_v26, %v753_v29 }
 0x227   : > { %v718_v33 = vrot.slane %v717_v30, 4  ;;  %v727_v49 = vrot.slane %v726_v44, 4  ;;  %v758_v50 = vrot.slane %v757_v60, 4  ;;  %v767_v59 = vrot.slane %v766_v62, 4 }
 0x228   : > { %v733_v8 = vmul.f32 0.03125, %v705_v45  ;;  %v734_v18 = vmul.f32 0.03125, %v714_v47  ;;  %v1761_v52 = vmul.f32 %v1760_v36, %v745_v32  ;;  %v1762_v35 = vmul.f32 %v1760_v36, %v754_v48 }
 0x229   : > { %v719_v19 = vadd.f32 %v718_v33, %v717_v30  ;;  %v728_v9 = vadd.f32 %v727_v49, %v726_v44  ;;  %v759_v22 = vmax.f32 %v757_v60, %v758_v50  ;;  %v768_v2 = vmax.f32 %v766_v62, %v767_v59 }
 0x22a   : > { %v1756_v4 = vmul.f32 %v3620_v27, %v733_v8  ;;  %v1757_v51 = vmul.f32 %v3620_v27, %v734_v18  ;;  %v3631_v63 = vsub.s32 0, %v3628_v61  ;;  %v3634_v39 = vsub.s32 1, %v3628_v61 }
 0x22b   : > { %v720_v0 = vrot.slane %v719_v19, 2  ;;  %v729_v1 = vrot.slane %v728_v9, 2  ;;  %v760_v53 = vrot.slane %v759_v22, 2  ;;  %v769_v38 = vrot.slane %v768_v2, 2  ;;  %6589 = sst [smem:[#allocation67_spill]] %s4191_s4  ;;  %s4289_s4 = sld [smem:[#allocation2]] }
 0x22c   : > { %v1765_v54 = vadd.f32 %v1761_v52, %v1756_v4  ;;  %v1766_v55 = vadd.f32 %v1762_v35, %v1757_v51  ;;  %v1773_v34 = vrot.slane %v3008_v12, %v3631_v63  ;;  %v1777_v17 = vrot.slane %v3008_v12, %v3634_v39 }
 0x22d   : > { %v721_v56 = vadd.f32 %v720_v0, %v719_v19  ;;  %v730_v5 = vadd.f32 %v729_v1, %v728_v9  ;;  %v761_v6 = vmax.f32 %v759_v22, %v760_v53  ;;  %v770_v43 = vmax.f32 %v768_v2, %v769_v38 }
 0x22e   : > { %v1780_v58 = vmul.f32 %v1773_v34, %v1765_v54  ;;  %v1781_v29 = vmul.f32 %v1777_v17, %v1766_v55 }
 0x22f   : > { %v722_v14 = vrot.slane %v721_v56, 1  ;;  %v731_v10 = vrot.slane %v730_v5, 1  ;;  %v762_v15 = vrot.slane %v761_v6, 1  ;;  %v771_v40 = vrot.slane %v770_v43, 1 }
 0x231   : > { %v723_v37 = vadd.f32 %v722_v14, %v721_v56  ;;  %v732_v41 = vadd.f32 %v731_v10, %v730_v5  ;;  %v763_v3 = vmax.f32 %v761_v6, %v762_v15  ;;  %v772_v7 = vmax.f32 %v770_v43, %v771_v40 }
 0x233   : > { %v735_v42 = vmul.f32 0.03125, %v723_v37  ;;  %v736_v28 = vmul.f32 0.03125, %v732_v41  ;;  %v3637_v20 = vsel %vm777_vm2, %v763_v3, %v745_v32  ;;  %v3640_v11 = vsel %vm777_vm2, %v772_v7, %v754_v48 }
 0x234   : > { %6523 = vst [vmem:[#allocation9_spill] sm:$0xff] %v3637_v20  ;;  %6524 = vst [vmem:[#allocation10_spill] sm:$0xff] %v3640_v11  ;;  %v1763_v21 = vmul.f32 %v1760_v36, %v763_v3  ;;  %v1764_v16 = vmul.f32 %v1760_v36, %v772_v7  ;;  %801 = vrot.lane.b32.xlu0 %v3640_v11, %s3244_s29  ;;  %799 = vrot.lane.b32.xlu1 %v3637_v20, %s3244_s29 }
 0x235   : > { %v3650_v23 = vsel %vm777_vm2, %v735_v42, %v733_v8  ;;  %v3653_v13 = vsel %vm777_vm2, %v736_v28, %v734_v18  ;;  %v1758_v24 = vmul.f32 %v3620_v27, %v735_v42  ;;  %v1759_v25 = vmul.f32 %v3620_v27, %v736_v28 }
 0x237   : > { %v1767_v26 = vadd.f32 %v1763_v21, %v1758_v24  ;;  %v1768_v36 = vadd.f32 %v1764_v16, %v1759_v25 }
 0x238   : > { %840 = vrot.lane.b32.xlu0 %v3640_v11, %s3245_s8  ;;  %838 = vrot.lane.b32.xlu1 %v3637_v20, %s3245_s8 }
 0x239   : > { %v1782_v31 = vmul.f32 %v1773_v34, %v1767_v26  ;;  %v1783_v57 = vmul.f32 %v1777_v17, %v1768_v36 }
 0x23b   : > { %v1788_v30 = vrot.slane %v1782_v31, 7  ;;  %v1790_v44 = vrot.slane %v1783_v57, 7 }
 0x23c   : > { %880 = vrot.lane.b32.xlu0 %v3640_v11, %s3246_s9  ;;  %878 = vrot.lane.b32.xlu1 %v3637_v20, %s3246_s9 }
 0x23d   : > { %v3668_v27 = vsel %vm777_vm2, %v1788_v30, %v1780_v58  ;;  %v3671_v60 = vsel %vm777_vm2, %v1790_v44, %v1781_v29 }
 0x23e   : > { %6526 = vst [vmem:[#allocation11_spill] sm:$0xff] %v3668_v27  ;;  %6527 = vst [vmem:[#allocation12_spill] sm:$0xff] %v3671_v60 }
 0x240   : > { %920 = vrot.lane.b32.xlu0 %v3640_v11, %s3247_s10  ;;  %918 = vrot.lane.b32.xlu1 %v3637_v20, %s3247_s10 }
 0x244   : > { %960 = vrot.lane.b32.xlu0 %v3640_v11, %s3248_s11  ;;  %958 = vrot.lane.b32.xlu1 %v3637_v20, %s3248_s11 }
 0x248   : > { %1000 = vrot.lane.b32.xlu0 %v3640_v11, %s3249_s12  ;;  %998 = vrot.lane.b32.xlu1 %v3637_v20, %s3249_s12 }
 0x24c   : > { %1040 = vrot.lane.b32.xlu0 %v3640_v11, %s3250_s13  ;;  %1038 = vrot.lane.b32.xlu1 %v3637_v20, %s3250_s13 }
 0x250   : > { %1080 = vrot.lane.b32.xlu0 %v3640_v11, %s3251_s14  ;;  %1078 = vrot.lane.b32.xlu1 %v3637_v20, %s3251_s14 }
 0x254   : > { %1120 = vrot.lane.b32.xlu0 %v3640_v11, %s3252_s15  ;;  %1118 = vrot.lane.b32.xlu1 %v3637_v20, %s3252_s15 }
 0x258   : > { %1160 = vrot.lane.b32.xlu0 %v3640_v11, %s3253_s16  ;;  %1158 = vrot.lane.b32.xlu1 %v3637_v20, %s3253_s16 }
 0x25c   : > { %1200 = vrot.lane.b32.xlu0 %v3640_v11, %s3254_s17  ;;  %1198 = vrot.lane.b32.xlu1 %v3637_v20, %s3254_s17 }
 0x260   : > { %1240 = vrot.lane.b32.xlu0 %v3640_v11, %s3255_s19  ;;  %1238 = vrot.lane.b32.xlu1 %v3637_v20, %s3255_s19 }
 0x264   : > { %1280 = vrot.lane.b32.xlu0 %v3640_v11, %s3256_s20  ;;  %1278 = vrot.lane.b32.xlu1 %v3637_v20, %s3256_s20 }
 0x268   : > { %1320 = vrot.lane.b32.xlu0 %v3640_v11, %s3257_s21  ;;  %1318 = vrot.lane.b32.xlu1 %v3637_v20, %s3257_s21 }
 0x26c   : > { %1360 = vrot.lane.b32.xlu0 %v3640_v11, %s3258_s22  ;;  %1358 = vrot.lane.b32.xlu1 %v3637_v20, %s3258_s22 }
 0x270   : > { %1400 = vrot.lane.b32.xlu0 %v3640_v11, %s3259_s23  ;;  %1398 = vrot.lane.b32.xlu1 %v3637_v20, %s3259_s23 }
 0x274   : > { %1440 = vrot.lane.b32.xlu0 %v3640_v11, %s3260_s25  ;;  %1438 = vrot.lane.b32.xlu1 %v3637_v20, %s3260_s25 }
 0x278   : > { %1480 = vrot.lane.b32.xlu0 %v3640_v11, %s6335_s26  ;;  %1478 = vrot.lane.b32.xlu1 %v3637_v20, %s6335_s26  ;;  %s6341_s26 = smov 3  }
 0x27c   : > { %1520 = vrot.lane.b32.xlu0 %v3640_v11, %s6337_s30  ;;  %1518 = vrot.lane.b32.xlu1 %v3637_v20, %s6337_s30  ;;  %s6343_s30 = smov 2  }
 0x280   : > { %1560 = vrot.lane.b32.xlu0 %v3640_v11, %s6339_s7  ;;  %1558 = vrot.lane.b32.xlu1 %v3637_v20, %s6339_s7  ;;  %s6345_s7 = smov 1  }
 0x284   : > { %1600 = vrot.lane.b32.xlu0 %v3640_v11, %s3264_s28  ;;  %1598 = vrot.lane.b32.xlu1 %v3637_v20, %s3264_s28 }
 0x288   : > { %1640 = vrot.lane.b32.xlu0 %v3640_v11, %s6341_s26  ;;  %1638 = vrot.lane.b32.xlu1 %v3637_v20, %s6341_s26  ;;  %s6349_s26 = smov 126  }
 0x28c   : > { %1680 = vrot.lane.b32.xlu0 %v3640_v11, %s6343_s30  ;;  %1678 = vrot.lane.b32.xlu1 %v3637_v20, %s6343_s30  ;;  %s6421_s30 = smov 125  }
 0x290   : > { %1720 = vrot.lane.b32.xlu0 %v3640_v11, %s6345_s7  ;;  %1718 = vrot.lane.b32.xlu1 %v3637_v20, %s6345_s7  ;;  %s6351_s7 = smov 115  }
 0x294   : > { %1805 = vrot.lane.b32.xlu0 %v3640_v11, %s6347_s24  ;;  %1803 = vrot.lane.b32.xlu1 %v3637_v20, %s6347_s24  ;;  %s6353_s24 = smov 114  }
 0x298   : > { %1845 = vrot.lane.b32.xlu0 %v3640_v11, %s6349_s26  ;;  %1843 = vrot.lane.b32.xlu1 %v3637_v20, %s6349_s26  ;;  %s6355_s26 = smov 113  }
 0x29c   : > { %1885 = vrot.lane.b32.xlu0 %v3640_v11, %s6421_s30  ;;  %1883 = vrot.lane.b32.xlu1 %v3637_v20, %s6421_s30  ;;  %s4154_s30 = sld [smem:[#allocation2 + $0x46]] }
 0x2a0   : > { %1925 = vrot.lane.b32.xlu0 %v3640_v11, %s6351_s7  ;;  %1923 = vrot.lane.b32.xlu1 %v3637_v20, %s6351_s7  ;;  %s6357_s7 = smov 112  }
 0x2a4   : > { %1965 = vrot.lane.b32.xlu0 %v3640_v11, %s6353_s24  ;;  %1963 = vrot.lane.b32.xlu1 %v3637_v20, %s6353_s24  ;;  %s6359_s24 = smov 111  }
 0x2a6   : > { %v3777_v62 = vpop.permute.xlu0 %801  ;;  %v3779_v45 = vpop.permute.xlu1 %799 }
 0x2a8   : > { %2005 = vrot.lane.b32.xlu0 %v3640_v11, %s6355_s26  ;;  %2003 = vrot.lane.b32.xlu1 %v3637_v20, %s6355_s26  ;;  %s6361_s26 = smov 110  }
 0x2aa   : > { %v3785_v47 = vpop.permute.xlu0 %840  ;;  %v3787_v32 = vpop.permute.xlu1 %838 }
 0x2ac   : > { %2045 = vrot.lane.b32.xlu0 %v3640_v11, %s6357_s7  ;;  %2043 = vrot.lane.b32.xlu1 %v3637_v20, %s6357_s7  ;;  %s6363_s7 = smov 109  }
 0x2ae   : > { %v3793_v48 = vpop.permute.xlu0 %880  ;;  %v3795_v33 = vpop.permute.xlu1 %878 }
 0x2b0   : > { %2085 = vrot.lane.b32.xlu0 %v3640_v11, %s6359_s24  ;;  %2083 = vrot.lane.b32.xlu1 %v3637_v20, %s6359_s24  ;;  %s6365_s24 = smov 99  }
 0x2b2   : > { %v3801_v49 = vpop.permute.xlu0 %920  ;;  %v3803_v50 = vpop.permute.xlu1 %918 }
 0x2b4   : > { %2125 = vrot.lane.b32.xlu0 %v3640_v11, %s6361_s26  ;;  %2123 = vrot.lane.b32.xlu1 %v3637_v20, %s6361_s26  ;;  %s6367_s26 = smov 98  }
 0x2b6   : > { %v3809_v59 = vpop.permute.xlu0 %960  ;;  %v3811_v8 = vpop.permute.xlu1 %958 }
 0x2b8   : > { %2165 = vrot.lane.b32.xlu0 %v3640_v11, %s6363_s7  ;;  %2163 = vrot.lane.b32.xlu1 %v3637_v20, %s6363_s7  ;;  %s6369_s7 = smov 97  }
 0x2ba   : > { %v3817_v18 = vpop.permute.xlu0 %1000  ;;  %v3819_v19 = vpop.permute.xlu1 %998 }
 0x2bc   : > { %2205 = vrot.lane.b32.xlu0 %v3640_v11, %s6365_s24  ;;  %2203 = vrot.lane.b32.xlu1 %v3637_v20, %s6365_s24  ;;  %s6371_s24 = smov 96  }
 0x2be   : > { %v3825_v9 = vpop.permute.xlu0 %1040  ;;  %v3827_v22 = vpop.permute.xlu1 %1038 }
 0x2c0   : > { %2245 = vrot.lane.b32.xlu0 %v3640_v11, %s6367_s26  ;;  %2243 = vrot.lane.b32.xlu1 %v3637_v20, %s6367_s26  ;;  %s6373_s26 = smov 95  }
 0x2c2   : > { %v3833_v2 = vpop.permute.xlu0 %1080  ;;  %v3835_v4 = vpop.permute.xlu1 %1078 }
 0x2c4   : > { %2285 = vrot.lane.b32.xlu0 %v3640_v11, %s6369_s7  ;;  %2283 = vrot.lane.b32.xlu1 %v3637_v20, %s6369_s7  ;;  %s6375_s7 = smov 94  }
 0x2c6   : > { %v3841_v51 = vpop.permute.xlu0 %1120  ;;  %v3843_v52 = vpop.permute.xlu1 %1118 }
 0x2c8   : > { %2325 = vrot.lane.b32.xlu0 %v3640_v11, %s6371_s24  ;;  %2323 = vrot.lane.b32.xlu1 %v3637_v20, %s6371_s24  ;;  %s6377_s24 = smov 93  }
 0x2ca   : > { %v3849_v35 = vpop.permute.xlu0 %1160  ;;  %v3851_v0 = vpop.permute.xlu1 %1158 }
 0x2cc   : > { %2365 = vrot.lane.b32.xlu0 %v3640_v11, %s6373_s26  ;;  %2363 = vrot.lane.b32.xlu1 %v3637_v20, %s6373_s26  ;;  %s6379_s26 = smov 83  }
 0x2ce   : > { %v3857_v1 = vpop.permute.xlu0 %1200  ;;  %v3859_v53 = vpop.permute.xlu1 %1198 }
 0x2d0   : > { %2405 = vrot.lane.b32.xlu0 %v3640_v11, %s6375_s7  ;;  %2403 = vrot.lane.b32.xlu1 %v3637_v20, %s6375_s7  ;;  %s6381_s7 = smov 82  }
 0x2d2   : > { %v3865_v38 = vpop.permute.xlu0 %1240  ;;  %v3867_v54 = vpop.permute.xlu1 %1238 }
 0x2d4   : > { %2445 = vrot.lane.b32.xlu0 %v3640_v11, %s6377_s24  ;;  %2443 = vrot.lane.b32.xlu1 %v3637_v20, %s6377_s24  ;;  %s6383_s24 = smov 81  }
 0x2d6   : > { %v3873_v55 = vpop.permute.xlu0 %1280  ;;  %v3875_v56 = vpop.permute.xlu1 %1278 }
 0x2d8   : > { %2485 = vrot.lane.b32.xlu0 %v3640_v11, %s6379_s26  ;;  %2483 = vrot.lane.b32.xlu1 %v3637_v20, %s6379_s26  ;;  %s6419_s26 = smov 80  }
 0x2da   : > { %v3881_v5 = vpop.permute.xlu0 %1320  ;;  %v3883_v6 = vpop.permute.xlu1 %1318 }
 0x2dc   : > { %2525 = vrot.lane.b32.xlu0 %v3640_v11, %s6381_s7  ;;  %2523 = vrot.lane.b32.xlu1 %v3637_v20, %s6381_s7  ;;  %s6415_s7 = smov 79  }
 0x2de   : > { %v3889_v43 = vpop.permute.xlu0 %1360  ;;  %v3891_v14 = vpop.permute.xlu1 %1358 }
 0x2e0   : > { %2565 = vrot.lane.b32.xlu0 %v3640_v11, %s6383_s24  ;;  %2563 = vrot.lane.b32.xlu1 %v3637_v20, %s6383_s24  ;;  %s6413_s24 = smov 78  }
 0x2e2   : > { %v3897_v10 = vpop.permute.xlu0 %1400  ;;  %v3899_v15 = vpop.permute.xlu1 %1398 }
 0x2e4   : > { %2605 = vrot.lane.b32.xlu0 %v3640_v11, %s6419_s26  ;;  %2603 = vrot.lane.b32.xlu1 %v3637_v20, %s6419_s26  ;;  %s4150_s26 = sld [smem:[#allocation2 + $0x44]] }
 0x2e6   : > { %v3905_v40 = vpop.permute.xlu0 %1440  ;;  %v3907_v37 = vpop.permute.xlu1 %1438 }
 0x2e8   : > { %2645 = vrot.lane.b32.xlu0 %v3640_v11, %s6415_s7  ;;  %2643 = vrot.lane.b32.xlu1 %v3637_v20, %s6415_s7  ;;  %s4144_s7 = sld [smem:[#allocation2 + $0x43]] }
 0x2ea   : > { %v3913_v41 = vpop.permute.xlu0 %1480  ;;  %v3915_v3 = vpop.permute.xlu1 %1478 }
 0x2ec   : > { %2685 = vrot.lane.b32.xlu0 %v3640_v11, %s6413_s24  ;;  %2683 = vrot.lane.b32.xlu1 %v3637_v20, %s6413_s24  ;;  %s4142_s24 = sld [smem:[#allocation2 + $0x42]] }
 0x2ee   : > { %v3921_v7 = vpop.permute.xlu0 %1520  ;;  %v3923_v42 = vpop.permute.xlu1 %1518 }
 0x2f0   : > { %784 = vrot.lane.b32.xlu0 %v3653_v13, %s3244_s29  ;;  %782 = vrot.lane.b32.xlu1 %v3650_v23, %s3244_s29  ;;  %s6560_s29 = smov 16  }
 0x2f2   : > { %v3929_v28 = vpop.permute.xlu0 %1560  ;;  %v3931_v21 = vpop.permute.xlu1 %1558 }
 0x2f4   : > { %833 = vrot.lane.b32.xlu0 %v3653_v13, %s3245_s8  ;;  %831 = vrot.lane.b32.xlu1 %v3650_v23, %s3245_s8  ;;  %s6563_s8 = smov 15  }
 0x2f6   : > { %v3937_v16 = vpop.permute.xlu0 %1600  ;;  %v3939_v12 = vpop.permute.xlu1 %1598 }
 0x2f7   : > { %6528 = vst [vmem:[#allocation13_spill] sm:$0xff] %v3937_v16  ;;  %6529 = vst [vmem:[#allocation14_spill] sm:$0xff] %v3939_v12 }
 0x2f8   : > { %873 = vrot.lane.b32.xlu0 %v3653_v13, %s3246_s9  ;;  %871 = vrot.lane.b32.xlu1 %v3650_v23, %s3246_s9  ;;  %s6566_s9 = smov 14  }
 0x2fa   : > { %v3945_v24 = vpop.permute.xlu0 %1640  ;;  %v3947_v25 = vpop.permute.xlu1 %1638 }
 0x2fb   : > { %6530 = vst [vmem:[#allocation15_spill] sm:$0xff] %v3945_v24  ;;  %6531 = vst [vmem:[#allocation16_spill] sm:$0xff] %v3947_v25 }
 0x2fc   : > { %913 = vrot.lane.b32.xlu0 %v3653_v13, %s3247_s10  ;;  %911 = vrot.lane.b32.xlu1 %v3650_v23, %s3247_s10  ;;  %s4089_s10 = sld [smem:[#allocation2 + $0x31]] }
 0x2fe   : > { %v3953_v26 = vpop.permute.xlu0 %1680  ;;  %v3955_v36 = vpop.permute.xlu1 %1678 }
 0x2ff   : > { %6532 = vst [vmem:[#allocation17_spill] sm:$0xff] %v3953_v26  ;;  %6533 = vst [vmem:[#allocation18_spill] sm:$0xff] %v3955_v36 }
 0x300   : > { %953 = vrot.lane.b32.xlu0 %v3653_v13, %s3248_s11  ;;  %951 = vrot.lane.b32.xlu1 %v3650_v23, %s3248_s11  ;;  %s4091_s11 = sld [smem:[#allocation2 + $0x32]] }
 0x302   : > { %v3961_v34 = vpop.permute.xlu0 %1720  ;;  %v3963_v17 = vpop.permute.xlu1 %1718 }
 0x303   : > { %6534 = vst [vmem:[#allocation19_spill] sm:$0xff] %v3961_v34  ;;  %6535 = vst [vmem:[#allocation20_spill] sm:$0xff] %v3963_v17 }
 0x304   : > { %993 = vrot.lane.b32.xlu0 %v3653_v13, %s3249_s12  ;;  %991 = vrot.lane.b32.xlu1 %v3650_v23, %s3249_s12  ;;  %s4093_s12 = sld [smem:[#allocation2 + $0x33]] }
 0x306   : > { %v3969_v31 = vpop.permute.xlu0 %1805  ;;  %v3971_v57 = vpop.permute.xlu1 %1803 }
 0x307   : > { %6536 = vst [vmem:[#allocation21_spill] sm:$0xff] %v3969_v31  ;;  %6537 = vst [vmem:[#allocation22_spill] sm:$0xff] %v3971_v57 }
 0x308   : > { %1033 = vrot.lane.b32.xlu0 %v3653_v13, %s3250_s13  ;;  %1031 = vrot.lane.b32.xlu1 %v3650_v23, %s3250_s13  ;;  %s4099_s13 = sld [smem:[#allocation2 + $0x34]] }
 0x30a   : > { %v3977_v58 = vpop.permute.xlu0 %1845  ;;  %v3979_v29 = vpop.permute.xlu1 %1843 }
 0x30b   : > { %6538 = vst [vmem:[#allocation23_spill] sm:$0xff] %v3977_v58  ;;  %6539 = vst [vmem:[#allocation24_spill] sm:$0xff] %v3979_v29 }
 0x30c   : > { %1073 = vrot.lane.b32.xlu0 %v3653_v13, %s3251_s14  ;;  %1071 = vrot.lane.b32.xlu1 %v3650_v23, %s3251_s14  ;;  %s4101_s14 = sld [smem:[#allocation2 + $0x35]] }
 0x30e   : > { %v3985_v30 = vpop.permute.xlu0 %1885  ;;  %v3987_v44 = vpop.permute.xlu1 %1883  ;;  %6571 = sst [smem:[#allocation53_spill]] %s4099_s13  ;;  %s6590_s13 = smov 127  }
 0x30f   : > { %6540 = vst [vmem:[#allocation25_spill] sm:$0xff] %v3985_v30  ;;  %6541 = vst [vmem:[#allocation26_spill] sm:$0xff] %v3987_v44 }
 0x310   : > { %1113 = vrot.lane.b32.xlu0 %v3653_v13, %s3252_s15  ;;  %1111 = vrot.lane.b32.xlu1 %v3650_v23, %s3252_s15  ;;  %s4103_s15 = sld [smem:[#allocation2 + $0x36]] }
 0x312   : > { %v3993_v46 = vpop.permute.xlu0 %1925  ;;  %v3995_v61 = vpop.permute.xlu1 %1923 }
 0x313   : > { %6542 = vst [vmem:[#allocation27_spill] sm:$0xff] %v3993_v46  ;;  %6543 = vst [vmem:[#allocation28_spill] sm:$0xff] %v3995_v61 }
 0x314   : > { %1153 = vrot.lane.b32.xlu0 %v3653_v13, %s3253_s16  ;;  %1151 = vrot.lane.b32.xlu1 %v3650_v23, %s3253_s16  ;;  %s4105_s16 = sld [smem:[#allocation2 + $0x37]] }
 0x316   : > { %v4001_v60 = vpop.permute.xlu0 %1965  ;;  %v4003_v27 = vpop.permute.xlu1 %1963  ;;  %6572 = sst [smem:[#allocation54_spill]] %s4103_s15  ;;  %s4206_s15 = sld [smem:[#allocation2 + $0x51]] }
 0x317   : > { %6544 = vst [vmem:[#allocation29_spill] sm:$0xff] %v4001_v60  ;;  %6545 = vst [vmem:[#allocation30_spill] sm:$0xff] %v4003_v27 }
 0x318   : > { %1193 = vrot.lane.b32.xlu0 %v3653_v13, %s3254_s17  ;;  %1191 = vrot.lane.b32.xlu1 %v3650_v23, %s3254_s17  ;;  %s6573_s17 = smov 3  }
 0x31a   : > { %v4009_v20 = vpop.permute.xlu0 %2005  ;;  %v4011_v46 = vpop.permute.xlu1 %2003 }
 0x31b   : > { %6546 = vst [vmem:[#allocation31_spill] sm:$0xff] %v4009_v20  ;;  %6547 = vst [vmem:[#allocation32_spill] sm:$0xff] %v4011_v46 }
 0x31c   : > { %1233 = vrot.lane.b32.xlu0 %v3653_v13, %s3255_s19  ;;  %1231 = vrot.lane.b32.xlu1 %v3650_v23, %s3255_s19  ;;  %s4113_s19 = sld [smem:[#allocation2 + $0x39]]  ;;  %6591 = sst [smem:[#allocation68_spill]] %s4206_s15 }
 0x31d   : > { %s4322_s15 = sld [smem:[#allocation2 + $0x58]] }
 0x31e   : > { %v4017_v61 = vpop.permute.xlu0 %2045  ;;  %v4019_v60 = vpop.permute.xlu1 %2043 }
 0x31f   : > { %6548 = vst [vmem:[#allocation33_spill] sm:$0xff] %v4017_v61  ;;  %6549 = vst [vmem:[#allocation34_spill] sm:$0xff] %v4019_v60 }
 0x320   : > { %1273 = vrot.lane.b32.xlu0 %v3653_v13, %s3256_s20  ;;  %1271 = vrot.lane.b32.xlu1 %v3650_v23, %s3256_s20  ;;  %s4115_s20 = sld [smem:[#allocation2 + $0x3a]] }
 0x322   : > { %v4025_v27 = vpop.permute.xlu0 %2085  ;;  %v4027_v20 = vpop.permute.xlu1 %2083 }
 0x323   : > { %6550 = vst [vmem:[#allocation35_spill] sm:$0xff] %v4025_v27  ;;  %6551 = vst [vmem:[#allocation36_spill] sm:$0xff] %v4027_v20 }
 0x324   : > { %1313 = vrot.lane.b32.xlu0 %v3653_v13, %s3257_s21  ;;  %1311 = vrot.lane.b32.xlu1 %v3650_v23, %s3257_s21  ;;  %s4117_s21 = sld [smem:[#allocation2 + $0x3b]] }
 0x326   : > { %v4033_v46 = vpop.permute.xlu0 %2125  ;;  %v4035_v61 = vpop.permute.xlu1 %2123 }
 0x327   : > { %6552 = vst [vmem:[#allocation37_spill] sm:$0xff] %v4033_v46  ;;  %6553 = vst [vmem:[#allocation38_spill] sm:$0xff] %v4035_v61 }
 0x328   : > { %1353 = vrot.lane.b32.xlu0 %v3653_v13, %s3258_s22  ;;  %1351 = vrot.lane.b32.xlu1 %v3650_v23, %s3258_s22  ;;  %s4123_s22 = sld [smem:[#allocation2 + $0x3c]] }
 0x32a   : > { %v4041_v60 = vpop.permute.xlu0 %2165  ;;  %v4043_v27 = vpop.permute.xlu1 %2163 }
 0x32b   : > { %6554 = vst [vmem:[#allocation39_spill] sm:$0xff] %v4041_v60  ;;  %6555 = vst [vmem:[#allocation40_spill] sm:$0xff] %v4043_v27 }
 0x32c   : > { %1393 = vrot.lane.b32.xlu0 %v3653_v13, %s3259_s23  ;;  %1391 = vrot.lane.b32.xlu1 %v3650_v23, %s3259_s23  ;;  %s4125_s23 = sld [smem:[#allocation2 + $0x3d]] }
 0x32e   : > { %v4049_v20 = vpop.permute.xlu0 %2205  ;;  %v4051_v46 = vpop.permute.xlu1 %2203 }
 0x32f   : > { %6556 = vst [vmem:[#allocation41_spill] sm:$0xff] %v4049_v20  ;;  %6557 = vst [vmem:[#allocation42_spill] sm:$0xff] %v4051_v46 }
 0x330   : > { %1433 = vrot.lane.b32.xlu0 %v3653_v13, %s3260_s25  ;;  %1431 = vrot.lane.b32.xlu1 %v3650_v23, %s3260_s25  ;;  %s4127_s25 = sld [smem:[#allocation2 + $0x3e]] }
 0x332   : > { %v4057_v61 = vpop.permute.xlu0 %2245  ;;  %v4059_v60 = vpop.permute.xlu1 %2243  ;;  %6576 = sst [smem:[#allocation57_spill]] %s4125_s23  ;;  %s6595_s23 = smov 126  }
 0x333   : > { %6558 = vst [vmem:[#allocation43_spill] sm:$0xff] %v4057_v61  ;;  %6559 = vst [vmem:[#allocation44_spill] sm:$0xff] %v4059_v60 }
 0x334   : > { %1473 = vrot.lane.b32.xlu0 %v3653_v13, %s6560_s29  ;;  %1471 = vrot.lane.b32.xlu1 %v3650_v23, %s6560_s29  ;;  %s4129_s29 = sld [smem:[#allocation2 + $0x3f]] }
 0x336   : > { %v4065_v27 = vpop.permute.xlu0 %2285  ;;  %v4067_v20 = vpop.permute.xlu1 %2283  ;;  %6577 = sst [smem:[#allocation58_spill]] %s4127_s25  ;;  %s4222_s25 = sld [smem:[#allocation2 + $0x53]] }
 0x337   : > { %6561 = vst [vmem:[#allocation45_spill] sm:$0xff] %v4065_v27  ;;  %6562 = vst [vmem:[#allocation46_spill] sm:$0xff] %v4067_v20 }
 0x338   : > { %1513 = vrot.lane.b32.xlu0 %v3653_v13, %s6563_s8  ;;  %1511 = vrot.lane.b32.xlu1 %v3650_v23, %s6563_s8  ;;  %s6578_s8 = smov 2  }
 0x33a   : > { %v4073_v46 = vpop.permute.xlu0 %2325  ;;  %v4075_v61 = vpop.permute.xlu1 %2323 }
 0x33b   : > { %6564 = vst [vmem:[#allocation47_spill] sm:$0xff] %v4073_v46  ;;  %6565 = vst [vmem:[#allocation48_spill] sm:$0xff] %v4075_v61 }
 0x33c   : > { %1553 = vrot.lane.b32.xlu0 %v3653_v13, %s6566_s9  ;;  %1551 = vrot.lane.b32.xlu1 %v3650_v23, %s6566_s9  ;;  %s4135_s9 = sld [smem:[#allocation2 + $0x40]] }
 0x33e   : > { %v4081_v60 = vpop.permute.xlu0 %2365  ;;  %v4083_v27 = vpop.permute.xlu1 %2363 }
 0x33f   : > { %6567 = vst [vmem:[#allocation49_spill] sm:$0xff] %v4081_v60  ;;  %6568 = vst [vmem:[#allocation50_spill] sm:$0xff] %v4083_v27 }
 0x340   : > { %1593 = vrot.lane.b32.xlu0 %v3653_v13, %s3264_s28  ;;  %1591 = vrot.lane.b32.xlu1 %v3650_v23, %s3264_s28  ;;  %s4111_s28 = sld [smem:[#allocation2 + $0x38]] }
 0x342   : > { %v4095_v61 = vpop.permute.xlu0 %2405  ;;  %v4097_v46 = vpop.permute.xlu1 %2403 }
 0x343   : > { %6569 = vst [vmem:[#allocation51_spill] sm:$0xff] %v4095_v61  ;;  %6570 = vst [vmem:[#allocation52_spill] sm:$0xff] %v4097_v46 }
 0x344   : > { %1633 = vrot.lane.b32.xlu0 %v3653_v13, %s6573_s17  ;;  %1631 = vrot.lane.b32.xlu1 %v3650_v23, %s6573_s17  ;;  %s4137_s17 = sld [smem:[#allocation2 + $0x41]] }
 0x346   : > { %v4119_v46 = vpop.permute.xlu0 %2445  ;;  %v4121_v61 = vpop.permute.xlu1 %2443 }
 0x347   : > { %6574 = vst [vmem:[#allocation55_spill] sm:$0xff] %v4119_v46  ;;  %6575 = vst [vmem:[#allocation56_spill] sm:$0xff] %v4121_v61  ;;  %v6579_v61 = vlaneseq }
 0x348   : > { %1673 = vrot.lane.b32.xlu0 %v3653_v13, %s6578_s8  ;;  %1671 = vrot.lane.b32.xlu1 %v3650_v23, %s6578_s8  ;;  %s4152_s8 = sld [smem:[#allocation2 + $0x45]] }
 0x349   : > { %v4140_v46 = vand.u32 127, %v6579_v61 }
 0x34a   : > { %v4146_v27 = vpop.permute.xlu0 %2485  ;;  %v4148_v60 = vpop.permute.xlu1 %2483 }
 0x34b   : > { %6580 = vst [vmem:[#allocation59_spill] sm:$0xff] %v4146_v27  ;;  %6581 = vst [vmem:[#allocation60_spill] sm:$0xff] %v4148_v60  ;;  %vm788_vm3 = vcmp.lt.s32.totalorder %v4140_v46, 51  ;;  %vm835_vm4 = vcmp.lt.s32.totalorder %v4140_v46, 50  ;;  %vm875_vm5 = vcmp.lt.s32.totalorder %v4140_v46, 49  ;;  %vm915_vm6 = vcmp.lt.s32.totalorder %v4140_v46, 48 }
 0x34c   : > { %1713 = vrot.lane.b32.xlu0 %v3653_v13, %s6582_s1  ;;  %1711 = vrot.lane.b32.xlu1 %v3650_v23, %s6582_s1  ;;  %s4181_s1 = sld [smem:[#allocation2 + $0x4d]]  ;;  %vm955_vm7 = vcmp.lt.s32.totalorder %v4140_v46, 47  ;;  %vm995_vm8 = vcmp.lt.s32.totalorder %v4140_v46, 46  ;;  %vm1035_vm9 = vcmp.lt.s32.totalorder %v4140_v46, 45  ;;  %vm1075_vm10 = vcmp.lt.s32.totalorder %v4140_v46, 35 }
 0x34d   : > { %vm1115_vm11 = vcmp.lt.s32.totalorder %v4140_v46, 34  ;;  %v803_v30 = vsel %vm788_vm3, %v3779_v45, %v3777_v62  ;;  %v804_v29 = vsel %vm788_vm3, %v3777_v62, %v3779_v45  ;;  %v843_v20 = vsel %vm835_vm4, %v3785_v47, %v3787_v32 }
 0x34e   : > { %v4173_v60 = vpop.permute.xlu0 %2525  ;;  %v4175_v27 = vpop.permute.xlu1 %2523  ;;  %v842_v62 = vsel %vm835_vm4, %v3787_v32, %v3785_v47  ;;  %vm1155_vm12 = vcmp.lt.s32.totalorder %v4140_v46, 33  ;;  %v882_v32 = vsel %vm875_vm5, %v3795_v33, %v3793_v48  ;;  %vm1195_vm13 = vcmp.lt.s32.totalorder %v4140_v46, 32 }
 0x34f   : > { %6586 = vst [vmem:[#allocation64_spill] sm:$0xff] %v4173_v60  ;;  %6587 = vst [vmem:[#allocation65_spill] sm:$0xff] %v4175_v27  ;;  %v883_v27 = vsel %vm875_vm5, %v3793_v48, %v3795_v33  ;;  %v6606_v48 = vstv %s4093_s12  ;;  %s4361_s12 = sld [smem:[#allocation2 + $0x1]]  ;;  %vm1235_vm14 = vcmp.lt.s32.totalorder %v4140_v46, 31  ;;  %vm1275_vm15 = vcmp.lt.s32.totalorder %v4140_v46, 30 }
 0x350   : > { %1798 = vrot.lane.b32.xlu0 %v3653_v13, %s6590_s13  ;;  %1796 = vrot.lane.b32.xlu1 %v3650_v23, %s6590_s13  ;;  %s4216_s13 = sld [smem:[#allocation2 + $0x52]]  ;;  %vm1315_vm0 = vcmp.lt.s32.totalorder %v4140_v46, 29  ;;  %vm1355_vm1 = vcmp.lt.s32.totalorder %v4140_v46, 19  ;;  %vm1395_vm2 = vcmp.lt.s32.totalorder %v4140_v46, 18 }
 0x352   : > { %v4208_v58 = vpop.permute.xlu0 %2565  ;;  %v4210_v57 = vpop.permute.xlu1 %2563 }
 0x353   : > { %6592 = vst [vmem:[#allocation69_spill] sm:$0xff] %v4208_v58  ;;  %6593 = vst [vmem:[#allocation70_spill] sm:$0xff] %v4210_v57  ;;  %v6599_v57 = vstv %s4089_s10  ;;  %s6602_s10 = sld [smem:[#allocation53_spill]] }
 0x354   : > { %1838 = vrot.lane.b32.xlu0 %v3653_v13, %s6595_s23  ;;  %1836 = vrot.lane.b32.xlu1 %v3650_v23, %s6595_s23  ;;  %s4243_s23 = sld [smem:[#allocation2 + $0x54]]  ;;  %v4273_v61 = vmul.f32 %v6599_v57, %v804_v29  ;;  %v6600_v44 = vmov %v6599_v57  ;;  %v6601_v57 = vstv %s4091_s11  ;;  %s4337_s11 = sld [smem:[#allocation2 + $0x59]] }
 0x355   : > { %v4277_v47 = vmul.f32 %v6600_v44, %v803_v30  ;;  %v4293_v29 = vmul.f32 %v6601_v57, %v843_v20  ;;  %v922_v30 = vsel %vm915_vm6, %v3803_v50, %v3801_v49  ;;  %v923_v44 = vsel %vm915_vm6, %v3801_v49, %v3803_v50 }
 0x356   : > { %6594 = sst [smem:[#allocation71_spill]] %s4216_s13  ;;  %v4245_v11 = vpop.permute.xlu0 %2605  ;;  %v4247_v31 = vpop.permute.xlu1 %2603  ;;  %v6605_v60 = vmov %v6601_v57  ;;  %v962_v57 = vsel %vm955_vm7, %v3811_v8, %v3809_v59  ;;  %v963_v49 = vsel %vm955_vm7, %v3809_v59, %v3811_v8  ;;  %s6609_s13 = sld [smem:[#allocation54_spill]]  ;;  %v1043_v59 = vsel %vm1035_vm9, %v3825_v9, %v3827_v22 }
 0x357   : > { %6596 = vst [vmem:[#allocation72_spill] sm:$0xff] %v4245_v11  ;;  %6597 = vst [vmem:[#allocation73_spill] sm:$0xff] %v4247_v31  ;;  %v4310_v20 = vmul.f32 %v6605_v60, %v842_v62  ;;  %v4326_v60 = vmul.f32 %v6606_v48, %v883_v27  ;;  %v6607_v62 = vmov %v6606_v48 }
 0x358   : > { %1878 = vrot.lane.b32.xlu0 %v3653_v13, %s6598_s3  ;;  %1876 = vrot.lane.b32.xlu1 %v3650_v23, %s6598_s3  ;;  %s4287_s3 = sld [smem:[#allocation2 + $0x57]] }
 0x359   : > { %v6610_v27 = vstv %s6602_s10  ;;  %s4456_s10 = sld [smem:[#allocation2 + $0x5b]] }
 0x35a   : > { %v4304_v33 = vpop.permute.xlu0 %2645  ;;  %v4306_v45 = vpop.permute.xlu1 %2643  ;;  %v4345_v8 = vmul.f32 %v6610_v27, %v923_v44  ;;  %v6612_v44 = vstv %s4101_s14  ;;  %s6619_s14 = smov 114  }
 0x35b   : > { %6603 = vst [vmem:[#allocation74_spill] sm:$0xff] %v4304_v33  ;;  %6604 = vst [vmem:[#allocation75_spill] sm:$0xff] %v4306_v45  ;;  %v4330_v45 = vmul.f32 %v6607_v62, %v882_v32  ;;  %v1003_v33 = vsel %vm995_vm8, %v3817_v18, %v3819_v19  ;;  %v6611_v32 = vmov %v6610_v27  ;;  %v1002_v62 = vsel %vm995_vm8, %v3819_v19, %v3817_v18 }
 0x35c   : > { %1918 = vrot.lane.b32.xlu0 %v3653_v13, %s6608_s27  ;;  %1916 = vrot.lane.b32.xlu1 %v3650_v23, %s6608_s27  ;;  %v4349_v48 = vmul.f32 %v6611_v32, %v922_v30  ;;  %s4359_s27 = sld [smem:[#allocation2 + $0x5a]]  ;;  %v4365_v30 = vmul.f32 %v6612_v44, %v963_v49  ;;  %v6613_v27 = vmov %v6612_v44  ;;  %v1042_v18 = vsel %vm1035_vm9, %v3827_v22, %v3825_v9 }
 0x35d   : > { %v4369_v32 = vmul.f32 %v6613_v27, %v962_v57  ;;  %v6616_v49 = vstv %s6609_s13  ;;  %v1082_v57 = vsel %vm1075_vm10, %v3835_v4, %v3833_v2  ;;  %v1083_v9 = vsel %vm1075_vm10, %v3833_v2, %v3835_v4  ;;  %s4421_s13 = sld [smem:[#allocation2 + $0x2]] }
 0x35e   : > { %v4377_v50 = vpop.permute.xlu0 %2685  ;;  %v4379_v31 = vpop.permute.xlu1 %2683  ;;  %v4383_v44 = vmul.f32 %v6616_v49, %v1003_v33  ;;  %v6617_v27 = vmov %v6616_v49  ;;  %v1123_v33 = vsel %vm1115_vm11, %v3841_v51, %v3843_v52 }
 0x35f   : > { %6614 = vst [vmem:[#allocation76_spill] sm:$0xff] %v4377_v50  ;;  %6615 = vst [vmem:[#allocation77_spill] sm:$0xff] %v4379_v31  ;;  %v4396_v19 = vmul.f32 %v6617_v27, %v1002_v62  ;;  %v6618_v31 = vstv %s4105_s16  ;;  %v808_v62 = vstv %s4289_s4  ;;  %v6621_v27 = vstv %s4111_s28  ;;  %s6624_s28 = sld [smem:[#allocation82_spill]]  ;;  %s4475_s16 = sld [smem:[#allocation2 + $0x3]] }
 0x360   : > { %v4400_v50 = vmul.f32 %v6618_v31, %v1043_v59  ;;  %1958 = vrot.lane.b32.xlu0 %v3653_v13, %s6619_s14  ;;  %1956 = vrot.lane.b32.xlu1 %v3650_v23, %s6619_s14  ;;  %v6620_v2 = vmov %v6618_v31  ;;  %v1122_v31 = vsel %vm1115_vm11, %v3843_v52, %v3841_v51  ;;  %v4425_v49 = vmul.f32 %v6621_v27, %v1083_v9  ;;  %s6626_s14 = smov 113   ;;  %s4578_s4 = sld [smem:[#allocation2 + $0x6]] }
 0x361   : > { %v4413_v4 = vmul.f32 %v6620_v2, %v1042_v18  ;;  %v6622_v22 = vmov %v6621_v27  ;;  %v1162_v18 = vsel %vm1155_vm12, %v3851_v0, %v3849_v35  ;;  %v1163_v51 = vsel %vm1155_vm12, %v3849_v35, %v3851_v0 }
 0x362   : > { %v4429_v11 = vmul.f32 %v6622_v22, %v1082_v57  ;;  %v785_v52 = vpop.permute.xlu0 %784  ;;  %v783_v2 = vpop.permute.xlu1 %782  ;;  %v6623_v9 = vstv %s4113_s19  ;;  %v6627_v57 = vstv %s4115_s20  ;;  %s4516_s19 = sld [smem:[#allocation2 + $0x4]] }
 0x363   : > { %v4441_v27 = vmul.f32 %v6623_v9, %v1123_v33  ;;  %v789_v59 = vsel %vm788_vm3, %v783_v2, %v785_v52  ;;  %v790_v58 = vsel %vm788_vm3, %v785_v52, %v783_v2  ;;  %v6625_v35 = vmov %v6623_v9  ;;  %s4540_s20 = sld [smem:[#allocation2 + $0x5c]] }
 0x364   : > { %v4453_v0 = vmul.f32 %v6625_v35, %v1122_v31  ;;  %v809_v33 = vmul.f32 %v808_v62, %v790_v58  ;;  %v810_v9 = vmul.f32 %v808_v62, %v789_v59  ;;  %1998 = vrot.lane.b32.xlu0 %v3653_v13, %s6626_s14  ;;  %1996 = vrot.lane.b32.xlu1 %v3650_v23, %s6626_s14  ;;  %v848_v2 = vstv %s4361_s12  ;;  %s6629_s14 = smov 112   ;;  %s4545_s12 = sld [smem:[#allocation2 + $0x5]] }
 0x365   : > { %v807_v22 = vld [vmem:[%s6624_s28] ss:$8 sm:$0x3]  ;;  %v4464_v34 = vmul.f32 %v6627_v57, %v1163_v51  ;;  %v6628_v36 = vmov %v6627_v57  ;;  %v2939_v31 = vld [vmem:[%s6624_s28 + $0x1] ss:$8 sm:$0x3]  ;;  %v1202_v58 = vsel %vm1195_vm13, %v3859_v53, %v3857_v1  ;;  %v1203_v59 = vsel %vm1195_vm13, %v3857_v1, %v3859_v53 }
 0x366   : > { %v4468_v26 = vmul.f32 %v6628_v36, %v1162_v18  ;;  %v820_v36 = vrot.slane %v807_v22, %v3631_v63  ;;  %v824_v62 = vrot.slane %v807_v22, %v3634_v39  ;;  %v834_v18 = vpop.permute.xlu0 %833  ;;  %v832_v51 = vpop.permute.xlu1 %831  ;;  %v814_v57 = vadd.f32 %v4273_v61, %v809_v33  ;;  %v2942_v53 = vld [vmem:[%s6624_s28 + $0x2] ss:$8 sm:$0x3] }
 0x367   : > { %v815_v35 = vadd.f32 %v4277_v47, %v810_v9  ;;  %v836_v52 = vsel %vm835_vm4, %v832_v51, %v834_v18  ;;  %v837_v1 = vsel %vm835_vm4, %v834_v18, %v832_v51  ;;  %v860_v17 = vrot.slane %v2939_v31, %v3631_v63 }
 0x368   : > { %v864_v22 = vrot.slane %v2939_v31, %v3634_v39  ;;  %v849_v25 = vmul.f32 %v848_v2, %v837_v1  ;;  %v850_v24 = vmul.f32 %v848_v2, %v836_v52  ;;  %2038 = vrot.lane.b32.xlu0 %v3653_v13, %s6629_s14  ;;  %v6630_v61 = vstv %s4117_s21  ;;  %2036 = vrot.lane.b32.xlu1 %v3650_v23, %s6629_s14  ;;  %s6632_s21 = smov 111   ;;  %s4635_s14 = sld [smem:[#allocation2 + $0x8]] }
 0x369   : > { %v4503_v47 = vmul.f32 %v6630_v61, %v1203_v59  ;;  %v6631_v33 = vmov %v6630_v61  ;;  %v1243_v18 = vsel %vm1235_vm14, %v3865_v38, %v3867_v54  ;;  %v888_v31 = vstv %s4421_s13  ;;  %s4573_s13 = sld [smem:[#allocation2 + $0x5d]] }
 0x36a   : > { %v4507_v9 = vmul.f32 %v6631_v33, %v1202_v58  ;;  %v854_v52 = vadd.f32 %v4293_v29, %v849_v25  ;;  %v855_v2 = vadd.f32 %v4310_v20, %v850_v24  ;;  %v874_v59 = vpop.permute.xlu0 %873  ;;  %v900_v58 = vrot.slane %v2942_v53, %v3631_v63  ;;  %v872_v1 = vpop.permute.xlu1 %871 }
 0x36b   : > { %v904_v51 = vrot.slane %v2942_v53, %v3634_v39  ;;  %v827_v61 = vmul.f32 %v820_v36, %v814_v57  ;;  %v828_v33 = vmul.f32 %v824_v62, %v815_v35  ;;  %v876_v12 = vsel %vm875_vm5, %v872_v1, %v874_v59  ;;  %v2945_v53 = vld [vmem:[%s6624_s28 + $0x3] ss:$8 sm:$0x3] }
 0x36c   : > { %v877_v16 = vsel %vm875_vm5, %v874_v59, %v872_v1  ;;  %v867_v25 = vmul.f32 %v860_v17, %v854_v52  ;;  %v868_v29 = vmul.f32 %v864_v22, %v855_v2  ;;  %v890_v20 = vmul.f32 %v888_v31, %v876_v12  ;;  %2078 = vrot.lane.b32.xlu0 %v3653_v13, %s6632_s21 }
 0x36d   : > { %v889_v24 = vmul.f32 %v888_v31, %v877_v16  ;;  %v1242_v36 = vsel %vm1235_vm14, %v3867_v54, %v3865_v38  ;;  %v6633_v62 = vstv %s4123_s22  ;;  %v2496_v35 = vstv %s4456_s10  ;;  %2076 = vrot.lane.b32.xlu1 %v3650_v23, %s6632_s21  ;;  %s6637_s22 = sld [smem:[#allocation57_spill]]  ;;  %s4606_s21 = sld [smem:[#allocation2 + $0x7]] }
 0x36e   : > { %v4537_v57 = vmul.f32 %v6633_v62, %v1243_v18  ;;  %v928_v16 = vstv %s4475_s16  ;;  %v869_v12 = vadd.f32 %v867_v25, %v827_v61  ;;  %v870_v17 = vadd.f32 %v868_v29, %v828_v33  ;;  %v914_v54 = vpop.permute.xlu0 %913  ;;  %v912_v18 = vpop.permute.xlu1 %911  ;;  %s6634_s16 = smov 110   ;;  %s5550_s10 = sld [smem:[#allocation2 + $0x1f]] }
 0x36f   : > { %v894_v22 = vadd.f32 %v4326_v60, %v889_v24  ;;  %v895_v38 = vadd.f32 %v4330_v45, %v890_v20  ;;  %v940_v31 = vrot.slane %v2945_v53, %v3631_v63  ;;  %v944_v52 = vrot.slane %v2945_v53, %v3634_v39  ;;  %v2948_v45 = vld [vmem:[%s6624_s28 + $0x4] ss:$8 sm:$0x3]  ;;  %6636 = sst [smem:[#allocation53_spill]] %s4573_s13  ;;  %s4666_s13 = sld [smem:[#allocation2 + $0x9]] }
 0x370   : > { %v916_v2 = vsel %vm915_vm6, %v912_v18, %v914_v54  ;;  %v917_v59 = vsel %vm915_vm6, %v914_v54, %v912_v18  ;;  %2118 = vrot.lane.b32.xlu0 %v3653_v13, %s6634_s16  ;;  %v6635_v60 = vmov %v6633_v62  ;;  %v1282_v24 = vsel %vm1275_vm15, %v3875_v56, %v3873_v55 }
 0x371   : > { %v907_v1 = vmul.f32 %v900_v58, %v894_v22  ;;  %v908_v61 = vmul.f32 %v904_v51, %v895_v38  ;;  %v929_v33 = vmul.f32 %v928_v16, %v917_v59  ;;  %v930_v25 = vmul.f32 %v928_v16, %v916_v2  ;;  %2116 = vrot.lane.b32.xlu1 %v3650_v23, %s6634_s16  ;;  %s4630_s16 = sld [smem:[#allocation2 + $0x5e]] }
 0x372   : > { %v4563_v29 = vmul.f32 %v6635_v60, %v1242_v36  ;;  %v1283_v58 = vsel %vm1275_vm15, %v3873_v55, %v3875_v56  ;;  %v968_v51 = vstv %s4516_s19  ;;  %v954_v55 = vpop.permute.xlu0 %953  ;;  %v952_v56 = vpop.permute.xlu1 %951  ;;  %v980_v16 = vrot.slane %v2948_v45, %v3631_v63  ;;  %s6638_s19 = smov 109  }
 0x373   : > { %v909_v20 = vadd.f32 %v907_v1, %v869_v12  ;;  %v910_v53 = vadd.f32 %v908_v61, %v870_v17  ;;  %v934_v36 = vadd.f32 %v4345_v8, %v929_v33  ;;  %v935_v62 = vadd.f32 %v4349_v48, %v930_v25  ;;  %v2951_v48 = vld [vmem:[%s6624_s28 + $0x5] ss:$8 sm:$0x3] }
 0x374   : > { %v984_v22 = vrot.slane %v2948_v45, %v3634_v39  ;;  %v956_v38 = vsel %vm955_vm7, %v952_v56, %v954_v55  ;;  %v957_v12 = vsel %vm955_vm7, %v954_v55, %v952_v56  ;;  %2158 = vrot.lane.b32.xlu0 %v3653_v13, %s6638_s19  ;;  %v6639_v2 = vstv %s6637_s22  ;;  %s6642_s22 = sld [smem:[#allocation58_spill]]  ;;  %v6786_v33 = vld [vmem:[#allocation70_spill] sm:$0xff] }
 0x375   : > { %v947_v17 = vmul.f32 %v940_v31, %v934_v36  ;;  %v948_v54 = vmul.f32 %v944_v52, %v935_v62  ;;  %v969_v18 = vmul.f32 %v968_v51, %v957_v12  ;;  %v970_v8 = vmul.f32 %v968_v51, %v956_v38  ;;  %2156 = vrot.lane.b32.xlu1 %v3650_v23, %s6638_s19  ;;  %s4695_s19 = sld [smem:[#allocation2 + $0xa]] }
 0x376   : > { %v4596_v59 = vmul.f32 %v6639_v2, %v1283_v58  ;;  %v6640_v1 = vmov %v6639_v2  ;;  %v1008_v31 = vstv %s4545_s12  ;;  %v994_v51 = vpop.permute.xlu0 %993  ;;  %v992_v58 = vpop.permute.xlu1 %991  ;;  %v1024_v36 = vrot.slane %v2951_v48, %v3634_v39  ;;  %s6641_s12 = smov 99  }
 0x377   : > { %v4600_v61 = vmul.f32 %v6640_v1, %v1282_v24  ;;  %v949_v52 = vadd.f32 %v947_v17, %v909_v20  ;;  %v950_v25 = vadd.f32 %v948_v54, %v910_v53  ;;  %v974_v45 = vadd.f32 %v4365_v30, %v969_v18 }
 0x378   : > { %v975_v60 = vadd.f32 %v4369_v32, %v970_v8  ;;  %v1020_v24 = vrot.slane %v2951_v48, %v3631_v63  ;;  %v996_v62 = vsel %vm995_vm8, %v992_v58, %v994_v51  ;;  %v997_v55 = vsel %vm995_vm8, %v994_v51, %v992_v58  ;;  %2198 = vrot.lane.b32.xlu0 %v3653_v13, %s6641_s12  ;;  %v2954_v32 = vld [vmem:[%s6624_s28 + $0x6] ss:$8 sm:$0x3] }
 0x379   : > { %v987_v20 = vmul.f32 %v980_v16, %v974_v45  ;;  %v1009_v56 = vmul.f32 %v1008_v31, %v997_v55  ;;  %v1010_v30 = vmul.f32 %v1008_v31, %v996_v62  ;;  %v1322_v38 = vsel %vm1315_vm0, %v3883_v6, %v3881_v5  ;;  %2196 = vrot.lane.b32.xlu1 %v3650_v23, %s6641_s12  ;;  %s4690_s12 = sld [smem:[#allocation2 + $0x5f]] }
 0x37a   : > { %v988_v53 = vmul.f32 %v984_v22, %v975_v60  ;;  %v1323_v16 = vsel %vm1315_vm0, %v3881_v5, %v3883_v6  ;;  %v1048_v12 = vstv %s4578_s4  ;;  %v1034_v5 = vpop.permute.xlu0 %1033  ;;  %v1032_v6 = vpop.permute.xlu1 %1031  ;;  %v1060_v48 = vrot.slane %v2954_v32, %v3631_v63  ;;  %s6643_s4 = smov 98  }
 0x37b   : > { %v989_v17 = vadd.f32 %v987_v20, %v949_v52  ;;  %v1014_v18 = vadd.f32 %v4383_v44, %v1009_v56  ;;  %v1015_v8 = vadd.f32 %v4396_v19, %v1010_v30  ;;  %v1064_v2 = vrot.slane %v2954_v32, %v3634_v39  ;;  %v2957_v19 = vld [vmem:[%s6624_s28 + $0x7] ss:$8 sm:$0x3] }
 0x37c   : > { %v990_v54 = vadd.f32 %v988_v53, %v950_v25  ;;  %v1036_v1 = vsel %vm1035_vm9, %v1032_v6, %v1034_v5  ;;  %v1037_v31 = vsel %vm1035_vm9, %v1034_v5, %v1032_v6  ;;  %2238 = vrot.lane.b32.xlu0 %v3653_v13, %s6643_s4  ;;  %v6644_v44 = vstv %s6642_s22  ;;  %s4756_s22 = sld [smem:[#allocation2 + $0xc]] }
 0x37d   : > { %v1027_v52 = vmul.f32 %v1020_v24, %v1014_v18  ;;  %v1028_v25 = vmul.f32 %v1024_v36, %v1015_v8  ;;  %v1049_v45 = vmul.f32 %v1048_v12, %v1037_v31  ;;  %v1050_v60 = vmul.f32 %v1048_v12, %v1036_v1  ;;  %2236 = vrot.lane.b32.xlu1 %v3650_v23, %s6643_s4  ;;  %s4723_s4 = sld [smem:[#allocation2 + $0x60]]  ;;  %v6782_v31 = vld [vmem:[#allocation65_spill] sm:$0xff] }
 0x37e   : > { %v4653_v51 = vmul.f32 %v6644_v44, %v1323_v16  ;;  %v6645_v58 = vmov %v6644_v44  ;;  %v1363_v24 = vsel %vm1355_vm1, %v3889_v43, %v3891_v14  ;;  %v1088_v36 = vstv %s4606_s21  ;;  %v1074_v30 = vpop.permute.xlu0 %1073  ;;  %v1072_v32 = vpop.permute.xlu1 %1071  ;;  %s6646_s21 = smov 97  }
 0x37f   : > { %v4657_v62 = vmul.f32 %v6645_v58, %v1322_v38  ;;  %v1029_v55 = vadd.f32 %v1027_v52, %v989_v17  ;;  %v1030_v20 = vadd.f32 %v1028_v25, %v990_v54  ;;  %v1054_v53 = vadd.f32 %v4400_v50, %v1049_v45 }
 0x380   : > { %v1055_v56 = vadd.f32 %v4413_v4, %v1050_v60  ;;  %v1100_v38 = vrot.slane %v2957_v19, %v3631_v63  ;;  %v1104_v16 = vrot.slane %v2957_v19, %v3634_v39  ;;  %v1076_v12 = vsel %vm1075_vm10, %v1072_v32, %v1074_v30  ;;  %2278 = vrot.lane.b32.xlu0 %v3653_v13, %s6646_s21  ;;  %v2960_v4 = vld [vmem:[%s6624_s28 + $0x10] ss:$8 sm:$0x3] }
 0x381   : > { %v1077_v17 = vsel %vm1075_vm10, %v1074_v30, %v1072_v32  ;;  %v1067_v54 = vmul.f32 %v1060_v48, %v1054_v53  ;;  %v1090_v50 = vmul.f32 %v1088_v36, %v1076_v12  ;;  %v1362_v5 = vsel %vm1355_vm1, %v3891_v14, %v3889_v43  ;;  %2276 = vrot.lane.b32.xlu1 %v3650_v23, %s6646_s21  ;;  %s4728_s21 = sld [smem:[#allocation2 + $0xb]] }
 0x382   : > { %v1068_v18 = vmul.f32 %v1064_v2, %v1055_v56  ;;  %v1089_v8 = vmul.f32 %v1088_v36, %v1077_v17  ;;  %v6647_v6 = vstv %s4129_s29  ;;  %v1128_v48 = vstv %s4635_s14  ;;  %v1114_v14 = vpop.permute.xlu0 %1113  ;;  %v1112_v45 = vpop.permute.xlu1 %1111  ;;  %s6648_s14 = smov 96   ;;  %s6650_s29 = smov 95  }
 0x383   : > { %v4687_v1 = vmul.f32 %v6647_v6, %v1363_v24  ;;  %vm1435_vm3 = vcmp.lt.s32.totalorder %v4140_v46, 17  ;;  %v1069_v2 = vadd.f32 %v1067_v54, %v1029_v55  ;;  %v1095_v43 = vadd.f32 %v4429_v11, %v1090_v50  ;;  %v2963_v11 = vld [vmem:[%s6624_s28 + $0x11] ss:$8 sm:$0x3] }
 0x384   : > { %v1070_v52 = vadd.f32 %v1068_v18, %v1030_v20  ;;  %v1094_v25 = vadd.f32 %v4425_v49, %v1089_v8  ;;  %v1140_v60 = vrot.slane %v2960_v4, %v3631_v63  ;;  %v1144_v19 = vrot.slane %v2960_v4, %v3634_v39  ;;  %2318 = vrot.lane.b32.xlu0 %v3653_v13, %s6648_s14 }
 0x385   : > { %v1116_v44 = vsel %vm1115_vm11, %v1112_v45, %v1114_v14  ;;  %v1117_v58 = vsel %vm1115_vm11, %v1114_v14, %v1112_v45  ;;  %v1108_v36 = vmul.f32 %v1104_v16, %v1095_v43  ;;  %v6649_v49 = vmov %v6647_v6  ;;  %2316 = vrot.lane.b32.xlu1 %v3650_v23, %s6648_s14  ;;  %s4940_s14 = sld [smem:[#allocation2 + $0x11]]  ;;  %v6781_v43 = vld [vmem:[#allocation64_spill] sm:$0xff] }
 0x386   : > { %v1107_v24 = vmul.f32 %v1100_v38, %v1094_v25  ;;  %v1129_v55 = vmul.f32 %v1128_v48, %v1117_v58  ;;  %v1130_v20 = vmul.f32 %v1128_v48, %v1116_v44  ;;  %v4713_v53 = vmul.f32 %v6649_v49, %v1362_v5 }
 0x387   : > { %v1402_v56 = vsel %vm1395_vm2, %v3899_v15, %v3897_v10  ;;  %v1403_v30 = vsel %vm1395_vm2, %v3897_v10, %v3899_v15  ;;  %v1168_v32 = vstv %s4666_s13  ;;  %vm1475_vm4 = vcmp.lt.s32.totalorder %v4140_v46, 16  ;;  %v1154_v10 = vpop.permute.xlu0 %1153  ;;  %v1152_v15 = vpop.permute.xlu1 %1151  ;;  %s4784_s13 = sld [smem:[#allocation2 + $0xd]] }
 0x388   : > { %v1109_v38 = vadd.f32 %v1107_v24, %v1069_v2  ;;  %v1110_v16 = vadd.f32 %v1108_v36, %v1070_v52  ;;  %v1134_v12 = vadd.f32 %v4441_v27, %v1129_v55  ;;  %v1135_v17 = vadd.f32 %v4453_v0, %v1130_v20  ;;  %2358 = vrot.lane.b32.xlu0 %v3653_v13, %s6650_s29  ;;  %v2966_v0 = vld [vmem:[%s6624_s28 + $0x12] ss:$8 sm:$0x3] }
 0x389   : > { %v1180_v54 = vrot.slane %v2963_v11, %v3631_v63  ;;  %v1184_v18 = vrot.slane %v2963_v11, %v3634_v39  ;;  %v1156_v8 = vsel %vm1155_vm12, %v1152_v15, %v1154_v10  ;;  %v1157_v50 = vsel %vm1155_vm12, %v1154_v10, %v1152_v15  ;;  %2356 = vrot.lane.b32.xlu1 %v3650_v23, %s6650_s29  ;;  %s6665_s29 = smov 80  }
 0x38a   : > { %v1147_v4 = vmul.f32 %v1140_v60, %v1134_v12  ;;  %v1148_v5 = vmul.f32 %v1144_v19, %v1135_v17  ;;  %v1169_v6 = vmul.f32 %v1168_v32, %v1157_v50  ;;  %v1170_v27 = vmul.f32 %v1168_v32, %v1156_v8 }
 0x38b   : > { %v6651_v48 = vstv %s4135_s9  ;;  %v1208_v14 = vstv %s4695_s19  ;;  %vm1515_vm5 = vcmp.lt.s32.totalorder %v4140_v46, 15  ;;  %v1194_v58 = vpop.permute.xlu0 %1193  ;;  %v1192_v24 = vpop.permute.xlu1 %1191  ;;  %v1220_v36 = vrot.slane %v2966_v0, %v3631_v63  ;;  %s6653_s9 = smov 94   ;;  %s4814_s19 = sld [smem:[#allocation2 + $0xe]] }
 0x38c   : > { %v4746_v2 = vmul.f32 %v6651_v48, %v1403_v30  ;;  %v6652_v52 = vmov %v6651_v48  ;;  %v1149_v45 = vadd.f32 %v1147_v4, %v1109_v38  ;;  %v1150_v60 = vadd.f32 %v1148_v5, %v1110_v16  ;;  %2398 = vrot.lane.b32.xlu0 %v3653_v13, %s6653_s9 }
 0x38d   : > { %v4750_v25 = vmul.f32 %v6652_v52, %v1402_v56  ;;  %v1174_v19 = vadd.f32 %v4464_v34, %v1169_v6  ;;  %v1175_v44 = vadd.f32 %v4468_v26, %v1170_v27  ;;  %v1224_v55 = vrot.slane %v2966_v0, %v3634_v39  ;;  %v2969_v26 = vld [vmem:[%s6624_s28 + $0x13] ss:$8 sm:$0x3]  ;;  %2396 = vrot.lane.b32.xlu1 %v3650_v23, %s6653_s9  ;;  %s4951_s9 = sld [smem:[#allocation2 + $0x12]] }
 0x38e   : > { %v1196_v20 = vsel %vm1195_vm13, %v1192_v24, %v1194_v58  ;;  %v1197_v11 = vsel %vm1195_vm13, %v1194_v58, %v1192_v24  ;;  %v1442_v32 = vsel %vm1435_vm3, %v3907_v37, %v3905_v40  ;;  %v1443_v38 = vsel %vm1435_vm3, %v3905_v40, %v3907_v37 }
 0x38f   : > { %v1187_v49 = vmul.f32 %v1180_v54, %v1174_v19  ;;  %v1188_v56 = vmul.f32 %v1184_v18, %v1175_v44  ;;  %v1209_v30 = vmul.f32 %v1208_v14, %v1197_v11  ;;  %v1210_v34 = vmul.f32 %v1208_v14, %v1196_v20  ;;  %v1234_v18 = vpop.permute.xlu0 %1233  ;;  %v1232_v8 = vpop.permute.xlu1 %1231 }
 0x390   : > { %v1248_v12 = vstv %s4728_s21  ;;  %v1260_v40 = vrot.slane %v2969_v26, %v3631_v63  ;;  %v1264_v37 = vrot.slane %v2969_v26, %v3634_v39  ;;  %v1236_v50 = vsel %vm1235_vm14, %v1232_v8, %v1234_v18  ;;  %s6654_s21 = smov 93  }
 0x391   : > { %v1189_v17 = vadd.f32 %v1187_v49, %v1149_v45  ;;  %v1190_v10 = vadd.f32 %v1188_v56, %v1150_v60  ;;  %v1214_v15 = vadd.f32 %v4503_v47, %v1209_v30  ;;  %v1215_v54 = vadd.f32 %v4507_v9, %v1210_v34  ;;  %2438 = vrot.lane.b32.xlu0 %v3653_v13, %s6654_s21  ;;  %v2972_v47 = vld [vmem:[%s6624_s28 + $0x14] ss:$8 sm:$0x3] }
 0x392   : > { %v1237_v4 = vsel %vm1235_vm14, %v1234_v18, %v1232_v8  ;;  %v1250_v0 = vmul.f32 %v1248_v12, %v1236_v50  ;;  %v6655_v9 = vstv %s4137_s17  ;;  %v1483_v45 = vsel %vm1475_vm4, %v3913_v41, %v3915_v3  ;;  %2436 = vrot.lane.b32.xlu1 %v3650_v23, %s6654_s21  ;;  %s6657_s17 = smov 83   ;;  %s4846_s21 = sld [smem:[#allocation2 + $0xf]] }
 0x393   : > { %v1227_v5 = vmul.f32 %v1220_v36, %v1214_v15  ;;  %v1228_v6 = vmul.f32 %v1224_v55, %v1215_v54  ;;  %v1249_v27 = vmul.f32 %v1248_v12, %v1237_v4  ;;  %v4801_v48 = vmul.f32 %v6655_v9, %v1443_v38  ;;  %v1274_v36 = vpop.permute.xlu0 %1273  ;;  %v1272_v55 = vpop.permute.xlu1 %1271 }
 0x394   : > { %v6656_v52 = vmov %v6655_v9  ;;  %v1288_v60 = vstv %s4756_s22  ;;  %vm1555_vm6 = vcmp.lt.s32.totalorder %v4140_v46, 14  ;;  %vm1595_vm7 = vcmp.lt.s32.totalorder %v4140_v46, 13 }
 0x395   : > { %v4805_v14 = vmul.f32 %v6656_v52, %v1442_v32  ;;  %v1229_v19 = vadd.f32 %v1227_v5, %v1189_v17  ;;  %v1230_v44 = vadd.f32 %v1228_v6, %v1190_v10  ;;  %v1254_v58 = vadd.f32 %v4537_v57, %v1249_v27  ;;  %2478 = vrot.lane.b32.xlu0 %v3653_v13, %s6657_s17  ;;  %v2975_v57 = vld [vmem:[%s6624_s28 + $0x15] ss:$8 sm:$0x3] }
 0x396   : > { %v1255_v24 = vadd.f32 %v4563_v29, %v1250_v0  ;;  %v1300_v20 = vrot.slane %v2972_v47, %v3631_v63  ;;  %v1304_v11 = vrot.slane %v2972_v47, %v3634_v39  ;;  %v1276_v49 = vsel %vm1275_vm15, %v1272_v55, %v1274_v36  ;;  %2476 = vrot.lane.b32.xlu1 %v3650_v23, %s6657_s17  ;;  %s4879_s17 = sld [smem:[#allocation2 + $0x10]] }
 0x397   : > { %v1277_v56 = vsel %vm1275_vm15, %v1274_v36, %v1272_v55  ;;  %v1267_v30 = vmul.f32 %v1260_v40, %v1254_v58  ;;  %v1290_v32 = vmul.f32 %v1288_v60, %v1276_v49  ;;  %v1482_v29 = vsel %vm1475_vm4, %v3915_v3, %v3913_v41  ;;  %v1314_v18 = vpop.permute.xlu0 %1313  ;;  %v1312_v8 = vpop.permute.xlu1 %1311 }
 0x398   : > { %v1268_v34 = vmul.f32 %v1264_v37, %v1255_v24  ;;  %v1289_v26 = vmul.f32 %v1288_v60, %v1277_v56  ;;  %v6658_v38 = vstv %s4142_s24  ;;  %v1523_v17 = vsel %vm1515_vm5, %v3921_v7, %v3923_v42  ;;  %s6662_s24 = smov 81  }
 0x399   : > { %v4837_v12 = vmul.f32 %v6658_v38, %v1483_v45  ;;  %v1328_v10 = vstv %s4784_s13  ;;  %vm1635_vm8 = vcmp.lt.s32.totalorder %v4140_v46, 3  ;;  %v1269_v15 = vadd.f32 %v1267_v30, %v1229_v19  ;;  %s6659_s13 = smov 82  }
 0x39a   : > { %v1270_v54 = vadd.f32 %v1268_v34, %v1230_v44  ;;  %v1294_v41 = vadd.f32 %v4596_v59, %v1289_v26  ;;  %v1295_v3 = vadd.f32 %v4600_v61, %v1290_v32  ;;  %v1340_v40 = vrot.slane %v2975_v57, %v3631_v63  ;;  %2518 = vrot.lane.b32.xlu0 %v3653_v13, %s6659_s13  ;;  %v2978_v61 = vld [vmem:[%s6624_s28 + $0x16] ss:$8 sm:$0x3]  ;;  %v6663_v32 = vld [vmem:[#allocation13_spill] sm:$0xff] }
 0x39b   : > { %v1344_v37 = vrot.slane %v2975_v57, %v3634_v39  ;;  %v1316_v50 = vsel %vm1315_vm0, %v1312_v8, %v1314_v18  ;;  %v1317_v4 = vsel %vm1315_vm0, %v1314_v18, %v1312_v8  ;;  %v6660_v0 = vmov %v6658_v38  ;;  %2516 = vrot.lane.b32.xlu1 %v3650_v23, %s6659_s13  ;;  %v1354_v36 = vpop.permute.xlu0 %1353  ;;  %v1352_v55 = vpop.permute.xlu1 %1351  ;;  %v6664_v57 = vld [vmem:[#allocation14_spill] sm:$0xff]  ;;  %s6722_s13 = sld [smem:[#allocation71_spill]] }
 0x39c   : > { %v1307_v5 = vmul.f32 %v1300_v20, %v1294_v41  ;;  %v1308_v6 = vmul.f32 %v1304_v11, %v1295_v3  ;;  %v1329_v27 = vmul.f32 %v1328_v10, %v1317_v4  ;;  %v1330_v59 = vmul.f32 %v1328_v10, %v1316_v50 }
 0x39d   : > { %v4864_v47 = vmul.f32 %v6660_v0, %v1482_v29  ;;  %v4870_v9 = vsel %vm1515_vm5, %v3923_v42, %v3921_v7  ;;  %v6661_v52 = vstv %s4144_s7  ;;  %v1368_v60 = vstv %s4814_s19  ;;  %s3290_s19 = smov 77  }
 0x39e   : > { %v4874_v45 = vmul.f32 %v6661_v52, %v1523_v17  ;;  %v1309_v19 = vadd.f32 %v1307_v5, %v1269_v15  ;;  %v1310_v44 = vadd.f32 %v1308_v6, %v1270_v54  ;;  %v1334_v58 = vadd.f32 %v4653_v51, %v1329_v27  ;;  %2558 = vrot.lane.b32.xlu0 %v3653_v13, %s6662_s24  ;;  %v6666_v5 = vld [vmem:[#allocation15_spill] sm:$0xff]  ;;  %v6667_v6 = vld [vmem:[#allocation16_spill] sm:$0xff] }
 0x39f   : > { %v1335_v24 = vadd.f32 %v4657_v62, %v1330_v59  ;;  %v1380_v7 = vrot.slane %v2978_v61, %v3631_v63  ;;  %v1384_v42 = vrot.slane %v2978_v61, %v3634_v39  ;;  %v1356_v20 = vsel %vm1355_vm1, %v1352_v55, %v1354_v36  ;;  %v2981_v62 = vld [vmem:[%s6624_s28 + $0x17] ss:$8 sm:$0x3]  ;;  %2556 = vrot.lane.b32.xlu1 %v3650_v23, %s6662_s24  ;;  %v1394_v41 = vpop.permute.xlu0 %1393  ;;  %v1392_v3 = vpop.permute.xlu1 %1391  ;;  %s6684_s24 = sld [smem:[#allocation62_spill]] }
 0x3a0   : > { %v1357_v11 = vsel %vm1355_vm1, %v1354_v36, %v1352_v55  ;;  %vm1675_vm9 = vcmp.lt.s32.totalorder %v4140_v46, 2  ;;  %v1347_v49 = vmul.f32 %v1340_v40, %v1334_v58  ;;  %v1370_v30 = vmul.f32 %v1368_v60, %v1356_v20 }
 0x3a1   : > { %v1348_v56 = vmul.f32 %v1344_v37, %v1335_v24  ;;  %v1369_v51 = vmul.f32 %v1368_v60, %v1357_v11  ;;  %v1562_v34 = vsel %vm1555_vm6, %v3931_v21, %v3929_v28  ;;  %v1563_v26 = vsel %vm1555_vm6, %v3929_v28, %v3931_v21 }
 0x3a2   : > { %v1602_v29 = vsel %vm1595_vm7, %v6664_v57, %v6663_v32  ;;  %vm1715_vm10 = vcmp.lt.s32.totalorder %v4140_v46, 1  ;;  %v1408_v38 = vstv %s4846_s21  ;;  %v1349_v17 = vadd.f32 %v1347_v49, %v1309_v19  ;;  %2598 = vrot.lane.b32.xlu0 %v3653_v13, %s6665_s29  ;;  %s6697_s21 = sld [smem:[#allocation63_spill]] }
 0x3a3   : > { %v1350_v10 = vadd.f32 %v1348_v56, %v1310_v44  ;;  %v1374_v15 = vadd.f32 %v4687_v1, %v1369_v51  ;;  %v1375_v54 = vadd.f32 %v4713_v53, %v1370_v30  ;;  %vm1800_vm11 = vcmp.lt.s32.totalorder %v4140_v46, 127  ;;  %v2984_v53 = vld [vmem:[%s6624_s28 + $0x20] ss:$8 sm:$0x3]  ;;  %2596 = vrot.lane.b32.xlu1 %v3650_v23, %s6665_s29  ;;  %v1434_v44 = vpop.permute.xlu0 %1433  ;;  %v1432_v58 = vpop.permute.xlu1 %1431  ;;  %s5070_s29 = sld [smem:[#allocation2 + $0x15]] }
 0x3a4   : > { %v1420_v28 = vrot.slane %v2981_v62, %v3631_v63  ;;  %v1424_v21 = vrot.slane %v2981_v62, %v3634_v39  ;;  %v1396_v18 = vsel %vm1395_vm2, %v1392_v3, %v1394_v41  ;;  %v1397_v8 = vsel %vm1395_vm2, %v1394_v41, %v1392_v3 }
 0x3a5   : > { %v1387_v40 = vmul.f32 %v1380_v7, %v1374_v15  ;;  %v1388_v37 = vmul.f32 %v1384_v42, %v1375_v54  ;;  %v1409_v1 = vmul.f32 %v1408_v38, %v1397_v8  ;;  %v1410_v50 = vmul.f32 %v1408_v38, %v1396_v18  ;;  %v6676_v18 = vld [vmem:[#allocation17_spill] sm:$0xff]  ;;  %v6677_v8 = vld [vmem:[#allocation18_spill] sm:$0xff] }
 0x3a6   : > { %v1603_v4 = vsel %vm1595_vm7, %v6663_v32, %v6664_v57  ;;  %v1642_v27 = vsel %vm1635_vm8, %v6667_v6, %v6666_v5  ;;  %v1643_v59 = vsel %vm1635_vm8, %v6666_v5, %v6667_v6  ;;  %v1448_v61 = vstv %s4879_s17  ;;  %s6668_s17 = smov 79  }
 0x3a7   : > { %vm1840_vm12 = vcmp.lt.s32.totalorder %v4140_v46, 126  ;;  %v1389_v0 = vadd.f32 %v1387_v40, %v1349_v17  ;;  %v1390_v52 = vadd.f32 %v1388_v37, %v1350_v10  ;;  %v1414_v60 = vadd.f32 %v4746_v2, %v1409_v1  ;;  %2638 = vrot.lane.b32.xlu0 %v3653_v13, %s6668_s17  ;;  %2636 = vrot.lane.b32.xlu1 %v3650_v23, %s6668_s17  ;;  %v1474_v15 = vpop.permute.xlu0 %1473  ;;  %v1472_v54 = vpop.permute.xlu1 %1471  ;;  %v6678_v40 = vld [vmem:[#allocation19_spill] sm:$0xff]  ;;  %v6679_v37 = vld [vmem:[#allocation20_spill] sm:$0xff]  ;;  %s5453_s17 = sld [smem:[#allocation2 + $0x1b]] }
 0x3a8   : > { %v1415_v19 = vadd.f32 %v4750_v25, %v1410_v50  ;;  %v1460_v24 = vrot.slane %v2984_v53, %v3631_v63  ;;  %v1464_v36 = vrot.slane %v2984_v53, %v3634_v39  ;;  %v1436_v55 = vsel %vm1435_vm3, %v1432_v58, %v1434_v44 }
 0x3a9   : > { %v1437_v7 = vsel %vm1435_vm3, %v1434_v44, %v1432_v58  ;;  %vm1880_vm13 = vcmp.lt.s32.totalorder %v4140_v46, 125  ;;  %v1427_v2 = vmul.f32 %v1420_v28, %v1414_v60  ;;  %v1450_v20 = vmul.f32 %v1448_v61, %v1436_v55 }
 0x3aa   : > { %v1428_v25 = vmul.f32 %v1424_v21, %v1415_v19  ;;  %v1449_v42 = vmul.f32 %v1448_v61, %v1437_v7  ;;  %v6669_v11 = vstv %s4144_s7  ;;  %v6670_v56 = vstv %s4150_s26  ;;  %s4977_s7 = sld [smem:[#allocation2 + $0x13]]  ;;  %s6680_s26 = smov 78  }
 0x3ab   : > { %v4959_v49 = vmul.f32 %v6669_v11, %v4870_v9  ;;  %v4963_v51 = vmul.f32 %v6670_v56, %v1563_v26  ;;  %v6671_v30 = vmov %v6670_v56  ;;  %v6672_v32 = vstv %s4152_s8  ;;  %2678 = vrot.lane.b32.xlu0 %v3653_v13, %s6680_s26  ;;  %2676 = vrot.lane.b32.xlu1 %v3650_v23, %s6680_s26  ;;  %s5016_s8 = sld [smem:[#allocation2 + $0x14]]  ;;  %v1514_v19 = vpop.permute.xlu0 %1513  ;;  %v1512_v44 = vpop.permute.xlu1 %1511  ;;  %s5112_s26 = sld [smem:[#allocation2 + $0x16]] }
 0x3ac   : > { %v4967_v62 = vmul.f32 %v6671_v30, %v1562_v34  ;;  %v4971_v57 = vmul.f32 %v6672_v32, %v1603_v4  ;;  %v1429_v38 = vadd.f32 %v1427_v2, %v1389_v0  ;;  %v1430_v17 = vadd.f32 %v1428_v25, %v1390_v52 }
 0x3ad   : > { %v1454_v10 = vadd.f32 %v4801_v48, %v1449_v42  ;;  %v1455_v9 = vadd.f32 %v4805_v14, %v1450_v20  ;;  %v6673_v26 = vmov %v6672_v32  ;;  %v6674_v41 = vstv %s4154_s30  ;;  %s6681_s30 = sld [smem:[#allocation61_spill]] }
 0x3ae   : > { %v4981_v34 = vmul.f32 %v6673_v26, %v1602_v29  ;;  %v4985_v3 = vmul.f32 %v6674_v41, %v1643_v59  ;;  %v6675_v28 = vmov %v6674_v41  ;;  %v1682_v48 = vsel %vm1675_vm9, %v6677_v8, %v6676_v18  ;;  %v6683_v59 = vld [vmem:[#allocation22_spill] sm:$0xff]  ;;  %v2987_v41 = vld [vmem:[%s6624_s28 + $0x21] ss:$8 sm:$0x3] }
 0x3af   : > { %v4989_v21 = vmul.f32 %v6675_v28, %v1642_v27  ;;  %v1683_v14 = vsel %vm1675_vm9, %v6676_v18, %v6677_v8  ;;  %v1722_v29 = vsel %vm1715_vm10, %v6679_v37, %v6678_v40  ;;  %v1467_v1 = vmul.f32 %v1460_v24, %v1454_v10  ;;  %v6682_v27 = vld [vmem:[#allocation21_spill] sm:$0xff]  ;;  %2718 = vrot.lane.b32.xlu0 %v3653_v13, %s3290_s19 }
 0x3b0   : > { %v1468_v50 = vmul.f32 %v1464_v36, %v1455_v9  ;;  %v1723_v53 = vsel %vm1715_vm10, %v6678_v40, %v6679_v37  ;;  %v1488_v4 = vstv %s4940_s14  ;;  %v1476_v5 = vsel %vm1475_vm4, %v1472_v54, %v1474_v15  ;;  %2716 = vrot.lane.b32.xlu1 %v3650_v23, %s3290_s19  ;;  %v2990_v28 = vld [vmem:[%s6624_s28 + $0x22] ss:$8 sm:$0x3]  ;;  %v1552_v40 = vpop.permute.xlu1 %1551  ;;  %s5725_s14 = sld [smem:[#allocation2 + $0x2a]] }
 0x3b1   : > { %v1477_v6 = vsel %vm1475_vm4, %v1474_v15, %v1472_v54  ;;  %v1807_v61 = vsel %vm1800_vm11, %v6683_v59, %v6682_v27  ;;  %v1808_v0 = vsel %vm1800_vm11, %v6682_v27, %v6683_v59  ;;  %v5026_v52 = vadd.f32 %v1467_v1, %v1429_v38  ;;  %v6691_v15 = vld [vmem:[#allocation23_spill] sm:$0xff]  ;;  %v6692_v54 = vld [vmem:[#allocation24_spill] sm:$0xff]  ;;  %v6693_v37 = vld [vmem:[#allocation25_spill] sm:$0xff] }
 0x3b2   : > { %v5028_v60 = vadd.f32 %v1468_v50, %v1430_v17  ;;  %v6685_v58 = vstv %s4156_s0  ;;  %v1528_v36 = vstv %s4951_s9  ;;  %v1516_v55 = vsel %vm1515_vm5, %v1512_v44, %v1514_v19  ;;  %v2993_v50 = vld [vmem:[%s6624_s28 + $0x23] ss:$8 sm:$0x3]  ;;  %s5552_s0 = sld [smem:[#allocation2 + $0x20]]  ;;  %s5837_s9 = sld [smem:[#allocation2 + $0x2d]] }
 0x3b3   : > { %v5032_v24 = vmul.f32 %v6685_v58, %v1683_v14  ;;  %v1517_v7 = vsel %vm1515_vm5, %v1514_v19, %v1512_v44  ;;  %v6686_v2 = vmov %v6685_v58  ;;  %v6687_v42 = vstv %s6681_s30 }
 0x3b4   : > { %v5041_v25 = vmul.f32 %v6686_v2, %v1682_v48  ;;  %v5045_v20 = vmul.f32 %v6687_v42, %v1723_v53  ;;  %v1489_v11 = vmul.f32 %v1488_v4, %v1477_v6  ;;  %v1490_v56 = vmul.f32 %v1488_v4, %v1476_v5  ;;  %v1554_v48 = vpop.permute.xlu0 %1553 }
 0x3b5   : > { %v6688_v30 = vmov %v6687_v42  ;;  %v6689_v38 = vstv %s6684_s24  ;;  %v5064_v26 = vsel %vm1840_vm12, %v6692_v54, %v6691_v15  ;;  %v5076_v13 = vsel %vm1840_vm12, %v6691_v15, %v6692_v54  ;;  %s5131_s24 = sld [smem:[#allocation2 + $0x17]] }
 0x3b6   : > { %v5050_v32 = vmul.f32 %v6688_v30, %v1722_v29  ;;  %v5054_v17 = vmul.f32 %v6689_v38, %v1807_v61  ;;  %v6690_v10 = vmov %v6689_v38  ;;  %v1529_v18 = vmul.f32 %v1528_v36, %v1517_v7  ;;  %v6694_v29 = vld [vmem:[#allocation26_spill] sm:$0xff] }
 0x3b7   : > { %v5058_v9 = vmul.f32 %v6690_v10, %v1808_v0  ;;  %v1530_v8 = vmul.f32 %v1528_v36, %v1516_v55  ;;  %v1568_v14 = vstv %s4977_s7  ;;  %v5086_v23 = vsel %vm1880_vm13, %v6694_v29, %v6693_v37  ;;  %v6695_v61 = vld [vmem:[#allocation10_spill] sm:$0xff]  ;;  %v2996_v0 = vld [vmem:[%s6624_s28 + $0x24] ss:$8 sm:$0x3]  ;;  %s5664_s7 = sld [smem:[#allocation2 + $0x27]] }
 0x3b8   : > { %v5092_v1 = vsel %vm1880_vm13, %v6693_v37, %v6694_v29  ;;  %v1556_v53 = vsel %vm1555_vm6, %v1552_v40, %v1554_v48  ;;  %v1557_v4 = vsel %vm1555_vm6, %v1554_v48, %v1552_v40  ;;  %v1500_v5 = vrot.slane %v2987_v41, %v3631_v63  ;;  %2725 = vrot.lane.b32.xlu0 %v6695_v61, %s3290_s19  ;;  %v6696_v36 = vld [vmem:[#allocation9_spill] sm:$0xff]  ;;  %v1594_v42 = vpop.permute.xlu0 %1593 }
 0x3b9   : > { %v1504_v6 = vrot.slane %v2987_v41, %v3634_v39  ;;  %v1494_v27 = vadd.f32 %v4837_v12, %v1489_v11  ;;  %v1495_v59 = vadd.f32 %v4864_v47, %v1490_v56  ;;  %v1540_v19 = vrot.slane %v2990_v28, %v3631_v63  ;;  %2723 = vrot.lane.b32.xlu1 %v6696_v36, %s3290_s19  ;;  %v1592_v11 = vpop.permute.xlu1 %1591  ;;  %s5534_s19 = sld [smem:[#allocation2 + $0x1e]] }
 0x3ba   : > { %v1569_v44 = vmul.f32 %v1568_v14, %v1557_v4  ;;  %v1570_v58 = vmul.f32 %v1568_v14, %v1556_v53  ;;  %v1608_v55 = vstv %s5016_s8  ;;  %v1544_v7 = vrot.slane %v2990_v28, %v3634_v39  ;;  %s5772_s8 = sld [smem:[#allocation2 + $0x2c]] }
 0x3bb   : > { %v1534_v12 = vadd.f32 %v4874_v45, %v1529_v18  ;;  %v1535_v47 = vadd.f32 %v4959_v49, %v1530_v8  ;;  %v1580_v2 = vrot.slane %v2993_v50, %v3631_v63  ;;  %v1584_v56 = vrot.slane %v2993_v50, %v3634_v39  ;;  %v2999_v45 = vld [vmem:[%s6624_s28 + $0x25] ss:$8 sm:$0x3] }
 0x3bc   : > { %v1620_v30 = vrot.slane %v2996_v0, %v3631_v63  ;;  %v1596_v38 = vsel %vm1595_vm7, %v1592_v11, %v1594_v42  ;;  %v1597_v10 = vsel %vm1595_vm7, %v1594_v42, %v1592_v11  ;;  %v1507_v49 = vmul.f32 %v1500_v5, %v1494_v27  ;;  %v1634_v37 = vpop.permute.xlu0 %1633 }
 0x3bd   : > { %v1508_v15 = vmul.f32 %v1504_v6, %v1495_v59  ;;  %v1609_v54 = vmul.f32 %v1608_v55, %v1597_v10  ;;  %v1610_v41 = vmul.f32 %v1608_v55, %v1596_v38  ;;  %v1574_v28 = vadd.f32 %v4963_v51, %v1569_v44  ;;  %v1632_v51 = vpop.permute.xlu1 %1631 }
 0x3be   : > { %v1575_v18 = vadd.f32 %v4967_v62, %v1570_v58  ;;  %v1624_v8 = vrot.slane %v2996_v0, %v3634_v39  ;;  %v1648_v48 = vstv %s5070_s29  ;;  %vm1920_vm14 = vcmp.lt.s32.totalorder %v4140_v46, 115  ;;  %v3002_v62 = vld [vmem:[%s6624_s28 + $0x26] ss:$8 sm:$0x3]  ;;  %s5569_s29 = sld [smem:[#allocation2 + $0x21]] }
 0x3bf   : > { %vm6480_vm15 = vcmp.lt.s32.totalorder %v4140_v46, 114  ;;  %v1547_v14 = vmul.f32 %v1540_v19, %v1534_v12  ;;  %v1548_v40 = vmul.f32 %v1544_v7, %v1535_v47  ;;  %v1660_v29 = vrot.slane %v2999_v45, %v3631_v63 }
 0x3c0   : > { %v1664_v50 = vrot.slane %v2999_v45, %v3634_v39  ;;  %v1614_v53 = vadd.f32 %v4971_v57, %v1609_v54  ;;  %v1615_v4 = vadd.f32 %v4981_v34, %v1610_v41  ;;  %v1636_v5 = vsel %vm1635_vm8, %v1632_v51, %v1634_v37  ;;  %v3005_v57 = vld [vmem:[%s6624_s28 + $0x27] ss:$8 sm:$0x3] }
 0x3c1   : > { %v1637_v6 = vsel %vm1635_vm8, %v1634_v37, %v1632_v51  ;;  %v1509_v27 = vadd.f32 %v1507_v49, %v5026_v52  ;;  %v1510_v59 = vadd.f32 %v1508_v15, %v5028_v60  ;;  %v1650_v0 = vmul.f32 %v1648_v48, %v1636_v5  ;;  %v1674_v52 = vpop.permute.xlu0 %1673  ;;  %v1672_v60 = vpop.permute.xlu1 %1671  ;;  %v6700_v5 = vld [vmem:[#allocation29_spill] sm:$0xff] }
 0x3c2   : > { %v1649_v61 = vmul.f32 %v1648_v48, %v1637_v6  ;;  %v1587_v19 = vmul.f32 %v1580_v2, %v1574_v28  ;;  %v1588_v44 = vmul.f32 %v1584_v56, %v1575_v18  ;;  %v1688_v58 = vstv %s5112_s26  ;;  %v6701_v6 = vld [vmem:[#allocation30_spill] sm:$0xff]  ;;  %s5511_s26 = sld [smem:[#allocation2 + $0x1d]] }
 0x3c3   : > { %v1700_v36 = vrot.slane %v3002_v62, %v3631_v63  ;;  %v1549_v34 = vadd.f32 %v1547_v14, %v1509_v27  ;;  %v1550_v55 = vadd.f32 %v1548_v40, %v1510_v59  ;;  %v1655_v12 = vadd.f32 %v4989_v21, %v1650_v0 }
 0x3c4   : > { %v1654_v7 = vadd.f32 %v4985_v3, %v1649_v61  ;;  %vm6481_vm0 = vcmp.lt.s32.totalorder %v4140_v46, 113  ;;  %v1627_v47 = vmul.f32 %v1620_v30, %v1614_v53  ;;  %v1628_v2 = vmul.f32 %v1624_v8, %v1615_v4 }
 0x3c5   : > { %v1676_v42 = vsel %vm1675_vm9, %v1672_v60, %v1674_v52  ;;  %v1677_v11 = vsel %vm1675_vm9, %v1674_v52, %v1672_v60  ;;  %vm6482_vm1 = vcmp.lt.s32.totalorder %v4140_v46, 112  ;;  %vm2080_vm2 = vcmp.lt.s32.totalorder %v4140_v46, 111  ;;  %v1714_v18 = vpop.permute.xlu0 %1713  ;;  %v1712_v8 = vpop.permute.xlu1 %1711 }
 0x3c6   : > { %v1704_v3 = vrot.slane %v3002_v62, %v3634_v39  ;;  %v1689_v21 = vmul.f32 %v1688_v58, %v1677_v11  ;;  %v1690_v56 = vmul.f32 %v1688_v58, %v1676_v42  ;;  %v1740_v38 = vrot.slane %v3005_v57, %v3631_v63  ;;  %v6699_v62 = vld [vmem:[#allocation28_spill] sm:$0xff] }
 0x3c7   : > { %vm2120_vm3 = vcmp.lt.s32.totalorder %v4140_v46, 110  ;;  %v1589_v30 = vadd.f32 %v1587_v19, %v1549_v34  ;;  %v1590_v10 = vadd.f32 %v1588_v44, %v1550_v55  ;;  %v1728_v45 = vstv %s5131_s24  ;;  %s6787_s24 = sld [smem:[#allocation53_spill]] }
 0x3c8   : > { %v1744_v49 = vrot.slane %v3005_v57, %v3634_v39  ;;  %vm6483_vm4 = vcmp.lt.s32.totalorder %v4140_v46, 109  ;;  %v1667_v15 = vmul.f32 %v1660_v29, %v1654_v7  ;;  %v1668_v54 = vmul.f32 %v1664_v50, %v1655_v12 }
 0x3c9   : > { %v1694_v41 = vadd.f32 %v5032_v24, %v1689_v21  ;;  %v1695_v28 = vadd.f32 %v5041_v25, %v1690_v56  ;;  %vm6484_vm5 = vcmp.lt.s32.totalorder %v4140_v46, 99  ;;  %v1629_v48 = vadd.f32 %v1627_v47, %v1589_v30  ;;  %v6698_v25 = vld [vmem:[#allocation27_spill] sm:$0xff]  ;;  %v5195_v58 = vpop.permute.xlu0 %1798 }
 0x3ca   : > { %v1630_v14 = vadd.f32 %v1628_v2, %v1590_v10  ;;  %v1716_v40 = vsel %vm1715_vm10, %v1712_v8, %v1714_v18  ;;  %v1717_v37 = vsel %vm1715_vm10, %v1714_v18, %v1712_v8  ;;  %v1927_v53 = vsel %vm1920_vm14, %v6699_v62, %v6698_v25  ;;  %v6710_v30 = vld [vmem:[#allocation31_spill] sm:$0xff]  ;;  %v6711_v10 = vld [vmem:[#allocation32_spill] sm:$0xff]  ;;  %v6715_v18 = vld [vmem:[#allocation34_spill] sm:$0xff] }
 0x3cb   : > { %v1707_v51 = vmul.f32 %v1700_v36, %v1694_v41  ;;  %v1708_v29 = vmul.f32 %v1704_v3, %v1695_v28  ;;  %v1729_v50 = vmul.f32 %v1728_v45, %v1717_v37  ;;  %v1730_v24 = vmul.f32 %v1728_v45, %v1716_v40  ;;  %v5197_v36 = vpop.permute.xlu1 %1796  ;;  %v6714_v28 = vld [vmem:[#allocation33_spill] sm:$0xff]  ;;  %v6717_v40 = vld [vmem:[#allocation36_spill] sm:$0xff] }
 0x3cc   : > { %v1928_v4 = vsel %vm1920_vm14, %v6698_v25, %v6699_v62  ;;  %v1967_v27 = vsel %vm6480_vm15, %v6701_v6, %v6700_v5  ;;  %v1968_v59 = vsel %vm6480_vm15, %v6700_v5, %v6701_v6  ;;  %vm2240_vm6 = vcmp.lt.s32.totalorder %v4140_v46, 98  ;;  %v6721_v62 = vld [vmem:[#allocation11_spill] sm:$0xff] }
 0x3cd   : > { %vm6485_vm7 = vcmp.lt.s32.totalorder %v4140_v46, 97  ;;  %v1669_v61 = vadd.f32 %v1667_v15, %v1629_v48  ;;  %v1670_v0 = vadd.f32 %v1668_v54, %v1630_v14  ;;  %v1734_v19 = vadd.f32 %v5045_v20, %v1729_v50  ;;  %v5247_v54 = vpop.permute.xlu0 %1838  ;;  %v6716_v14 = vld [vmem:[#allocation35_spill] sm:$0xff]  ;;  %v6719_v50 = vld [vmem:[#allocation38_spill] sm:$0xff] }
 0x3ce   : > { %v1735_v44 = vadd.f32 %v5050_v32, %v1730_v24  ;;  %v6702_v57 = vstv %s6697_s21  ;;  %v6704_v12 = vstv %s4171_s5  ;;  %vm2320_vm8 = vcmp.lt.s32.totalorder %v4140_v46, 96  ;;  %s6712_s5 = sld [smem:[#allocation66_spill]]  ;;  %s5711_s21 = sld [smem:[#allocation2 + $0x29]] }
 0x3cf   : > { %v5202_v34 = vmul.f32 %v6702_v57, %v5064_v26  ;;  %v6703_v55 = vmov %v6702_v57  ;;  %v5212_v20 = vmul.f32 %v6704_v12, %v5086_v23  ;;  %v6705_v32 = vmov %v6704_v12  ;;  %v5249_v41 = vpop.permute.xlu1 %1836 }
 0x3d0   : > { %v5207_v7 = vmul.f32 %v6703_v55, %v5076_v13  ;;  %v5217_v52 = vmul.f32 %v6705_v32, %v5092_v1  ;;  %vm6486_vm9 = vcmp.lt.s32.totalorder %v4140_v46, 95  ;;  %vm2400_vm10 = vcmp.lt.s32.totalorder %v4140_v46, 94 }
 0x3d1   : > { %v1709_v26 = vadd.f32 %v1707_v51, %v1669_v61  ;;  %v1710_v60 = vadd.f32 %v1708_v29, %v1670_v0  ;;  %v1747_v47 = vmul.f32 %v1740_v38, %v1734_v19  ;;  %v1748_v2 = vmul.f32 %v1744_v49, %v1735_v44  ;;  %v6718_v29 = vld [vmem:[#allocation37_spill] sm:$0xff]  ;;  %v6726_v0 = vld [vmem:[#allocation39_spill] sm:$0xff]  ;;  %v6727_v19 = vld [vmem:[#allocation40_spill] sm:$0xff] }
 0x3d2   : > { %v6706_v13 = vstv %s4181_s1  ;;  %v6708_v3 = vstv %s4183_s6  ;;  %vm2440_vm15 = vcmp.lt.s32.totalorder %v4140_v46, 93  ;;  %v2007_v38 = vsel %vm6481_vm0, %v6711_v10, %v6710_v30  ;;  %s6713_s6 = sld [smem:[#allocation67_spill]]  ;;  %s6720_s1 = sld [smem:[#allocation68_spill]] }
 0x3d3   : > { %v5224_v42 = vmul.f32 %v6706_v13, %v1927_v53  ;;  %v6707_v11 = vmov %v6706_v13  ;;  %v5232_v21 = vmul.f32 %v6708_v3, %v1967_v27  ;;  %v6709_v1 = vmov %v6708_v3  ;;  %v5318_v3 = vpop.permute.xlu1 %1876 }
 0x3d4   : > { %v5228_v23 = vmul.f32 %v6707_v11, %v1928_v4  ;;  %v5236_v56 = vmul.f32 %v6709_v1, %v1968_v59  ;;  %v2008_v45 = vsel %vm6481_vm0, %v6710_v30, %v6711_v10  ;;  %v1749_v49 = vadd.f32 %v1747_v47, %v1709_v26  ;;  %v6723_v4 = vld [vmem:[#allocation12_spill] sm:$0xff]  ;;  %v6731_v47 = vld [vmem:[#allocation42_spill] sm:$0xff]  ;;  %v5316_v11 = vpop.permute.xlu0 %1878 }
 0x3d5   : > { %v1750_v15 = vadd.f32 %v1748_v2, %v1710_v60  ;;  %v2047_v8 = vsel %vm6482_vm1, %v6715_v18, %v6714_v28  ;;  %v2048_v48 = vsel %vm6482_vm1, %v6714_v28, %v6715_v18  ;;  %v2087_v37 = vsel %vm2080_vm2, %v6717_v40, %v6716_v14  ;;  %v6730_v60 = vld [vmem:[#allocation41_spill] sm:$0xff] }
 0x3d6   : > { %v2088_v51 = vsel %vm2080_vm2, %v6716_v14, %v6717_v40  ;;  %vm2480_vm0 = vcmp.lt.s32.totalorder %v4140_v46, 83  ;;  %v2127_v24 = vsel %vm2120_vm3, %v6719_v50, %v6718_v29  ;;  %v2128_v25 = vsel %vm2120_vm3, %v6718_v29, %v6719_v50  ;;  %v6739_v40 = vld [vmem:[#allocation43_spill] sm:$0xff]  ;;  %v6740_v29 = vld [vmem:[#allocation44_spill] sm:$0xff] }
 0x3d7   : > { %vm2520_vm1 = vcmp.lt.s32.totalorder %v4140_v46, 82  ;;  %v5278_v53 = vadd.f32 %v6721_v62, %v1749_v49  ;;  %v5281_v5 = vadd.f32 %v6723_v4, %v1750_v15  ;;  %v6724_v6 = vstv %s6712_s5  ;;  %v6745_v4 = vld [vmem:[#allocation45_spill] sm:$0xff] }
 0x3d8   : > { %v5285_v27 = vmul.f32 %v6724_v6, %v2007_v38  ;;  %v6725_v59 = vmov %v6724_v6  ;;  %v2167_v44 = vsel %vm6483_vm4, %v6727_v19, %v6726_v0  ;;  %v2168_v57 = vsel %vm6483_vm4, %v6726_v0, %v6727_v19  ;;  %v6746_v6 = vld [vmem:[#allocation46_spill] sm:$0xff]  ;;  %v6747_v19 = vld [vmem:[#allocation47_spill] sm:$0xff] }
 0x3d9   : > { %v5289_v61 = vmul.f32 %v6725_v59, %v2008_v45  ;;  %v6728_v55 = vstv %s6713_s6  ;;  %v2207_v2 = vsel %vm6484_vm5, %v6731_v47, %v6730_v60  ;;  %v2208_v13 = vsel %vm6484_vm5, %v6730_v60, %v6731_v47  ;;  %v6750_v60 = vld [vmem:[#allocation50_spill] sm:$0xff]  ;;  %s5590_s6 = sld [smem:[#allocation2 + $0x22]] }
 0x3da   : > { %v5301_v12 = vmul.f32 %v6728_v55, %v2047_v8  ;;  %v6729_v32 = vmov %v6728_v55  ;;  %vm2560_vm4 = vcmp.lt.s32.totalorder %v4140_v46, 81  ;;  %v6732_v1 = vstv %s6720_s1  ;;  %s5603_s1 = sld [smem:[#allocation2 + $0x23]] }
 0x3db   : > { %v5305_v26 = vmul.f32 %v6729_v32, %v2048_v48  ;;  %v5322_v30 = vmul.f32 %v6732_v1, %v2087_v37  ;;  %v6733_v10 = vmov %v6732_v1  ;;  %v6734_v45 = vstv %s6722_s13  ;;  %v6749_v32 = vld [vmem:[#allocation49_spill] sm:$0xff]  ;;  %v5392_v1 = vpop.permute.xlu1 %1916  ;;  %s5605_s13 = sld [smem:[#allocation2 + $0x24]] }
 0x3dc   : > { %v5326_v38 = vmul.f32 %v6733_v10, %v2088_v51  ;;  %v5330_v49 = vmul.f32 %v6734_v45, %v2127_v24  ;;  %v6735_v15 = vmov %v6734_v45  ;;  %v6736_v18 = vstv %s4222_s25  ;;  %s5386_s25 = sld [smem:[#allocation2 + $0x19]] }
 0x3dd   : > { %v5334_v28 = vmul.f32 %v6735_v15, %v2128_v25  ;;  %v5338_v8 = vmul.f32 %v6736_v18, %v2167_v44  ;;  %v6737_v48 = vmov %v6736_v18  ;;  %v2247_v37 = vsel %vm2240_vm6, %v6740_v29, %v6739_v40  ;;  %v6748_v44 = vld [vmem:[#allocation48_spill] sm:$0xff] }
 0x3de   : > { %v5342_v14 = vmul.f32 %v6737_v48, %v2168_v57  ;;  %v2248_v51 = vsel %vm2240_vm6, %v6739_v40, %v6740_v29  ;;  %vm2600_vm5 = vcmp.lt.s32.totalorder %v4140_v46, 80  ;;  %v6741_v50 = vstv %s4243_s23  ;;  %s5388_s23 = sld [smem:[#allocation2 + $0x1a]]  ;;  %v6755_v48 = vld [vmem:[#allocation51_spill] sm:$0xff]  ;;  %v6756_v40 = vld [vmem:[#allocation52_spill] sm:$0xff] }
 0x3df   : > { %v5355_v24 = vmul.f32 %v6741_v50, %v2207_v2  ;;  %v6743_v25 = vmov %v6741_v50  ;;  %v2287_v59 = vsel %vm6485_vm7, %v6746_v6, %v6745_v4  ;;  %v2288_v0 = vsel %vm6485_vm7, %v6745_v4, %v6746_v6 }
 0x3e0   : > { %6738 = vst [vmem:[#allocation13_spill] sm:$0xff] %v5342_v14  ;;  %v5359_v62 = vmul.f32 %v6743_v25, %v2208_v13  ;;  %v2327_v57 = vsel %vm2320_vm8, %v6748_v44, %v6747_v19  ;;  %v2328_v55 = vsel %vm2320_vm8, %v6747_v19, %v6748_v44  ;;  %v2367_v47 = vsel %vm6486_vm9, %v6750_v60, %v6749_v32  ;;  %v5390_v13 = vpop.permute.xlu0 %1918  ;;  %v6762_v19 = vld [vmem:[#allocation56_spill] sm:$0xff] }
 0x3e1   : > { %6742 = vst [vmem:[#allocation14_spill] sm:$0xff] %v5355_v24  ;;  %v2368_v2 = vsel %vm6486_vm9, %v6749_v32, %v6750_v60  ;;  %vm2640_vm7 = vcmp.lt.s32.totalorder %v4140_v46, 79  ;;  %v6751_v10 = vstv %s4256_s2  ;;  %v2407_v29 = vsel %vm2400_vm10, %v6756_v40, %v6755_v48 }
 0x3e2   : > { %6744 = vst [vmem:[#allocation15_spill] sm:$0xff] %v5359_v62  ;;  %v5396_v45 = vmul.f32 %v6751_v10, %v2247_v37  ;;  %v6753_v15 = vmov %v6751_v10  ;;  %v2408_v50 = vsel %vm2400_vm10, %v6755_v48, %v6756_v40  ;;  %vm2680_vm9 = vcmp.lt.s32.totalorder %v4140_v46, 78 }
 0x3e3   : > { %v5400_v18 = vmul.f32 %v6753_v15, %v2248_v51  ;;  %v6757_v25 = vstv %s4265_s18  ;;  %v6761_v51 = vld [vmem:[#allocation55_spill] sm:$0xff]  ;;  %v6763_v60 = vstv %s4287_s3  ;;  %v6767_v48 = vstv %s4322_s15  ;;  %s5644_s15 = sld [smem:[#allocation2 + $0x25]]  ;;  %s5646_s3 = sld [smem:[#allocation2 + $0x26]] }
 0x3e4   : > { %6752 = vst [vmem:[#allocation16_spill] sm:$0xff] %v5396_v45  ;;  %v5413_v37 = vmul.f32 %v6757_v25, %v2287_v59  ;;  %v6759_v4 = vmov %v6757_v25  ;;  %v2447_v44 = vsel %vm2440_vm15, %v6762_v19, %v6761_v51  ;;  %v2448_v32 = vsel %vm2440_vm15, %v6761_v51, %v6762_v19  ;;  %v5430_v59 = vld [vmem:[%s6624_s28 + $0x31] ss:$8 sm:$0x3] }
 0x3e5   : > { %6754 = vst [vmem:[#allocation17_spill] sm:$0xff] %v5400_v18  ;;  %v5417_v6 = vmul.f32 %v6759_v4, %v2288_v0  ;;  %v5434_v0 = vmul.f32 %v6763_v60, %v2327_v57  ;;  %v6765_v10 = vmov %v6763_v60  ;;  %v5442_v40 = vmul.f32 %v6767_v48, %v2367_v47  ;;  %v5451_v51 = vld [vmem:[%s6624_s28 + $0x32] ss:$8 sm:$0x3] }
 0x3e6   : > { %6758 = vst [vmem:[#allocation18_spill] sm:$0xff] %v5413_v37  ;;  %v5438_v15 = vmul.f32 %v6765_v10, %v2328_v55  ;;  %v6769_v25 = vmov %v6767_v48  ;;  %v6771_v19 = vstv %s4337_s11  ;;  %v6775_v55 = vld [vmem:[#allocation59_spill] sm:$0xff]  ;;  %v6776_v10 = vld [vmem:[#allocation60_spill] sm:$0xff]  ;;  %v5471_v48 = vpop.permute.xlu0 %1958  ;;  %v2527_v22 = vsel %vm2520_vm1, %v6782_v31, %v6781_v43  ;;  %s5496_s11 = sld [smem:[#allocation2 + $0x1c]] }
 0x3e7   : > { %6760 = vst [vmem:[#allocation19_spill] sm:$0xff] %v5417_v6  ;;  %6764 = vst [vmem:[#allocation20_spill] sm:$0xff] %v5434_v0  ;;  %v5446_v4 = vmul.f32 %v6769_v25, %v2368_v2  ;;  %v5457_v16 = vmul.f32 %v6771_v19, %v2407_v29  ;;  %v6773_v57 = vmov %v6771_v19  ;;  %v2487_v47 = vsel %vm2480_vm0, %v6776_v10, %v6775_v55  ;;  %v5473_v25 = vpop.permute.xlu1 %1956 }
 0x3e8   : > { %6766 = vst [vmem:[#allocation21_spill] sm:$0xff] %v5438_v15  ;;  %6768 = vst [vmem:[#allocation22_spill] sm:$0xff] %v5442_v40  ;;  %v5461_v60 = vmul.f32 %v6773_v57, %v2408_v50  ;;  %v2488_v2 = vsel %vm2480_vm0, %v6775_v55, %v6776_v10  ;;  %v6777_v29 = vstv %s4359_s27  ;;  %v2528_v55 = vsel %vm2520_vm1, %v6781_v43, %v6782_v31  ;;  %v5509_v43 = vld [vmem:[%s6624_s28 + $0x34] ss:$8 sm:$0x3] }
 0x3e9   : > { %6770 = vst [vmem:[#allocation23_spill] sm:$0xff] %v5446_v4  ;;  %6772 = vst [vmem:[#allocation24_spill] sm:$0xff] %v5457_v16  ;;  %v5477_v19 = vmul.f32 %v6777_v29, %v2447_v44  ;;  %v6779_v50 = vmov %v6777_v29  ;;  %v5494_v44 = vld [vmem:[%s6624_s28 + $0x33] ss:$8 sm:$0x3]  ;;  %v6807_v6 = vstv %s4690_s12  ;;  %v1841_v62 = vsel %vm1840_vm12, %v5249_v41, %v5247_v54 }
 0x3ea   : > { %6774 = vst [vmem:[#allocation25_spill] sm:$0xff] %v5461_v60  ;;  %v5481_v57 = vmul.f32 %v6779_v50, %v2448_v32  ;;  %v5515_v50 = vmul.f32 %v2496_v35, %v2487_v47  ;;  %v5519_v32 = vmul.f32 %v2496_v35, %v2488_v2  ;;  %v6785_v10 = vld [vmem:[#allocation69_spill] sm:$0xff]  ;;  %v6788_v35 = vstv %s4540_s20  ;;  %v5546_v60 = vpop.permute.xlu0 %1998  ;;  %v6793_v16 = vld [vmem:[#allocation73_spill] sm:$0xff] }
 0x3eb   : > { %6778 = vst [vmem:[#allocation26_spill] sm:$0xff] %v5477_v19  ;;  %v2567_v29 = vsel %vm2560_vm4, %v6786_v33, %v6785_v10  ;;  %v2568_v31 = vsel %vm2560_vm4, %v6785_v10, %v6786_v33  ;;  %v5538_v47 = vmul.f32 %v6788_v35, %v2527_v22  ;;  %v6790_v2 = vmov %v6788_v35  ;;  %v5548_v33 = vpop.permute.xlu1 %1996  ;;  %v6792_v10 = vld [vmem:[#allocation72_spill] sm:$0xff]  ;;  %v5567_v19 = vld [vmem:[%s6624_s28 + $0x36] ss:$8 sm:$0x3] }
 0x3ec   : > { %6780 = vst [vmem:[#allocation10_spill] sm:$0xff] %v5481_v57  ;;  %6783 = vst [vmem:[#allocation9_spill] sm:$0xff] %v5515_v50  ;;  %v5532_v57 = vld [vmem:[%s6624_s28 + $0x35] ss:$8 sm:$0x3]  ;;  %v2607_v22 = vsel %vm2600_vm5, %v6793_v16, %v6792_v10  ;;  %v6794_v50 = vstv %s6787_s24  ;;  %v2608_v35 = vsel %vm2600_vm5, %v6792_v10, %v6793_v16  ;;  %s5695_s24 = sld [smem:[#allocation2 + $0x28]]  ;;  %v1921_v14 = vsel %vm1920_vm14, %v5392_v1, %v5390_v13 }
 0x3ed   : > { %6784 = vst [vmem:[#allocation27_spill] sm:$0xff] %v5519_v32  ;;  %6789 = vst [vmem:[#allocation28_spill] sm:$0xff] %v5538_v47  ;;  %v5542_v32 = vmul.f32 %v6790_v2, %v2528_v55  ;;  %v6796_v47 = vmov %v6794_v50  ;;  %v5588_v55 = vld [vmem:[%s6624_s28 + $0x37] ss:$8 sm:$0x3]  ;;  %v6800_v2 = vstv %s4630_s16 }
 0x3ee   : > { %v5577_v4 = vmul.f32 %v6796_v47, %v2568_v31  ;;  %v6799_v31 = vld [vmem:[#allocation75_spill] sm:$0xff]  ;;  %v6803_v40 = vld [vmem:[#allocation77_spill] sm:$0xff]  ;;  %v5621_v10 = vpop.permute.xlu0 %2038  ;;  %v6805_v47 = vstv %s4630_s16  ;;  %s5839_s16 = sld [smem:[#allocation2 + $0x2e]] }
 0x3ef   : > { %6791 = vst [vmem:[#allocation29_spill] sm:$0xff] %v5542_v32  ;;  %v5573_v32 = vmul.f32 %v6794_v50, %v2567_v29  ;;  %v6798_v29 = vld [vmem:[#allocation74_spill] sm:$0xff]  ;;  %v5642_v0 = vpop.permute.xlu1 %2036 }
 0x3f0   : > { %6797 = vst [vmem:[#allocation31_spill] sm:$0xff] %v5577_v4  ;;  %v2647_v50 = vsel %vm2640_vm7, %v6799_v31, %v6798_v29  ;;  %v2648_v16 = vsel %vm2640_vm7, %v6798_v29, %v6799_v31  ;;  %v5609_v4 = vmul.f32 %v6800_v2, %v2607_v22  ;;  %v5626_v22 = vld [vmem:[%s6624_s28 + $0x40] ss:$8 sm:$0x3] }
 0x3f1   : > { %6795 = vst [vmem:[#allocation30_spill] sm:$0xff] %v5573_v32  ;;  %v6802_v32 = vld [vmem:[#allocation76_spill] sm:$0xff]  ;;  %v5650_v37 = vmul.f32 %v6807_v6, %v2647_v50 }
 0x3f2   : > { %6801 = vst [vmem:[#allocation32_spill] sm:$0xff] %v5609_v4  ;;  %v2687_v15 = vsel %vm2680_vm9, %v6803_v40, %v6802_v32  ;;  %v2688_v29 = vsel %vm2680_vm9, %v6802_v32, %v6803_v40  ;;  %v5631_v2 = vld [vmem:[%s6624_s28 + $0x41] ss:$8 sm:$0x3]  ;;  %v5635_v40 = vmul.f32 %v6805_v47, %v2608_v35  ;;  %v6809_v35 = vmov %v6807_v6 }
 0x3f3   : > { %6804 = vst [vmem:[#allocation33_spill] sm:$0xff] %v5631_v2  ;;  %6808 = vst [vmem:[#allocation35_spill] sm:$0xff] %v5650_v37  ;;  %v5654_v47 = vmul.f32 %v6809_v35, %v2648_v16  ;;  %v5662_v4 = vld [vmem:[%s6624_s28 + $0x42] ss:$8 sm:$0x3]  ;;  %v1801_v16 = vsel %vm1800_vm11, %v5197_v36, %v5195_v58  ;;  %v1802_v37 = vsel %vm1800_vm11, %v5195_v58, %v5197_v36  ;;  %vm6830_vm11 = vcmp.lt.s32.totalorder %v4140_v46, 114 }
 0x3f4   : > { %6806 = vst [vmem:[#allocation34_spill] sm:$0xff] %v5635_v40  ;;  %6811 = vst [vmem:[#allocation37_spill] sm:$0xff] %v5662_v4  ;;  %v6812_v40 = vstv %s4723_s4  ;;  %v5680_v31 = vld [vmem:[%s6624_s28 + $0x43] ss:$8 sm:$0x3]  ;;  %s5770_s4 = sld [smem:[#allocation2 + $0x2b]]  ;;  %v1842_v58 = vsel %vm1840_vm12, %v5247_v54, %v5249_v41  ;;  %v1881_v54 = vsel %vm1880_vm13, %v5318_v3, %v5316_v11  ;;  %v1882_v41 = vsel %vm1880_vm13, %v5316_v11, %v5318_v3 }
 0x3f5   : > { %6810 = vst [vmem:[#allocation36_spill] sm:$0xff] %v5654_v47  ;;  %v5668_v18 = vmul.f32 %v6812_v40, %v2687_v15  ;;  %v6814_v6 = vmov %v6812_v40  ;;  %6816 = vst [vmem:[#allocation12_spill] sm:$0xff] %v5680_v31  ;;  %v5683_v47 = vpop.permute.xlu0 %2078  ;;  %v5693_v40 = vld [vmem:[%s6624_s28 + $0x44] ss:$8 sm:$0x3]  ;;  %vm6838_vm13 = vcmp.lt.s32.totalorder %v4140_v46, 113 }
 0x3f6   : > { %v5672_v50 = vmul.f32 %v6814_v6, %v2688_v29  ;;  %6817 = vst [vmem:[#allocation39_spill] sm:$0xff] %v5693_v40  ;;  %v5697_v6 = vpop.permute.xlu1 %2076  ;;  %v5709_v32 = vld [vmem:[%s6624_s28 + $0x45] ss:$8 sm:$0x3]  ;;  %vm6831_vm12 = vmmov %vm6830_vm11 }
 0x3f7   : > { %6813 = vst [vmem:[#allocation38_spill] sm:$0xff] %v5668_v18  ;;  %6818 = vst [vmem:[#allocation40_spill] sm:$0xff] %v5709_v32  ;;  %v5723_v29 = vld [vmem:[%s6624_s28 + $0x46] ss:$8 sm:$0x3] }
 0x3f8   : > { %6815 = vst [vmem:[#allocation11_spill] sm:$0xff] %v5672_v50  ;;  %6819 = vst [vmem:[#allocation41_spill] sm:$0xff] %v5723_v29  ;;  %v5736_v15 = vld [vmem:[%s6624_s28 + $0x47] ss:$8 sm:$0x3]  ;;  %v6823_v50 = vstv %s5386_s25 }
 0x3f9   : > { %6820 = vst [vmem:[#allocation42_spill] sm:$0xff] %v5736_v15  ;;  %v5741_v18 = vld [vmem:[%s6624_s28 + $0x50] ss:$8 sm:$0x3]  ;;  %v5751_v35 = vpop.permute.xlu0 %2118  ;;  %v1814_v4 = vmul.f32 %v6823_v50, %v1801_v16  ;;  %v6824_v29 = vmov %v6823_v50  ;;  %v1962_v16 = vsel %vm6831_vm12, %v5471_v48, %v5473_v25 }
 0x3fa   : > { %6821 = vst [vmem:[#allocation43_spill] sm:$0xff] %v5741_v18  ;;  %v5760_v31 = vld [vmem:[%s6624_s28 + $0x51] ss:$8 sm:$0x3]  ;;  %v5762_v45 = vpop.permute.xlu1 %2116  ;;  %v1815_v40 = vmul.f32 %v6824_v29, %v1802_v37 }
 0x3fb   : > { %6822 = vst [vmem:[#allocation44_spill] sm:$0xff] %v5760_v31  ;;  %v5784_v36 = vld [vmem:[%s6624_s28 + $0x52] ss:$8 sm:$0x3]  ;;  %v6826_v31 = vstv %s5388_s23  ;;  %v1819_v3 = vadd.f32 %v5054_v17, %v1814_v4  ;;  %v1922_v17 = vsel %vm1920_vm14, %v5390_v13, %v5392_v1  ;;  %vm6839_vm14 = vmmov %vm6838_vm13 }
 0x3fc   : > { %v5810_v29 = vld [vmem:[%s6624_s28 + $0x53] ss:$8 sm:$0x3]  ;;  %v5828_v15 = vld [vmem:[%s6624_s28 + $0x54] ss:$8 sm:$0x3]  ;;  %v1854_v18 = vmul.f32 %v6826_v31, %v1841_v62  ;;  %v6827_v24 = vmov %v6826_v31  ;;  %v1820_v50 = vadd.f32 %v5058_v9, %v1815_v40  ;;  %v6828_v62 = vstv %s5453_s17 }
 0x3fd   : > { %v5798_v32 = vpop.permute.xlu0 %2158  ;;  %6825 = vst [vmem:[#allocation45_spill] sm:$0xff] %v5810_v29  ;;  %v1855_v2 = vmul.f32 %v6827_v24, %v1842_v58  ;;  %v1894_v31 = vmul.f32 %v6828_v62, %v1881_v54  ;;  %v6829_v58 = vmov %v6828_v62  ;;  %v5864_v4 = vld [vmem:[%s6624_s28 + $0x55] ss:$8 sm:$0x3]  ;;  %v1961_v24 = vsel %vm6830_vm11, %v5473_v25, %v5471_v48  ;;  %s6164_s17 = sld [smem:[#allocation2 + $0x2f]] }
 0x3fe   : > { %v5820_v37 = vpop.permute.xlu1 %2156  ;;  %v1895_v11 = vmul.f32 %v6829_v58, %v1882_v41  ;;  %v1859_v13 = vadd.f32 %v5202_v34, %v1854_v18  ;;  %v6832_v41 = vstv %s5496_s11  ;;  %v6834_v18 = vrot.slane %v5430_v59, %v3631_v63 }
 0x3ff   : > { %v1860_v1 = vadd.f32 %v5207_v7, %v1855_v2  ;;  %v1934_v62 = vmul.f32 %v6832_v41, %v1921_v14  ;;  %v6833_v54 = vmov %v6832_v41  ;;  %v6835_v58 = vrot.slane %v5430_v59, %v3634_v39 }
 0x400   : > { %v1935_v29 = vmul.f32 %v6833_v54, %v1922_v17  ;;  %v1832_v2 = vmul.f32 %v6834_v18, %v1819_v3  ;;  %v1899_v14 = vadd.f32 %v5212_v20, %v1894_v31  ;;  %v1900_v25 = vadd.f32 %v5217_v52, %v1895_v11 }
 0x401   : > { %v5859_v9 = vpop.permute.xlu0 %2198  ;;  %v1833_v48 = vmul.f32 %v6835_v58, %v1820_v50  ;;  %v6836_v54 = vstv %s5511_s26  ;;  %v2001_v3 = vsel %vm6838_vm13, %v5548_v33, %v5546_v60  ;;  %v2002_v20 = vsel %vm6839_vm14, %v5546_v60, %v5548_v33 }
 0x402   : > { %v5866_v40 = vpop.permute.xlu1 %2196  ;;  %v1974_v41 = vmul.f32 %v6836_v54, %v1961_v24  ;;  %v6837_v34 = vmov %v6836_v54  ;;  %v6840_v52 = vrot.slane %v5451_v51, %v3631_v63  ;;  %v6841_v11 = vrot.slane %v5451_v51, %v3634_v39 }
 0x403   : > { %v1975_v7 = vmul.f32 %v6837_v34, %v1962_v16  ;;  %v2613_v24 = vstv %s5837_s9  ;;  %v2653_v31 = vstv %s5839_s16  ;;  %v1939_v58 = vadd.f32 %v5224_v42, %v1934_v62 }
 0x404   : > { %v1872_v50 = vmul.f32 %v6840_v52, %v1859_v13  ;;  %v1873_v16 = vmul.f32 %v6841_v11, %v1860_v1  ;;  %v1940_v34 = vadd.f32 %v5228_v23, %v1935_v29  ;;  %vm6842_vm11 = vcmp.lt.s32.totalorder %v4140_v46, 112 }
 0x405   : > { %v5900_v17 = vpop.permute.xlu0 %2238  ;;  %v2041_v60 = vsel %vm6842_vm11, %v5642_v0, %v5621_v10  ;;  %vm6843_vm12 = vmmov %vm6842_vm11  ;;  %v1834_v51 = vadd.f32 %v1832_v2, %v5278_v53  ;;  %v1835_v13 = vadd.f32 %v1833_v48, %v5281_v5  ;;  %v6844_v1 = vstv %s5534_s19  ;;  %s6228_s19 = sld [smem:[#allocation2 + $0x30]] }
 0x406   : > { %v5914_v59 = vpop.permute.xlu1 %2236  ;;  %v2042_v33 = vsel %vm6843_vm12, %v5621_v10, %v5642_v0  ;;  %v2014_v18 = vmul.f32 %v6844_v1, %v2001_v3  ;;  %v6845_v54 = vmov %v6844_v1  ;;  %v6846_v23 = vrot.slane %v5494_v44, %v3631_v63 }
 0x407   : > { %v2015_v42 = vmul.f32 %v6845_v54, %v2002_v20  ;;  %v6847_v52 = vrot.slane %v5494_v44, %v3634_v39  ;;  %v1979_v0 = vadd.f32 %v5232_v21, %v1974_v41  ;;  %v1980_v53 = vadd.f32 %v5236_v56, %v1975_v7 }
 0x408   : > { %v1912_v29 = vmul.f32 %v6846_v23, %v1899_v14  ;;  %v6848_v5 = vstv %s5550_s10  ;;  %v2081_v14 = vsel %vm2080_vm2, %v5697_v6, %v5683_v47  ;;  %v2082_v44 = vsel %vm2080_vm2, %v5683_v47, %v5697_v6  ;;  %s6230_s10 = sld [smem:[#allocation2 + $0x61]] }
 0x409   : > { %v5940_v62 = vpop.permute.xlu0 %2278  ;;  %v1913_v11 = vmul.f32 %v6847_v52, %v1900_v25  ;;  %v2054_v2 = vmul.f32 %v6848_v5, %v2041_v60  ;;  %v6849_v48 = vmov %v6848_v5  ;;  %v1874_v21 = vadd.f32 %v1872_v50, %v1834_v51 }
 0x40a   : > { %v2277_v10 = vpop.permute.xlu1 %2276  ;;  %v2055_v3 = vmul.f32 %v6849_v48, %v2042_v33  ;;  %v1875_v25 = vadd.f32 %v1873_v16, %v1835_v13  ;;  %v6850_v56 = vrot.slane %v5509_v43, %v3631_v63  ;;  %v6851_v41 = vrot.slane %v5509_v43, %v3634_v39 }
 0x40b   : > { %v2019_v60 = vadd.f32 %v5285_v27, %v2014_v18  ;;  %v2020_v33 = vadd.f32 %v5289_v61, %v2015_v42  ;;  %v2121_v47 = vsel %vm2120_vm3, %v5762_v45, %v5751_v35  ;;  %v2122_v6 = vsel %vm2120_vm3, %v5751_v35, %v5762_v45 }
 0x40c   : > { %v1952_v7 = vmul.f32 %v6850_v56, %v1939_v58  ;;  %v1953_v20 = vmul.f32 %v6851_v41, %v1940_v34  ;;  %v1914_v16 = vadd.f32 %v1912_v29, %v1874_v21  ;;  %v1915_v43 = vadd.f32 %v1913_v11, %v1875_v25 }
 0x40d   : > { %v2319_v50 = vpop.permute.xlu0 %2318  ;;  %v6852_v58 = vstv %s5552_s0  ;;  %v6854_v61 = vrot.slane %v5532_v57, %v3631_v63  ;;  %v6855_v18 = vrot.slane %v5532_v57, %v3634_v39  ;;  %v2059_v42 = vadd.f32 %v5301_v12, %v2054_v2 }
 0x40e   : > { %v2094_v34 = vmul.f32 %v6852_v58, %v2081_v14  ;;  %v6853_v51 = vmov %v6852_v58  ;;  %v2317_v27 = vpop.permute.xlu1 %2316  ;;  %v2060_v45 = vadd.f32 %v5305_v26, %v2055_v3  ;;  %v6856_v35 = vstv %s5569_s29 }
 0x40f   : > { %v2095_v13 = vmul.f32 %v6853_v51, %v2082_v44  ;;  %v1992_v1 = vmul.f32 %v6854_v61, %v1979_v0  ;;  %v1993_v54 = vmul.f32 %v6855_v18, %v1980_v53  ;;  %v2134_v23 = vmul.f32 %v6856_v35, %v2121_v47 }
 0x410   : > { %v6857_v29 = vmov %v6856_v35  ;;  %vm6858_vm2 = vcmp.lt.s32.totalorder %v4140_v46, 109  ;;  %v1954_v0 = vadd.f32 %v1952_v7, %v1914_v16  ;;  %v1955_v12 = vadd.f32 %v1953_v20, %v1915_v43 }
 0x411   : > { %v2135_v52 = vmul.f32 %v6857_v29, %v2122_v6  ;;  %v2161_v11 = vsel %vm6858_vm2, %v5820_v37, %v5798_v32  ;;  %vm6859_vm3 = vmmov %vm6858_vm2  ;;  %v6860_v26 = vrot.slane %v5567_v19, %v3631_v63  ;;  %v6861_v5 = vrot.slane %v5567_v19, %v3634_v39  ;;  %v2359_v48 = vpop.permute.xlu0 %2358 }
 0x412   : > { %v2162_v57 = vsel %vm6859_vm3, %v5798_v32, %v5820_v37  ;;  %v2099_v3 = vadd.f32 %v5322_v30, %v2094_v34  ;;  %v2100_v14 = vadd.f32 %v5326_v38, %v2095_v13  ;;  %vm6862_vm13 = vcmp.lt.s32.totalorder %v4140_v46, 99  ;;  %v2357_v44 = vpop.permute.xlu1 %2356 }
 0x413   : > { %v2032_v53 = vmul.f32 %v6860_v26, %v2019_v60  ;;  %v2033_v2 = vmul.f32 %v6861_v5, %v2020_v33  ;;  %v2201_v32 = vsel %vm6862_vm13, %v5866_v40, %v5859_v9  ;;  %vm6863_vm14 = vmmov %vm6862_vm13  ;;  %v1994_v19 = vadd.f32 %v1992_v1, %v1954_v0  ;;  %v6880_v26 = vld [vmem:[#allocation14_spill] sm:$0xff]  ;;  %v6881_v5 = vld [vmem:[#allocation15_spill] sm:$0xff] }
 0x414   : > { %v2202_v37 = vsel %vm6863_vm14, %v5859_v9, %v5866_v40  ;;  %v1995_v21 = vadd.f32 %v1993_v54, %v1955_v12  ;;  %v6864_v25 = vstv %s5590_s6  ;;  %v6866_v30 = vrot.slane %v5588_v55, %v3631_v63  ;;  %v6872_v54 = vld [vmem:[#allocation13_spill] sm:$0xff] }
 0x415   : > { %v2174_v56 = vmul.f32 %v6864_v25, %v2161_v11  ;;  %v6865_v7 = vmov %v6864_v25  ;;  %v6867_v20 = vrot.slane %v5588_v55, %v3634_v39  ;;  %v2139_v33 = vadd.f32 %v5330_v49, %v2134_v23  ;;  %v2399_v58 = vpop.permute.xlu0 %2398  ;;  %v6877_v11 = vld [vmem:[#allocation33_spill] sm:$0xff] }
 0x416   : > { %v2175_v41 = vmul.f32 %v6865_v7, %v2162_v57  ;;  %v2072_v38 = vmul.f32 %v6866_v30, %v2059_v42  ;;  %v2140_v47 = vadd.f32 %v5334_v28, %v2135_v52  ;;  %v6868_v9 = vstv %s5603_s1  ;;  %v2397_v1 = vpop.permute.xlu1 %2396  ;;  %v6884_v7 = vld [vmem:[#allocation37_spill] sm:$0xff] }
 0x417   : > { %v2073_v60 = vmul.f32 %v6867_v20, %v2060_v45  ;;  %v2214_v40 = vmul.f32 %v6868_v9, %v2201_v32  ;;  %v6869_v6 = vmov %v6868_v9  ;;  %v2241_v43 = vsel %vm2240_vm6, %v5914_v59, %v5900_v17 }
 0x418   : > { %v2215_v16 = vmul.f32 %v6869_v6, %v2202_v37  ;;  %v2242_v55 = vsel %vm2240_vm6, %v5900_v17, %v5914_v59  ;;  %v2034_v49 = vadd.f32 %v2032_v53, %v1994_v19  ;;  %v2035_v34 = vadd.f32 %v2033_v2, %v1995_v21 }
 0x419   : > { %v6870_v28 = vrot.slane %v5626_v22, %v3631_v63  ;;  %v6871_v13 = vrot.slane %v5626_v22, %v3634_v39  ;;  %v2179_v18 = vadd.f32 %v5338_v8, %v2174_v56  ;;  %v2180_v42 = vadd.f32 %v6872_v54, %v2175_v41  ;;  %v6896_v54 = vld [vmem:[#allocation18_spill] sm:$0xff] }
 0x41a   : > { %vm6873_vm6 = vcmp.lt.s32.totalorder %v4140_v46, 97  ;;  %v2074_v45 = vadd.f32 %v2072_v38, %v2034_v49  ;;  %v2075_v35 = vadd.f32 %v2073_v60, %v2035_v34  ;;  %v6875_v23 = vstv %s5605_s13  ;;  %v2437_v21 = vpop.permute.xlu1 %2436  ;;  %v6887_v60 = vld [vmem:[#allocation16_spill] sm:$0xff]  ;;  %s6958_s13 = sld [smem:[#allocation7_spill]] }
 0x41b   : > { %v2112_v51 = vmul.f32 %v6870_v28, %v2099_v3  ;;  %v2113_v61 = vmul.f32 %v6871_v13, %v2100_v14  ;;  %v2281_v17 = vsel %vm6873_vm6, %v2277_v10, %v5940_v62  ;;  %vm6874_vm11 = vmmov %vm6873_vm6  ;;  %v2254_v22 = vmul.f32 %v6875_v23, %v2241_v43  ;;  %v2439_v3 = vpop.permute.xlu0 %2438  ;;  %v6893_v28 = vld [vmem:[#allocation12_spill] sm:$0xff] }
 0x41c   : > { %v2282_v59 = vsel %vm6874_vm11, %v5940_v62, %v2277_v10  ;;  %v6876_v29 = vmov %v6875_v23  ;;  %v6878_v57 = vrot.slane %v6877_v11, %v3631_v63  ;;  %v6879_v0 = vrot.slane %v6877_v11, %v3634_v39 }
 0x41d   : > { %v2255_v52 = vmul.f32 %v6876_v29, %v2242_v55  ;;  %v2219_v53 = vadd.f32 %v6880_v26, %v2214_v40  ;;  %v2220_v2 = vadd.f32 %v6881_v5, %v2215_v16  ;;  %v6882_v62 = vstv %s5644_s15 }
 0x41e   : > { %v2152_v8 = vmul.f32 %v6878_v57, %v2139_v33  ;;  %v2153_v12 = vmul.f32 %v6879_v0, %v2140_v47  ;;  %v2294_v10 = vmul.f32 %v6882_v62, %v2281_v17  ;;  %v6883_v14 = vmov %v6882_v62  ;;  %v6888_v47 = vld [vmem:[#allocation17_spill] sm:$0xff]  ;;  %v6897_v17 = vld [vmem:[#allocation19_spill] sm:$0xff] }
 0x41f   : > { %v2295_v32 = vmul.f32 %v6883_v14, %v2282_v59  ;;  %v2321_v37 = vsel %vm2320_vm8, %v2317_v27, %v2319_v50  ;;  %v2322_v19 = vsel %vm2320_vm8, %v2319_v50, %v2317_v27  ;;  %v2114_v25 = vadd.f32 %v2112_v51, %v2074_v45  ;;  %v2479_v34 = vpop.permute.xlu0 %2478  ;;  %v6900_v57 = vld [vmem:[#allocation39_spill] sm:$0xff] }
 0x420   : > { %v2115_v56 = vadd.f32 %v2113_v61, %v2075_v35  ;;  %v6885_v41 = vrot.slane %v6884_v7, %v3631_v63  ;;  %v6886_v38 = vrot.slane %v6884_v7, %v3634_v39  ;;  %v2259_v33 = vadd.f32 %v6887_v60, %v2254_v22 }
 0x421   : > { %v2260_v9 = vadd.f32 %v6888_v47, %v2255_v52  ;;  %vm6889_vm12 = vcmp.lt.s32.totalorder %v4140_v46, 95  ;;  %v2154_v40 = vadd.f32 %v2152_v8, %v2114_v25  ;;  %v6891_v16 = vstv %s5646_s3 }
 0x422   : > { %v2192_v30 = vmul.f32 %v6885_v41, %v2179_v18  ;;  %v2193_v20 = vmul.f32 %v6886_v38, %v2180_v42  ;;  %v2361_v50 = vsel %vm6889_vm12, %v2357_v44, %v2359_v48  ;;  %vm6890_vm8 = vmmov %vm6889_vm12  ;;  %v2155_v6 = vadd.f32 %v2153_v12, %v2115_v56  ;;  %v6907_v41 = vld [vmem:[#allocation40_spill] sm:$0xff] }
 0x423   : > { %v2362_v27 = vsel %vm6890_vm8, %v2359_v48, %v2357_v44  ;;  %v2334_v43 = vmul.f32 %v6891_v16, %v2321_v37  ;;  %v6892_v55 = vmov %v6891_v16  ;;  %v6894_v51 = vrot.slane %v6893_v28, %v3631_v63  ;;  %v2477_v48 = vpop.permute.xlu1 %2476 }
 0x424   : > { %v2335_v49 = vmul.f32 %v6892_v55, %v2322_v19  ;;  %v6895_v61 = vrot.slane %v6893_v28, %v3634_v39  ;;  %v2299_v42 = vadd.f32 %v6896_v54, %v2294_v10  ;;  %v2300_v59 = vadd.f32 %v6897_v17, %v2295_v32  ;;  %v6917_v54 = vld [vmem:[#allocation24_spill] sm:$0xff]  ;;  %v6918_v17 = vld [vmem:[#allocation25_spill] sm:$0xff] }
 0x425   : > { %v2232_v13 = vmul.f32 %v6894_v51, %v2219_v53  ;;  %v6898_v44 = vstv %s5664_s7  ;;  %v2401_v22 = vsel %vm2400_vm10, %v2397_v1, %v2399_v58  ;;  %v2402_v29 = vsel %vm2400_vm10, %v2399_v58, %v2397_v1  ;;  %v6903_v53 = vld [vmem:[#allocation20_spill] sm:$0xff]  ;;  %v2519_v1 = vpop.permute.xlu0 %2518 }
 0x426   : > { %v2233_v18 = vmul.f32 %v6895_v61, %v2220_v2  ;;  %v2374_v45 = vmul.f32 %v6898_v44, %v2361_v50  ;;  %v6899_v35 = vmov %v6898_v44  ;;  %v2194_v52 = vadd.f32 %v2192_v30, %v2154_v40  ;;  %v6904_v2 = vld [vmem:[#allocation21_spill] sm:$0xff] }
 0x427   : > { %v2375_v23 = vmul.f32 %v6899_v35, %v2362_v27  ;;  %v2195_v11 = vadd.f32 %v2193_v20, %v2155_v6  ;;  %v6901_v8 = vrot.slane %v6900_v57, %v3631_v63  ;;  %v6902_v12 = vrot.slane %v6900_v57, %v3634_v39  ;;  %v2517_v7 = vpop.permute.xlu1 %2516 }
 0x428   : > { %v2339_v5 = vadd.f32 %v6903_v53, %v2334_v43  ;;  %v2340_v62 = vadd.f32 %v6904_v2, %v2335_v49  ;;  %v2441_v10 = vsel %vm2440_vm15, %v2437_v21, %v2439_v3  ;;  %v2442_v58 = vsel %vm2440_vm15, %v2439_v3, %v2437_v21  ;;  %v6914_v49 = vld [vmem:[#allocation41_spill] sm:$0xff] }
 0x429   : > { %v2272_v0 = vmul.f32 %v6901_v8, %v2259_v33  ;;  %v2273_v26 = vmul.f32 %v6902_v12, %v2260_v9  ;;  %v2234_v14 = vadd.f32 %v2232_v13, %v2194_v52  ;;  %v2235_v32 = vadd.f32 %v2233_v18, %v2195_v11  ;;  %v6910_v33 = vld [vmem:[#allocation22_spill] sm:$0xff]  ;;  %v6911_v9 = vld [vmem:[#allocation23_spill] sm:$0xff]  ;;  %v2559_v18 = vpop.permute.xlu0 %2558 }
 0x42a   : > { %v6905_v37 = vstv %s5695_s24  ;;  %v6908_v30 = vrot.slane %v6907_v41, %v3631_v63  ;;  %v6909_v20 = vrot.slane %v6907_v41, %v3634_v39  ;;  %v2379_v47 = vadd.f32 %v6910_v33, %v2374_v45  ;;  %v6921_v11 = vld [vmem:[#allocation42_spill] sm:$0xff]  ;;  %s6961_s24 = sld [smem:[#allocation83_spill]] }
 0x42b   : > { %v2414_v19 = vmul.f32 %v6905_v37, %v2401_v22  ;;  %v6906_v25 = vmov %v6905_v37  ;;  %v2380_v3 = vadd.f32 %v6911_v9, %v2375_v23  ;;  %v6912_v21 = vstv %s5711_s21  ;;  %v2557_v44 = vpop.permute.xlu1 %2556 }
 0x42c   : > { %v2415_v56 = vmul.f32 %v6906_v25, %v2402_v29  ;;  %v2312_v38 = vmul.f32 %v6908_v30, %v2299_v42  ;;  %v2313_v60 = vmul.f32 %v6909_v20, %v2300_v59  ;;  %v2454_v50 = vmul.f32 %v6912_v21, %v2441_v10 }
 0x42d   : > { %v6913_v27 = vmov %v6912_v21  ;;  %v2481_v6 = vsel %vm2480_vm0, %v2477_v48, %v2479_v34  ;;  %v2482_v16 = vsel %vm2480_vm0, %v2479_v34, %v2477_v48  ;;  %v2274_v43 = vadd.f32 %v2272_v0, %v2234_v14  ;;  %v2599_v37 = vpop.permute.xlu0 %2598 }
 0x42e   : > { %v2455_v40 = vmul.f32 %v6913_v27, %v2442_v58  ;;  %v2275_v55 = vadd.f32 %v2273_v26, %v2235_v32  ;;  %v6915_v28 = vrot.slane %v6914_v49, %v3631_v63  ;;  %v6916_v13 = vrot.slane %v6914_v49, %v3634_v39  ;;  %v6924_v26 = vld [vmem:[#allocation26_spill] sm:$0xff] }
 0x42f   : > { %v2419_v42 = vadd.f32 %v6917_v54, %v2414_v19  ;;  %v2420_v59 = vadd.f32 %v6918_v17, %v2415_v56  ;;  %v2521_v34 = vsel %vm2520_vm1, %v2517_v7, %v2519_v1  ;;  %v2522_v48 = vsel %vm2520_vm1, %v2519_v1, %v2517_v7  ;;  %v6928_v56 = vld [vmem:[#allocation43_spill] sm:$0xff]  ;;  %v2597_v20 = vpop.permute.xlu1 %2596  ;;  %v6939_v54 = vld [vmem:[#allocation29_spill] sm:$0xff] }
 0x430   : > { %v2352_v51 = vmul.f32 %v6915_v28, %v2339_v5  ;;  %v2353_v61 = vmul.f32 %v6916_v13, %v2340_v62  ;;  %v2314_v45 = vadd.f32 %v2312_v38, %v2274_v43  ;;  %v2315_v35 = vadd.f32 %v2313_v60, %v2275_v55  ;;  %v6925_v5 = vld [vmem:[#allocation10_spill] sm:$0xff]  ;;  %v6931_v60 = vld [vmem:[#allocation9_spill] sm:$0xff]  ;;  %v6935_v55 = vld [vmem:[#allocation44_spill] sm:$0xff] }
 0x431   : > { %v6919_v23 = vstv %s5725_s14  ;;  %v6922_v57 = vrot.slane %v6921_v11, %v3631_v63  ;;  %v6923_v0 = vrot.slane %v6921_v11, %v3634_v39  ;;  %v2459_v53 = vadd.f32 %v6924_v26, %v2454_v50  ;;  %v2639_v17 = vpop.permute.xlu0 %2638 }
 0x432   : > { %v2494_v22 = vmul.f32 %v6919_v23, %v2481_v6  ;;  %v6920_v29 = vmov %v6919_v23  ;;  %v2460_v2 = vadd.f32 %v6925_v5, %v2455_v40  ;;  %v6926_v62 = vstv %s5770_s4 }
 0x433   : > { %v2495_v52 = vmul.f32 %v6920_v29, %v2482_v16  ;;  %v2392_v8 = vmul.f32 %v6922_v57, %v2379_v47  ;;  %v2393_v12 = vmul.f32 %v6923_v0, %v2380_v3  ;;  %v2534_v10 = vmul.f32 %v6926_v62, %v2521_v34  ;;  %v6932_v47 = vld [vmem:[#allocation27_spill] sm:$0xff] }
 0x434   : > { %v6927_v58 = vmov %v6926_v62  ;;  %v2561_v14 = vsel %vm2560_vm4, %v2557_v44, %v2559_v18  ;;  %v2562_v32 = vsel %vm2560_vm4, %v2559_v18, %v2557_v44  ;;  %v2354_v19 = vadd.f32 %v2352_v51, %v2314_v45 }
 0x435   : > { %v2535_v1 = vmul.f32 %v6927_v58, %v2522_v48  ;;  %v2355_v25 = vadd.f32 %v2353_v61, %v2315_v35  ;;  %v6929_v7 = vrot.slane %v6928_v56, %v3631_v63  ;;  %v6930_v30 = vrot.slane %v6928_v56, %v3634_v39  ;;  %v6938_v61 = vld [vmem:[#allocation28_spill] sm:$0xff]  ;;  %v2637_v35 = vpop.permute.xlu1 %2636 }
 0x436   : > { %v2499_v33 = vadd.f32 %v6931_v60, %v2494_v22  ;;  %v2500_v9 = vadd.f32 %v6932_v47, %v2495_v52  ;;  %v2601_v3 = vsel %vm2600_vm5, %v2597_v20, %v2599_v37  ;;  %v2602_v21 = vsel %vm2600_vm5, %v2599_v37, %v2597_v20 }
 0x437   : > { %v2432_v41 = vmul.f32 %v6929_v7, %v2419_v42  ;;  %v2433_v38 = vmul.f32 %v6930_v30, %v2420_v59  ;;  %v2394_v50 = vadd.f32 %v2392_v8, %v2354_v19  ;;  %v2395_v27 = vadd.f32 %v2393_v12, %v2355_v25  ;;  %v6201_v59 = vld [vmem:[%s6624_s28 + $0x56] ss:$8 sm:$0x3] }
 0x438   : > { %v6933_v40 = vstv %s5772_s8  ;;  %v6936_v49 = vrot.slane %v6935_v55, %v3631_v63  ;;  %v6937_v51 = vrot.slane %v6935_v55, %v3634_v39  ;;  %v2539_v18 = vadd.f32 %v6938_v61, %v2534_v10  ;;  %v6942_v8 = vld [vmem:[#allocation30_spill] sm:$0xff]  ;;  %v6954_v61 = vld [vmem:[#allocation36_spill] sm:$0xff] }
 0x439   : > { %v2574_v6 = vmul.f32 %v6933_v40, %v2561_v14  ;;  %v6934_v16 = vmov %v6933_v40  ;;  %v2540_v42 = vadd.f32 %v6939_v54, %v2535_v1  ;;  %v2434_v34 = vadd.f32 %v2432_v41, %v2394_v50  ;;  %v2679_v14 = vpop.permute.xlu0 %2678  ;;  %v6948_v19 = vld [vmem:[#allocation34_spill] sm:$0xff]  ;;  %v2677_v41 = vpop.permute.xlu1 %2676 }
 0x43a   : > { %v2575_v43 = vmul.f32 %v6934_v16, %v2562_v32  ;;  %v2472_v28 = vmul.f32 %v6936_v49, %v2459_v53  ;;  %v2473_v13 = vmul.f32 %v6937_v51, %v2460_v2  ;;  %v2435_v48 = vadd.f32 %v2433_v38, %v2395_v27  ;;  %v6947_v32 = vld [vmem:[#allocation32_spill] sm:$0xff]  ;;  %v6953_v51 = vld [vmem:[#allocation35_spill] sm:$0xff] }
 0x43b   : > { %v2614_v44 = vmul.f32 %v2613_v24, %v2601_v3  ;;  %v2615_v45 = vmul.f32 %v2613_v24, %v2602_v21  ;;  %v6940_v23 = vrot.slane %v5784_v36, %v3631_v63  ;;  %v6941_v29 = vrot.slane %v5784_v36, %v3634_v39  ;;  %v6943_v24 = vld [vmem:[#allocation31_spill] sm:$0xff]  ;;  %v6944_v36 = vld [vmem:[#allocation45_spill] sm:$0xff] }
 0x43c   : > { %v2641_v11 = vsel %vm2640_vm7, %v2637_v35, %v2639_v17  ;;  %v2642_v57 = vsel %vm2640_vm7, %v2639_v17, %v2637_v35  ;;  %v2579_v0 = vadd.f32 %v6942_v8, %v2574_v6  ;;  %v2580_v12 = vadd.f32 %v6943_v24, %v2575_v43 }
 0x43d   : > { %v2512_v22 = vmul.f32 %v6940_v23, %v2499_v33  ;;  %v2513_v52 = vmul.f32 %v6941_v29, %v2500_v9  ;;  %v2665_v26 = vrot.slane %v6201_v59, %v3631_v63  ;;  %v2693_v53 = vstv %s6164_s17  ;;  %v2719_v16 = vpop.permute.xlu0 %2718  ;;  %v2717_v54 = vpop.permute.xlu1 %2716 }
 0x43e   : > { %v2474_v5 = vadd.f32 %v2472_v28, %v2434_v34  ;;  %v2475_v2 = vadd.f32 %v2473_v13, %v2435_v48  ;;  %v6945_v62 = vrot.slane %v6944_v36, %v3631_v63  ;;  %v6946_v58 = vrot.slane %v6944_v36, %v3634_v39  ;;  %v6956_v48 = vld [vmem:[#allocation11_spill] sm:$0xff] }
 0x43f   : > { %v2619_v37 = vadd.f32 %v6947_v32, %v2614_v44  ;;  %v2620_v25 = vadd.f32 %v6948_v19, %v2615_v45  ;;  %v2654_v56 = vmul.f32 %v2653_v31, %v2641_v11  ;;  %v2655_v7 = vmul.f32 %v2653_v31, %v2642_v57  ;;  %v3077_v31 = vld [vmem:[%s6624_s28 + $0x57] ss:$8 sm:$0x3] }
 0x440   : > { %v2552_v10 = vmul.f32 %v6945_v62, %v2539_v18  ;;  %v2553_v1 = vmul.f32 %v6946_v58, %v2540_v42  ;;  %v2514_v30 = vadd.f32 %v2512_v22, %v2474_v5  ;;  %v2515_v38 = vadd.f32 %v2513_v52, %v2475_v2 }
 0x441   : > { %v2681_v20 = vsel %vm2680_vm9, %v2677_v41, %v2679_v14  ;;  %v2682_v60 = vsel %vm2680_vm9, %v2679_v14, %v2677_v41  ;;  %v6949_v33 = vrot.slane %v5828_v15, %v3631_v63  ;;  %v6950_v9 = vrot.slane %v5828_v15, %v3634_v39  ;;  %v3080_v15 = vld [vmem:[%s6624_s28 + $0x60] ss:$8 sm:$0x3]  ;;  %v2726_v11 = vpop.permute.xlu0 %2725  ;;  %s6957_s28 = sld [smem:[#allocation6_spill]] }
 0x442   : > { %v2694_v21 = vmul.f32 %v2693_v53, %v2681_v20  ;;  %v2695_v50 = vmul.f32 %v2693_v53, %v2682_v60  ;;  %v2554_v27 = vadd.f32 %v2552_v10, %v2514_v30  ;;  %v2555_v40 = vadd.f32 %v2553_v1, %v2515_v38  ;;  %v2724_v53 = vpop.permute.xlu1 %2723 }
 0x443   : > { %v2592_v47 = vmul.f32 %v6949_v33, %v2579_v0  ;;  %v2593_v3 = vmul.f32 %v6950_v9, %v2580_v12  ;;  %v2669_v6 = vrot.slane %v6201_v59, %v3634_v39  ;;  %vm2720_vm15 = vcmp.lt.s32.totalorder %v4140_v46, 77  ;;  %v6955_v59 = vld [vmem:[#allocation38_spill] sm:$0xff] }
 0x444   : > { %v6951_v43 = vrot.slane %v5864_v4, %v3631_v63  ;;  %v6952_v49 = vrot.slane %v5864_v4, %v3634_v39  ;;  %v2659_v13 = vadd.f32 %v6953_v51, %v2654_v56  ;;  %v2660_v18 = vadd.f32 %v6954_v61, %v2655_v7 }
 0x445   : > { %v2705_v42 = vrot.slane %v3077_v31, %v3631_v63  ;;  %v2709_v17 = vrot.slane %v3077_v31, %v3634_v39  ;;  %v2699_v34 = vadd.f32 %v6955_v59, %v2694_v21  ;;  %v2700_v44 = vadd.f32 %v6956_v48, %v2695_v50  ;;  %v3200_v59 = vld [vmem:[%s6958_s13 + $0x10] sm:$0xff]  ;;  %v3201_v48 = vld [vmem:[%s6958_s13 + $0x18] sm:$0xff] }
 0x446   : > { %v2632_v55 = vmul.f32 %v6951_v43, %v2619_v37  ;;  %v2633_v28 = vmul.f32 %v6952_v49, %v2620_v25  ;;  %v2594_v45 = vadd.f32 %v2592_v47, %v2554_v27  ;;  %v2595_v35 = vadd.f32 %v2593_v3, %v2555_v40  ;;  %v6959_v27 = vld [vmem:[#allocation8_spill] sm:$0xff] }
 0x447   : > { %v2745_v23 = vrot.slane %v3080_v15, %v3631_v63  ;;  %v2749_v4 = vrot.slane %v3080_v15, %v3634_v39  ;;  %v2733_v22 = vstv %s6228_s19  ;;  %v2721_v29 = vsel %vm2720_vm15, %v2717_v54, %v2719_v16  ;;  %s6960_s15 = sshll.u32 %s6957_s28, 6 }
 0x448   : > { %v2722_v52 = vsel %vm2720_vm15, %v2719_v16, %v2717_v54  ;;  %v2736_v57 = vstv %s6230_s10  ;;  %v2634_v8 = vadd.f32 %v2632_v55, %v2594_v45  ;;  %v2635_v0 = vadd.f32 %v2633_v28, %v2595_v35  ;;  %s6289_s21 = scalar_lea.vmem %s6961_s24, %s6960_s15  ;;  %v3202_v45 = vld [vmem:[%s6958_s13 + $0x20] sm:$0xff] }
 0x449   : > { %v2672_v24 = vmul.f32 %v2665_v26, %v2659_v13  ;;  %v2673_v12 = vmul.f32 %v2669_v6, %v2660_v18  ;;  %v2712_v5 = vmul.f32 %v2705_v42, %v2699_v34  ;;  %v2713_v2 = vmul.f32 %v2709_v17, %v2700_v44  ;;  %v3198_v18 = vld [vmem:[%s6958_s13] sm:$0xff]  ;;  %v3199_v42 = vld [vmem:[%s6958_s13 + $0x8] sm:$0xff] }
 0x44a   : > { %v2727_v36 = vsel %vm2720_vm15, %v2724_v53, %v2726_v11  ;;  %v2728_v62 = vsel %vm2720_vm15, %v2726_v11, %v2724_v53  ;;  %v2734_v10 = vmul.f32 %v2733_v22, %v2721_v29  ;;  %v2735_v58 = vmul.f32 %v2733_v22, %v2722_v52  ;;  %v3205_v22 = vld [vmem:[%s6958_s13 + $0x38] sm:$0xff]  ;;  %v3206_v52 = vld [vmem:[%s6958_s13 + $0x40] sm:$0xff] }
 0x44b   : > { %v2737_v1 = vmul.f32 %v2736_v57, %v2727_v36  ;;  %v2738_v14 = vmul.f32 %v2736_v57, %v2728_v62  ;;  %v2674_v32 = vadd.f32 %v2672_v24, %v2634_v8  ;;  %v2675_v37 = vadd.f32 %v2673_v12, %v2635_v0  ;;  %v3207_v57 = vld [vmem:[%s6958_s13 + $0x48] sm:$0xff]  ;;  %v3208_v0 = vld [vmem:[%s6958_s13 + $0x50] sm:$0xff]  ;;  %v3209_v12 = vld [vmem:[%s6958_s13 + $0x58] sm:$0xff] }
 0x44c   : > { %v3291_v3 = vmov 1966171168   ;;  %v3211_v36 = vld [vmem:[%s6958_s13 + $0x68] sm:$0xff] }
 0x44d   : > { %v2739_v19 = vadd.f32 %v2737_v1, %v2734_v10  ;;  %v2740_v25 = vadd.f32 %v2738_v14, %v2735_v58  ;;  %v2714_v56 = vadd.f32 %v2712_v5, %v2674_v32  ;;  %v2715_v26 = vadd.f32 %v2713_v2, %v2675_v37  ;;  %v3210_v5 = vld [vmem:[%s6958_s13 + $0x60] sm:$0xff]  ;;  %v3212_v10 = vld [vmem:[%s6958_s13 + $0x70] sm:$0xff]  ;;  %v3213_v1 = vld [vmem:[%s6958_s13 + $0x78] sm:$0xff] }
 0x44e   : > { %v2772_v31 = vunpack.c.l.s4 %v3291_v3 }
 0x44f   : > { %v2752_v7 = vmul.f32 %v2745_v23, %v2739_v19  ;;  %v2753_v41 = vmul.f32 %v2749_v4, %v2740_v25 }
 0x450   : > { %v2773_v21 = vunpack.c.0.s8 %v2772_v31 }
 0x451   : > { %v2754_v30 = vadd.f32 %v2752_v7, %v2714_v56  ;;  %v2755_v38 = vadd.f32 %v2753_v41, %v2715_v26 }
 0x452   : > { %v2776_v40 = vsub.s32 %v2773_v21, %v6959_v27 }
 0x453   : > { %v3081_v20 = vmul.f32 -1.442695, %v2754_v30  ;;  %v3082_v60 = vmul.f32 -1.442695, %v2755_v38 }
 0x455   : > { %3190 = vpow2.f32 %v3081_v20 }
 0x456   : > { %3192 = vpow2.f32 %v3082_v60 }
 0x45f   : > { %v3191_v46 = vpop.eup %3190 }
 0x460   : > { %v3193_v33 = vpop.eup %3192  ;;  %v2762_v47 = vadd.f32 1.0, %v3191_v46 }
 0x461   : > { %v2763_v9 = vadd.f32 1.0, %v3193_v33 }
 0x462   : > { %3194 = vrcp.f32 %v2762_v47 }
 0x463   : > { %3196 = vrcp.f32 %v2763_v9 }
 0x46c   : > { %v3195_v50 = vpop.eup %3194 }
 0x46d   : > { %v3197_v6 = vpop.eup %3196 }
 0x46e   : > { %v2770_v16 = vcombine.low %v3195_v50, %v3197_v6 }
 0x470   : > { %v2777_v15 = vrot.slane %v2770_v16, %v2776_v40 }
 0x472   : > { %v2778_v43 = vcombine.high %v2777_v15, %v2777_v15  ;;  %v2785_v55 = vrot.slane %v2777_v15, %v2776_v40 }
 0x474   : > { %v2792_v49 = vrot.slane %v2778_v43, %v2776_v40  ;;  %v2796_v28 = vrot.slane %v2785_v55, %v3631_v63  ;;  %v2800_v51 = vrot.slane %v2785_v55, %v3634_v39 }
 0x476   : > { %v2804_v13 = vrot.slane %v2792_v49, %v3631_v63  ;;  %v2808_v61 = vrot.slane %v2792_v49, %v3634_v39  ;;  %v2813_v54 = vmul.f32 %v3198_v18, %v2796_v28  ;;  %v2814_v17 = vmul.f32 %v3199_v42, %v2800_v51  ;;  %v3203_v63 = vld [vmem:[%s6958_s13 + $0x28] sm:$0xff]  ;;  %v3204_v39 = vld [vmem:[%s6958_s13 + $0x30] sm:$0xff] }
 0x477   : > { %v2815_v34 = vmul.f32 %v3200_v59, %v2796_v28  ;;  %v2816_v44 = vmul.f32 %v3201_v48, %v2800_v51  ;;  %v2817_v35 = vmul.f32 %v3202_v45, %v2796_v28  ;;  %v2818_v23 = vmul.f32 %v3203_v63, %v2800_v51 }
 0x478   : > { %v2819_v4 = vmul.f32 %v3204_v39, %v2796_v28  ;;  %v2820_v29 = vmul.f32 %v3205_v22, %v2800_v51  ;;  %v2821_v11 = vmul.f32 %v3206_v52, %v2804_v13  ;;  %v2822_v8 = vmul.f32 %v3207_v57, %v2808_v61  ;;  %2829 = vst [vmem:[%s6289_s21] sm:$0xff] %v2813_v54 }
 0x479   : > { %2830 = vst [vmem:[%s6289_s21 + $0x8] sm:$0xff] %v2814_v17  ;;  %v2823_v24 = vmul.f32 %v3208_v0, %v2804_v13  ;;  %v2824_v53 = vmul.f32 %v3209_v12, %v2808_v61  ;;  %v2825_v2 = vmul.f32 %v3210_v5, %v2804_v13  ;;  %v2826_v62 = vmul.f32 %v3211_v36, %v2808_v61 }
 0x47a   : > { %2831 = vst [vmem:[%s6289_s21 + $0x10] sm:$0xff] %v2815_v34  ;;  %2832 = vst [vmem:[%s6289_s21 + $0x18] sm:$0xff] %v2816_v44  ;;  %v2827_v58 = vmul.f32 %v3212_v10, %v2804_v13  ;;  %v2828_v14 = vmul.f32 %v3213_v1, %v2808_v61 }
 0x47b   : > { %2833 = vst [vmem:[%s6289_s21 + $0x20] sm:$0xff] %v2817_v35  ;;  %2834 = vst [vmem:[%s6289_s21 + $0x28] sm:$0xff] %v2818_v23 }
 0x47c   : > { %2835 = vst [vmem:[%s6289_s21 + $0x30] sm:$0xff] %v2819_v4  ;;  %2836 = vst [vmem:[%s6289_s21 + $0x38] sm:$0xff] %v2820_v29 }
 0x47d   : > { %2837 = vst [vmem:[%s6289_s21 + $0x40] sm:$0xff] %v2821_v11  ;;  %2838 = vst [vmem:[%s6289_s21 + $0x48] sm:$0xff] %v2822_v8 }
 0x47e   : > { %2839 = vst [vmem:[%s6289_s21 + $0x50] sm:$0xff] %v2823_v24  ;;  %2840 = vst [vmem:[%s6289_s21 + $0x58] sm:$0xff] %v2824_v53 }
 0x47f   : > { %2841 = vst [vmem:[%s6289_s21 + $0x60] sm:$0xff] %v2825_v2  ;;  %2842 = vst [vmem:[%s6289_s21 + $0x68] sm:$0xff] %v2826_v62 }
 0x480   : > { %2843 = vst [vmem:[%s6289_s21 + $0x70] sm:$0xff] %v2827_v58  ;;  %2844 = vst [vmem:[%s6289_s21 + $0x78] sm:$0xff] %v2828_v14 }
 0x481 PF: > { %s6962_s14 = sld [smem:[#allocation5_spill]] }
 0x487   : > { %s16_s18 = sadd.s32 1, %s6962_s14  }
 0x488   : > { %p13_p1 = scmp.ge.s32.totalorder %s16_s18, 4  }
 0x48a   :  { %15 = sbr.rel (!%p13_p1) target bundleno = 8 (0x8), region = 123 }
 0x491   :  { %2869 = vsyncpa [#allocation3], 1 }
 0x492   :  { %2871 = vsyncpa [#allocation3 + $0x1], 1 }

</bundles_post_ra>
